<compile_context>
chip_gen: v7x
topology: tpu7x:2x2x1
jax: 0.10.0
libtpu: 0.0.40
codegen_flags: <defaults>
</compile_context>

<pallas_src>
import functools

import jax
import jax.numpy as jnp
from jax import lax
from jax.experimental import pallas as pl
from jax.experimental.pallas import tpu as pltpu

NEG_INF = float("-inf")


def _silu(y):
    # Exact sigmoid (divide) kept for tight numerical agreement with the
    # reference; exp already runs on the EUP slot.
    return y * (1.0 / (1.0 + jnp.exp(-y)))


def sppf_kernel(x_ref, w1_ref, s1_ref, b1_ref, w2_ref, s2_ref, b2_ref, o_ref, *, k):
    H, W, C1 = x_ref.shape
    HW = H * W
    c_ = w1_ref.shape[1]
    c2 = w2_ref.shape[2]
    r = k // 2

    # ---- cv1: 1x1 conv == channel matmul (bf16 operands, f32 acc) + BN + SiLU
    xb = x_ref[...].reshape(HW, C1).astype(jnp.bfloat16)
    y = jnp.dot(xb, w1_ref[...], preferred_element_type=jnp.float32)
    y = y * s1_ref[...] + b1_ref[...]
    x0 = _silu(y)                                     # (HW, c_), f32

    # ---- boundary masks for the roll-based shifts (hoisted once; reused by
    #      all three pools).  Flattened index i = h*W + w.
    idx = lax.broadcasted_iota(jnp.int32, (HW, 1), 0)                        # i
    wpos = lax.broadcasted_iota(jnp.int32, (H, W, 1), 1).reshape(HW, 1)      # w

    w_shifts = []   # shifts along W: flattened shift d,   d = 1..r
    h_shifts = []   # shifts along H: flattened shift d*W
    for d in range(1, r + 1):
        w_shifts.append((d, wpos < (W - d), wpos >= d))
        h_shifts.append((d * W, idx < (H - d) * W, idx >= d * W))

    def window_max(a, shifts):
        # Max over the (2r+1)-wide window along one spatial axis, -inf padded.
        # roll(a, HW - s)[i] == a[i + s]   (circular; wrap killed by the mask)
        # roll(a, s)[i]      == a[i - s]
        m = a
        for s, ok_plus, ok_minus in shifts:
            plus = jnp.where(ok_plus, pltpu.roll(a, HW - s, axis=0), NEG_INF)
            minus = jnp.where(ok_minus, pltpu.roll(a, s, axis=0), NEG_INF)
            m = jnp.maximum(m, jnp.maximum(plus, minus))
        return m

    def maxpool(a):
        # Separable k x k max pool, stride 1, SAME, implicit -inf padding.
        return window_max(window_max(a, w_shifts), h_shifts)

    y1 = maxpool(x0)
    y2 = maxpool(y1)
    y3 = maxpool(y2)

    # ---- cv2: split-K accumulation instead of a lane-axis concat
    z = jnp.dot(x0.astype(jnp.bfloat16), w2_ref[0], preferred_element_type=jnp.float32)
    z = z + jnp.dot(y1.astype(jnp.bfloat16), w2_ref[1], preferred_element_type=jnp.float32)
    z = z + jnp.dot(y2.astype(jnp.bfloat16), w2_ref[2], preferred_element_type=jnp.float32)
    z = z + jnp.dot(y3.astype(jnp.bfloat16), w2_ref[3], preferred_element_type=jnp.float32)
    z = z * s2_ref[...] + b2_ref[...]
    z = _silu(z)
    o_ref[...] = z.reshape(H, W, c2).astype(o_ref.dtype)


def sppf_forward(x_nchw, params, k=5):
    x = jnp.transpose(x_nchw, (0, 2, 3, 1)).astype(jnp.float32)   # NCHW -> NHWC
    N, H, W, C1 = x.shape
    w1 = params["w1"].astype(jnp.bfloat16)                        # (C1, c_)
    c_ = w1.shape[1]
    c2 = params["w2"].shape[1]
    w2s = params["w2"].reshape(4, c_, c2).astype(jnp.bfloat16)    # split slabs
    s1, b1, s2, b2 = params["s1"], params["b1"], params["s2"], params["b2"]

    # Explicit VMEM budget: double-buffered in/out blocks + weights + an
    # estimate of the in-kernel intermediates, clamped with headroom.
    # (Upper clamp stays below the v7x 64 MiB physical VMEM per TensorCore.)
    f32b, bf16b = 4, 2
    blk_in = H * W * C1 * f32b
    blk_out = H * W * c2 * f32b
    interm = H * W * (4 * c_ * f32b + 4 * c_ * bf16b + c2 * f32b) * 2
    wgts = (C1 * c_ + 4 * c_ * c2) * bf16b + 2 * (c_ + c2) * f32b
    vmem_limit = int(min(max(2 * (blk_in + blk_out) + wgts + interm, 32 << 20),
                         60 << 20))

    out = pl.pallas_call(
        functools.partial(sppf_kernel, k=k),
        out_shape=jax.ShapeDtypeStruct((N, H, W, c2), jnp.float32),
        grid_spec=pltpu.PrefetchScalarGridSpec(
            num_scalar_prefetch=0,
            grid=(N,),
            in_specs=[
                pl.BlockSpec((None, H, W, C1), lambda n: (n, 0, 0, 0)),
                pl.BlockSpec((C1, c_), lambda n: (0, 0)),
                pl.BlockSpec((1, c_), lambda n: (0, 0)),
                pl.BlockSpec((1, c_), lambda n: (0, 0)),
                pl.BlockSpec((4, c_, c2), lambda n: (0, 0, 0)),
                pl.BlockSpec((1, c2), lambda n: (0, 0)),
                pl.BlockSpec((1, c2), lambda n: (0, 0)),
            ],
            out_specs=pl.BlockSpec((None, H, W, c2), lambda n: (n, 0, 0, 0)),
        ),
        compiler_params=pltpu.CompilerParams(
            dimension_semantics=("parallel",),
            vmem_limit_bytes=vmem_limit,
        ),
    )(x, w1, s1, b1, w2s, s2, b2)
    return jnp.transpose(out, (0, 3, 1, 2))                       # NHWC -> NCHW


def sppf_reference(x_nchw, params, k=5):
    """Pure-JAX reference of the SPPF forward with the same precision policy
    (bf16 matmul operands, f32 accumulation / BN / SiLU, f32 pooling)."""
    x = jnp.transpose(x_nchw, (0, 2, 3, 1)).astype(jnp.float32)

    def conv_bn_silu(a, w, s, b):
        y = jnp.einsum("nhwc,cd->nhwd",
                       a.astype(jnp.bfloat16), w.astype(jnp.bfloat16),
                       preferred_element_type=jnp.float32)
        y = y * s + b
        return y * jax.nn.sigmoid(y)

    def mp(a):
        return lax.reduce_window(a, -jnp.inf, lax.max,
                                 (1, k, k, 1), (1, 1, 1, 1), "SAME")

    x0 = conv_bn_silu(x, params["w1"], params["s1"], params["b1"])
    y1 = mp(x0)
    y2 = mp(y1)
    y3 = mp(y2)
    cat = jnp.concatenate([x0, y1, y2, y3], axis=-1)
    out = conv_bn_silu(cat, params["w2"], params["s2"], params["b2"])
    return jnp.transpose(out, (0, 3, 1, 2))


def make_params(key, c1, c2):
    """Deterministic synthetic parameters; BN (eval mode) folded to scale/bias."""
    c_ = c1 // 2
    eps = 1e-5
    ks = jax.random.split(key, 10)

    def bn_fold(kg, kb, km, kv, c):
        gamma = 1.0 + 0.1 * jax.random.normal(kg, (c,), jnp.float32)
        beta = 0.1 * jax.random.normal(kb, (c,), jnp.float32)
        mean = 0.1 * jax.random.normal(km, (c,), jnp.float32)
        var = jax.random.uniform(kv, (c,), jnp.float32, 0.5, 1.5)
        scale = gamma / jnp.sqrt(var + eps)
        bias = beta - mean * scale
        return scale[None, :], bias[None, :]

    # torch Conv2d weight layout is (out, in, 1, 1); stored as (in, out).
    w1_t = 0.2 * jax.random.normal(ks[0], (c_, c1), jnp.float32)
    w2_t = 0.2 * jax.random.normal(ks[1], (c2, 4 * c_), jnp.float32)
    s1, b1 = bn_fold(ks[2], ks[3], ks[4], ks[5], c_)
    s2, b2 = bn_fold(ks[6], ks[7], ks[8], ks[9], c2)
    return {"w1": w1_t.T, "s1": s1, "b1": b1,
            "w2": w2_t.T, "s2": s2, "b2": b2}


if __name__ == "__main__":
    key = jax.random.PRNGKey(0)
    k_x, k_p = jax.random.split(key)

    N, C1, H, W = 2, 8, 16, 16   # c_ = 4, concat channels = 16
    C2 = 16
    x = jax.random.normal(k_x, (N, C1, H, W), jnp.float32)
    params = make_params(k_p, C1, C2)

    out = sppf_forward(x, params, k=5)
    out = jax.block_until_ready(out)

    ref = sppf_reference(x, params, k=5)
    assert out.shape == (N, C2, H, W), out.shape
    err = float(jnp.max(jnp.abs(out - ref)))
    assert err < 1e-3, err

    print("KERNEL_OK")
</pallas_src>

<mosaic_0001>
module attributes {stable_mosaic.version = 11 : i64} {
  func.func @sppf_kernel(%arg0: i32, %arg1: memref<1x16x16x8xf32, #tpu.memory_space<vmem>>, %arg2: memref<8x4xbf16, #tpu.memory_space<vmem>>, %arg3: memref<1x4xf32, #tpu.memory_space<vmem>>, %arg4: memref<1x4xf32, #tpu.memory_space<vmem>>, %arg5: memref<4x4x16xbf16, #tpu.memory_space<vmem>>, %arg6: memref<1x16xf32, #tpu.memory_space<vmem>>, %arg7: memref<1x16xf32, #tpu.memory_space<vmem>>, %arg8: memref<1x16x16x16xf32, #tpu.memory_space<vmem>>) attributes {dimension_semantics = [#tpu.dimension_semantics<parallel>], iteration_bounds = array<i64: 2>, scalar_prefetch = 0 : i64, scratch_operands = 0 : i64, tpu.core_type = #tpu.core_type<tc>, window_params = [{transform_indices = @transform_0, window_bounds = array<i64: 1, 16, 16, 8>}, {pipeline_mode = #tpu.pipeline_mode<synchronous>, transform_indices = @transform_1, window_bounds = array<i64: 8, 4>}, {pipeline_mode = #tpu.pipeline_mode<synchronous>, transform_indices = @transform_2, window_bounds = array<i64: 1, 4>}, {pipeline_mode = #tpu.pipeline_mode<synchronous>, transform_indices = @transform_3, window_bounds = array<i64: 1, 4>}, {pipeline_mode = #tpu.pipeline_mode<synchronous>, transform_indices = @transform_4, window_bounds = array<i64: 4, 4, 16>}, {pipeline_mode = #tpu.pipeline_mode<synchronous>, transform_indices = @transform_5, window_bounds = array<i64: 1, 16>}, {pipeline_mode = #tpu.pipeline_mode<synchronous>, transform_indices = @transform_6, window_bounds = array<i64: 1, 16>}, {transform_indices = @transform_7, window_bounds = array<i64: 1, 16, 16, 16>}]} {
    %c0 = arith.constant 0 : index
    %c0_0 = arith.constant 0 : index
    %c0_1 = arith.constant 0 : index
    %c0_2 = arith.constant 0 : index
    %0 = vector.load %arg1[%c0, %c0_0, %c0_1, %c0_2] : memref<1x16x16x8xf32, #tpu.memory_space<vmem>>, vector<1x16x16x8xf32>
    %1 = vector.shape_cast %0 : vector<1x16x16x8xf32> to vector<16x16x8xf32>
    %2 = vector.shape_cast %1 : vector<16x16x8xf32> to vector<256x8xf32>
    %3 = arith.truncf %2 : vector<256x8xf32> to vector<256x8xbf16>
    %c0_3 = arith.constant 0 : index
    %c0_4 = arith.constant 0 : index
    %4 = vector.load %arg2[%c0_3, %c0_4] : memref<8x4xbf16, #tpu.memory_space<vmem>>, vector<8x4xbf16>
    %cst = arith.constant dense<0.000000e+00> : vector<256x4xf32>
    %5 = tpu.matmul %3, %4, %cst {dimension_numbers = #tpu.dot_dimension_numbers<[1], [0], [0], [1], [0, 0, 1, 1], [], []>} : vector<256x8xbf16>, vector<8x4xbf16>, vector<256x4xf32> -> vector<256x4xf32>
    %c0_5 = arith.constant 0 : index
    %c0_6 = arith.constant 0 : index
    %6 = vector.load %arg3[%c0_5, %c0_6] : memref<1x4xf32, #tpu.memory_space<vmem>>, vector<1x4xf32>
    %7 = vector.broadcast %6 : vector<1x4xf32> to vector<256x4xf32>
    %8 = arith.mulf %5, %7 : vector<256x4xf32>
    %c0_7 = arith.constant 0 : index
    %c0_8 = arith.constant 0 : index
    %9 = vector.load %arg4[%c0_7, %c0_8] : memref<1x4xf32, #tpu.memory_space<vmem>>, vector<1x4xf32>
    %10 = vector.broadcast %9 : vector<1x4xf32> to vector<256x4xf32>
    %11 = arith.addf %8, %10 : vector<256x4xf32>
    %cst_9 = arith.constant 0.000000e+00 : f32
    %12 = vector.broadcast %cst_9 : f32 to vector<256x4xf32>
    %13 = arith.subf %12, %11 : vector<256x4xf32>
    %14 = math.exp %13 : vector<256x4xf32>
    %cst_10 = arith.constant 1.000000e+00 : f32
    %15 = vector.broadcast %cst_10 : f32 to vector<256x4xf32>
    %16 = arith.addf %15, %14 : vector<256x4xf32>
    %cst_11 = arith.constant 1.000000e+00 : f32
    %17 = vector.broadcast %cst_11 : f32 to vector<256x4xf32>
    %18 = arith.divf %17, %16 : vector<256x4xf32>
    %19 = arith.mulf %11, %18 : vector<256x4xf32>
    %20 = tpu.iota {dimensions = array<i32: 0>} : vector<256x1xi32>
    %21 = tpu.iota {dimensions = array<i32: 1>} : vector<16x16x1xi32>
    %22 = vector.shape_cast %21 : vector<16x16x1xi32> to vector<256x1xi32>
    %c15_i32 = arith.constant 15 : i32
    %23 = vector.broadcast %c15_i32 : i32 to vector<256x1xi32>
    %24 = arith.cmpi slt, %22, %23 : vector<256x1xi32>
    %c1_i32 = arith.constant 1 : i32
    %25 = vector.broadcast %c1_i32 : i32 to vector<256x1xi32>
    %26 = arith.cmpi sge, %22, %25 : vector<256x1xi32>
    %c240_i32 = arith.constant 240 : i32
    %27 = vector.broadcast %c240_i32 : i32 to vector<256x1xi32>
    %28 = arith.cmpi slt, %20, %27 : vector<256x1xi32>
    %c16_i32 = arith.constant 16 : i32
    %29 = vector.broadcast %c16_i32 : i32 to vector<256x1xi32>
    %30 = arith.cmpi sge, %20, %29 : vector<256x1xi32>
    %c14_i32 = arith.constant 14 : i32
    %31 = vector.broadcast %c14_i32 : i32 to vector<256x1xi32>
    %32 = arith.cmpi slt, %22, %31 : vector<256x1xi32>
    %c2_i32 = arith.constant 2 : i32
    %33 = vector.broadcast %c2_i32 : i32 to vector<256x1xi32>
    %34 = arith.cmpi sge, %22, %33 : vector<256x1xi32>
    %c224_i32 = arith.constant 224 : i32
    %35 = vector.broadcast %c224_i32 : i32 to vector<256x1xi32>
    %36 = arith.cmpi slt, %20, %35 : vector<256x1xi32>
    %c32_i32 = arith.constant 32 : i32
    %37 = vector.broadcast %c32_i32 : i32 to vector<256x1xi32>
    %38 = arith.cmpi sge, %20, %37 : vector<256x1xi32>
    %c255_i32 = arith.constant 255 : i32
    %39 = tpu.dynamic_rotate %19 by %c255_i32 dim 0 : vector<256x4xf32>, i32 -> vector<256x4xf32>
    %cst_12 = arith.constant 0xFF800000 : f32
    %40 = vector.shape_cast %24 : vector<256x1xi1> to vector<256x1xi1>
    %41 = vector.broadcast %40 : vector<256x1xi1> to vector<256x4xi1>
    %42 = vector.broadcast %cst_12 : f32 to vector<256x4xf32>
    %43 = arith.select %41, %39, %42 : vector<256x4xi1>, vector<256x4xf32>
    %c1_i32_13 = arith.constant 1 : i32
    %44 = tpu.dynamic_rotate %19 by %c1_i32_13 dim 0 : vector<256x4xf32>, i32 -> vector<256x4xf32>
    %cst_14 = arith.constant 0xFF800000 : f32
    %45 = vector.shape_cast %26 : vector<256x1xi1> to vector<256x1xi1>
    %46 = vector.broadcast %45 : vector<256x1xi1> to vector<256x4xi1>
    %47 = vector.broadcast %cst_14 : f32 to vector<256x4xf32>
    %48 = arith.select %46, %44, %47 : vector<256x4xi1>, vector<256x4xf32>
    %49 = arith.maximumf %43, %48 : vector<256x4xf32>
    %50 = arith.maximumf %19, %49 : vector<256x4xf32>
    %c254_i32 = arith.constant 254 : i32
    %51 = tpu.dynamic_rotate %19 by %c254_i32 dim 0 : vector<256x4xf32>, i32 -> vector<256x4xf32>
    %cst_15 = arith.constant 0xFF800000 : f32
    %52 = vector.shape_cast %32 : vector<256x1xi1> to vector<256x1xi1>
    %53 = vector.broadcast %52 : vector<256x1xi1> to vector<256x4xi1>
    %54 = vector.broadcast %cst_15 : f32 to vector<256x4xf32>
    %55 = arith.select %53, %51, %54 : vector<256x4xi1>, vector<256x4xf32>
    %c2_i32_16 = arith.constant 2 : i32
    %56 = tpu.dynamic_rotate %19 by %c2_i32_16 dim 0 : vector<256x4xf32>, i32 -> vector<256x4xf32>
    %cst_17 = arith.constant 0xFF800000 : f32
    %57 = vector.shape_cast %34 : vector<256x1xi1> to vector<256x1xi1>
    %58 = vector.broadcast %57 : vector<256x1xi1> to vector<256x4xi1>
    %59 = vector.broadcast %cst_17 : f32 to vector<256x4xf32>
    %60 = arith.select %58, %56, %59 : vector<256x4xi1>, vector<256x4xf32>
    %61 = arith.maximumf %55, %60 : vector<256x4xf32>
    %62 = arith.maximumf %50, %61 : vector<256x4xf32>
    %c240_i32_18 = arith.constant 240 : i32
    %63 = tpu.dynamic_rotate %62 by %c240_i32_18 dim 0 : vector<256x4xf32>, i32 -> vector<256x4xf32>
    %cst_19 = arith.constant 0xFF800000 : f32
    %64 = vector.shape_cast %28 : vector<256x1xi1> to vector<256x1xi1>
    %65 = vector.broadcast %64 : vector<256x1xi1> to vector<256x4xi1>
    %66 = vector.broadcast %cst_19 : f32 to vector<256x4xf32>
    %67 = arith.select %65, %63, %66 : vector<256x4xi1>, vector<256x4xf32>
    %c16_i32_20 = arith.constant 16 : i32
    %68 = tpu.dynamic_rotate %62 by %c16_i32_20 dim 0 : vector<256x4xf32>, i32 -> vector<256x4xf32>
    %cst_21 = arith.constant 0xFF800000 : f32
    %69 = vector.shape_cast %30 : vector<256x1xi1> to vector<256x1xi1>
    %70 = vector.broadcast %69 : vector<256x1xi1> to vector<256x4xi1>
    %71 = vector.broadcast %cst_21 : f32 to vector<256x4xf32>
    %72 = arith.select %70, %68, %71 : vector<256x4xi1>, vector<256x4xf32>
    %73 = arith.maximumf %67, %72 : vector<256x4xf32>
    %74 = arith.maximumf %62, %73 : vector<256x4xf32>
    %c224_i32_22 = arith.constant 224 : i32
    %75 = tpu.dynamic_rotate %62 by %c224_i32_22 dim 0 : vector<256x4xf32>, i32 -> vector<256x4xf32>
    %cst_23 = arith.constant 0xFF800000 : f32
    %76 = vector.shape_cast %36 : vector<256x1xi1> to vector<256x1xi1>
    %77 = vector.broadcast %76 : vector<256x1xi1> to vector<256x4xi1>
    %78 = vector.broadcast %cst_23 : f32 to vector<256x4xf32>
    %79 = arith.select %77, %75, %78 : vector<256x4xi1>, vector<256x4xf32>
    %c32_i32_24 = arith.constant 32 : i32
    %80 = tpu.dynamic_rotate %62 by %c32_i32_24 dim 0 : vector<256x4xf32>, i32 -> vector<256x4xf32>
    %cst_25 = arith.constant 0xFF800000 : f32
    %81 = vector.shape_cast %38 : vector<256x1xi1> to vector<256x1xi1>
    %82 = vector.broadcast %81 : vector<256x1xi1> to vector<256x4xi1>
    %83 = vector.broadcast %cst_25 : f32 to vector<256x4xf32>
    %84 = arith.select %82, %80, %83 : vector<256x4xi1>, vector<256x4xf32>
    %85 = arith.maximumf %79, %84 : vector<256x4xf32>
    %86 = arith.maximumf %74, %85 : vector<256x4xf32>
    %c255_i32_26 = arith.constant 255 : i32
    %87 = tpu.dynamic_rotate %86 by %c255_i32_26 dim 0 : vector<256x4xf32>, i32 -> vector<256x4xf32>
    %cst_27 = arith.constant 0xFF800000 : f32
    %88 = vector.shape_cast %24 : vector<256x1xi1> to vector<256x1xi1>
    %89 = vector.broadcast %88 : vector<256x1xi1> to vector<256x4xi1>
    %90 = vector.broadcast %cst_27 : f32 to vector<256x4xf32>
    %91 = arith.select %89, %87, %90 : vector<256x4xi1>, vector<256x4xf32>
    %c1_i32_28 = arith.constant 1 : i32
    %92 = tpu.dynamic_rotate %86 by %c1_i32_28 dim 0 : vector<256x4xf32>, i32 -> vector<256x4xf32>
    %cst_29 = arith.constant 0xFF800000 : f32
    %93 = vector.shape_cast %26 : vector<256x1xi1> to vector<256x1xi1>
    %94 = vector.broadcast %93 : vector<256x1xi1> to vector<256x4xi1>
    %95 = vector.broadcast %cst_29 : f32 to vector<256x4xf32>
    %96 = arith.select %94, %92, %95 : vector<256x4xi1>, vector<256x4xf32>
    %97 = arith.maximumf %91, %96 : vector<256x4xf32>
    %98 = arith.maximumf %86, %97 : vector<256x4xf32>
    %c254_i32_30 = arith.constant 254 : i32
    %99 = tpu.dynamic_rotate %86 by %c254_i32_30 dim 0 : vector<256x4xf32>, i32 -> vector<256x4xf32>
    %cst_31 = arith.constant 0xFF800000 : f32
    %100 = vector.shape_cast %32 : vector<256x1xi1> to vector<256x1xi1>
    %101 = vector.broadcast %100 : vector<256x1xi1> to vector<256x4xi1>
    %102 = vector.broadcast %cst_31 : f32 to vector<256x4xf32>
    %103 = arith.select %101, %99, %102 : vector<256x4xi1>, vector<256x4xf32>
    %c2_i32_32 = arith.constant 2 : i32
    %104 = tpu.dynamic_rotate %86 by %c2_i32_32 dim 0 : vector<256x4xf32>, i32 -> vector<256x4xf32>
    %cst_33 = arith.constant 0xFF800000 : f32
    %105 = vector.shape_cast %34 : vector<256x1xi1> to vector<256x1xi1>
    %106 = vector.broadcast %105 : vector<256x1xi1> to vector<256x4xi1>
    %107 = vector.broadcast %cst_33 : f32 to vector<256x4xf32>
    %108 = arith.select %106, %104, %107 : vector<256x4xi1>, vector<256x4xf32>
    %109 = arith.maximumf %103, %108 : vector<256x4xf32>
    %110 = arith.maximumf %98, %109 : vector<256x4xf32>
    %c240_i32_34 = arith.constant 240 : i32
    %111 = tpu.dynamic_rotate %110 by %c240_i32_34 dim 0 : vector<256x4xf32>, i32 -> vector<256x4xf32>
    %cst_35 = arith.constant 0xFF800000 : f32
    %112 = vector.shape_cast %28 : vector<256x1xi1> to vector<256x1xi1>
    %113 = vector.broadcast %112 : vector<256x1xi1> to vector<256x4xi1>
    %114 = vector.broadcast %cst_35 : f32 to vector<256x4xf32>
    %115 = arith.select %113, %111, %114 : vector<256x4xi1>, vector<256x4xf32>
    %c16_i32_36 = arith.constant 16 : i32
    %116 = tpu.dynamic_rotate %110 by %c16_i32_36 dim 0 : vector<256x4xf32>, i32 -> vector<256x4xf32>
    %cst_37 = arith.constant 0xFF800000 : f32
    %117 = vector.shape_cast %30 : vector<256x1xi1> to vector<256x1xi1>
    %118 = vector.broadcast %117 : vector<256x1xi1> to vector<256x4xi1>
    %119 = vector.broadcast %cst_37 : f32 to vector<256x4xf32>
    %120 = arith.select %118, %116, %119 : vector<256x4xi1>, vector<256x4xf32>
    %121 = arith.maximumf %115, %120 : vector<256x4xf32>
    %122 = arith.maximumf %110, %121 : vector<256x4xf32>
    %c224_i32_38 = arith.constant 224 : i32
    %123 = tpu.dynamic_rotate %110 by %c224_i32_38 dim 0 : vector<256x4xf32>, i32 -> vector<256x4xf32>
    %cst_39 = arith.constant 0xFF800000 : f32
    %124 = vector.shape_cast %36 : vector<256x1xi1> to vector<256x1xi1>
    %125 = vector.broadcast %124 : vector<256x1xi1> to vector<256x4xi1>
    %126 = vector.broadcast %cst_39 : f32 to vector<256x4xf32>
    %127 = arith.select %125, %123, %126 : vector<256x4xi1>, vector<256x4xf32>
    %c32_i32_40 = arith.constant 32 : i32
    %128 = tpu.dynamic_rotate %110 by %c32_i32_40 dim 0 : vector<256x4xf32>, i32 -> vector<256x4xf32>
    %cst_41 = arith.constant 0xFF800000 : f32
    %129 = vector.shape_cast %38 : vector<256x1xi1> to vector<256x1xi1>
    %130 = vector.broadcast %129 : vector<256x1xi1> to vector<256x4xi1>
    %131 = vector.broadcast %cst_41 : f32 to vector<256x4xf32>
    %132 = arith.select %130, %128, %131 : vector<256x4xi1>, vector<256x4xf32>
    %133 = arith.maximumf %127, %132 : vector<256x4xf32>
    %134 = arith.maximumf %122, %133 : vector<256x4xf32>
    %c255_i32_42 = arith.constant 255 : i32
    %135 = tpu.dynamic_rotate %134 by %c255_i32_42 dim 0 : vector<256x4xf32>, i32 -> vector<256x4xf32>
    %cst_43 = arith.constant 0xFF800000 : f32
    %136 = vector.shape_cast %24 : vector<256x1xi1> to vector<256x1xi1>
    %137 = vector.broadcast %136 : vector<256x1xi1> to vector<256x4xi1>
    %138 = vector.broadcast %cst_43 : f32 to vector<256x4xf32>
    %139 = arith.select %137, %135, %138 : vector<256x4xi1>, vector<256x4xf32>
    %c1_i32_44 = arith.constant 1 : i32
    %140 = tpu.dynamic_rotate %134 by %c1_i32_44 dim 0 : vector<256x4xf32>, i32 -> vector<256x4xf32>
    %cst_45 = arith.constant 0xFF800000 : f32
    %141 = vector.shape_cast %26 : vector<256x1xi1> to vector<256x1xi1>
    %142 = vector.broadcast %141 : vector<256x1xi1> to vector<256x4xi1>
    %143 = vector.broadcast %cst_45 : f32 to vector<256x4xf32>
    %144 = arith.select %142, %140, %143 : vector<256x4xi1>, vector<256x4xf32>
    %145 = arith.maximumf %139, %144 : vector<256x4xf32>
    %146 = arith.maximumf %134, %145 : vector<256x4xf32>
    %c254_i32_46 = arith.constant 254 : i32
    %147 = tpu.dynamic_rotate %134 by %c254_i32_46 dim 0 : vector<256x4xf32>, i32 -> vector<256x4xf32>
    %cst_47 = arith.constant 0xFF800000 : f32
    %148 = vector.shape_cast %32 : vector<256x1xi1> to vector<256x1xi1>
    %149 = vector.broadcast %148 : vector<256x1xi1> to vector<256x4xi1>
    %150 = vector.broadcast %cst_47 : f32 to vector<256x4xf32>
    %151 = arith.select %149, %147, %150 : vector<256x4xi1>, vector<256x4xf32>
    %c2_i32_48 = arith.constant 2 : i32
    %152 = tpu.dynamic_rotate %134 by %c2_i32_48 dim 0 : vector<256x4xf32>, i32 -> vector<256x4xf32>
    %cst_49 = arith.constant 0xFF800000 : f32
    %153 = vector.shape_cast %34 : vector<256x1xi1> to vector<256x1xi1>
    %154 = vector.broadcast %153 : vector<256x1xi1> to vector<256x4xi1>
    %155 = vector.broadcast %cst_49 : f32 to vector<256x4xf32>
    %156 = arith.select %154, %152, %155 : vector<256x4xi1>, vector<256x4xf32>
    %157 = arith.maximumf %151, %156 : vector<256x4xf32>
    %158 = arith.maximumf %146, %157 : vector<256x4xf32>
    %c240_i32_50 = arith.constant 240 : i32
    %159 = tpu.dynamic_rotate %158 by %c240_i32_50 dim 0 : vector<256x4xf32>, i32 -> vector<256x4xf32>
    %cst_51 = arith.constant 0xFF800000 : f32
    %160 = vector.shape_cast %28 : vector<256x1xi1> to vector<256x1xi1>
    %161 = vector.broadcast %160 : vector<256x1xi1> to vector<256x4xi1>
    %162 = vector.broadcast %cst_51 : f32 to vector<256x4xf32>
    %163 = arith.select %161, %159, %162 : vector<256x4xi1>, vector<256x4xf32>
    %c16_i32_52 = arith.constant 16 : i32
    %164 = tpu.dynamic_rotate %158 by %c16_i32_52 dim 0 : vector<256x4xf32>, i32 -> vector<256x4xf32>
    %cst_53 = arith.constant 0xFF800000 : f32
    %165 = vector.shape_cast %30 : vector<256x1xi1> to vector<256x1xi1>
    %166 = vector.broadcast %165 : vector<256x1xi1> to vector<256x4xi1>
    %167 = vector.broadcast %cst_53 : f32 to vector<256x4xf32>
    %168 = arith.select %166, %164, %167 : vector<256x4xi1>, vector<256x4xf32>
    %169 = arith.maximumf %163, %168 : vector<256x4xf32>
    %170 = arith.maximumf %158, %169 : vector<256x4xf32>
    %c224_i32_54 = arith.constant 224 : i32
    %171 = tpu.dynamic_rotate %158 by %c224_i32_54 dim 0 : vector<256x4xf32>, i32 -> vector<256x4xf32>
    %cst_55 = arith.constant 0xFF800000 : f32
    %172 = vector.shape_cast %36 : vector<256x1xi1> to vector<256x1xi1>
    %173 = vector.broadcast %172 : vector<256x1xi1> to vector<256x4xi1>
    %174 = vector.broadcast %cst_55 : f32 to vector<256x4xf32>
    %175 = arith.select %173, %171, %174 : vector<256x4xi1>, vector<256x4xf32>
    %c32_i32_56 = arith.constant 32 : i32
    %176 = tpu.dynamic_rotate %158 by %c32_i32_56 dim 0 : vector<256x4xf32>, i32 -> vector<256x4xf32>
    %cst_57 = arith.constant 0xFF800000 : f32
    %177 = vector.shape_cast %38 : vector<256x1xi1> to vector<256x1xi1>
    %178 = vector.broadcast %177 : vector<256x1xi1> to vector<256x4xi1>
    %179 = vector.broadcast %cst_57 : f32 to vector<256x4xf32>
    %180 = arith.select %178, %176, %179 : vector<256x4xi1>, vector<256x4xf32>
    %181 = arith.maximumf %175, %180 : vector<256x4xf32>
    %182 = arith.maximumf %170, %181 : vector<256x4xf32>
    %183 = arith.truncf %19 : vector<256x4xf32> to vector<256x4xbf16>
    %c0_58 = arith.constant 0 : index
    %c0_59 = arith.constant 0 : index
    %c0_60 = arith.constant 0 : index
    %184 = vector.load %arg5[%c0_58, %c0_59, %c0_60] : memref<4x4x16xbf16, #tpu.memory_space<vmem>>, vector<1x4x16xbf16>
    %185 = vector.shape_cast %184 : vector<1x4x16xbf16> to vector<4x16xbf16>
    %cst_61 = arith.constant dense<0.000000e+00> : vector<256x16xf32>
    %186 = tpu.matmul %183, %185, %cst_61 {dimension_numbers = #tpu.dot_dimension_numbers<[1], [0], [0], [1], [0, 0, 1, 1], [], []>} : vector<256x4xbf16>, vector<4x16xbf16>, vector<256x16xf32> -> vector<256x16xf32>
    %187 = arith.truncf %86 : vector<256x4xf32> to vector<256x4xbf16>
    %c1 = arith.constant 1 : index
    %c0_62 = arith.constant 0 : index
    %c0_63 = arith.constant 0 : index
    %188 = vector.load %arg5[%c1, %c0_62, %c0_63] : memref<4x4x16xbf16, #tpu.memory_space<vmem>>, vector<1x4x16xbf16>
    %189 = vector.shape_cast %188 : vector<1x4x16xbf16> to vector<4x16xbf16>
    %cst_64 = arith.constant dense<0.000000e+00> : vector<256x16xf32>
    %190 = tpu.matmul %187, %189, %cst_64 {dimension_numbers = #tpu.dot_dimension_numbers<[1], [0], [0], [1], [0, 0, 1, 1], [], []>} : vector<256x4xbf16>, vector<4x16xbf16>, vector<256x16xf32> -> vector<256x16xf32>
    %191 = arith.addf %186, %190 : vector<256x16xf32>
    %192 = arith.truncf %134 : vector<256x4xf32> to vector<256x4xbf16>
    %c2 = arith.constant 2 : index
    %c0_65 = arith.constant 0 : index
    %c0_66 = arith.constant 0 : index
    %193 = vector.load %arg5[%c2, %c0_65, %c0_66] : memref<4x4x16xbf16, #tpu.memory_space<vmem>>, vector<1x4x16xbf16>
    %194 = vector.shape_cast %193 : vector<1x4x16xbf16> to vector<4x16xbf16>
    %cst_67 = arith.constant dense<0.000000e+00> : vector<256x16xf32>
    %195 = tpu.matmul %192, %194, %cst_67 {dimension_numbers = #tpu.dot_dimension_numbers<[1], [0], [0], [1], [0, 0, 1, 1], [], []>} : vector<256x4xbf16>, vector<4x16xbf16>, vector<256x16xf32> -> vector<256x16xf32>
    %196 = arith.addf %191, %195 : vector<256x16xf32>
    %197 = arith.truncf %182 : vector<256x4xf32> to vector<256x4xbf16>
    %c3 = arith.constant 3 : index
    %c0_68 = arith.constant 0 : index
    %c0_69 = arith.constant 0 : index
    %198 = vector.load %arg5[%c3, %c0_68, %c0_69] : memref<4x4x16xbf16, #tpu.memory_space<vmem>>, vector<1x4x16xbf16>
    %199 = vector.shape_cast %198 : vector<1x4x16xbf16> to vector<4x16xbf16>
    %cst_70 = arith.constant dense<0.000000e+00> : vector<256x16xf32>
    %200 = tpu.matmul %197, %199, %cst_70 {dimension_numbers = #tpu.dot_dimension_numbers<[1], [0], [0], [1], [0, 0, 1, 1], [], []>} : vector<256x4xbf16>, vector<4x16xbf16>, vector<256x16xf32> -> vector<256x16xf32>
    %201 = arith.addf %196, %200 : vector<256x16xf32>
    %c0_71 = arith.constant 0 : index
    %c0_72 = arith.constant 0 : index
    %202 = vector.load %arg6[%c0_71, %c0_72] : memref<1x16xf32, #tpu.memory_space<vmem>>, vector<1x16xf32>
    %203 = vector.broadcast %202 : vector<1x16xf32> to vector<256x16xf32>
    %204 = arith.mulf %201, %203 : vector<256x16xf32>
    %c0_73 = arith.constant 0 : index
    %c0_74 = arith.constant 0 : index
    %205 = vector.load %arg7[%c0_73, %c0_74] : memref<1x16xf32, #tpu.memory_space<vmem>>, vector<1x16xf32>
    %206 = vector.broadcast %205 : vector<1x16xf32> to vector<256x16xf32>
    %207 = arith.addf %204, %206 : vector<256x16xf32>
    %cst_75 = arith.constant 0.000000e+00 : f32
    %208 = vector.broadcast %cst_75 : f32 to vector<256x16xf32>
    %209 = arith.subf %208, %207 : vector<256x16xf32>
    %210 = math.exp %209 : vector<256x16xf32>
    %cst_76 = arith.constant 1.000000e+00 : f32
    %211 = vector.broadcast %cst_76 : f32 to vector<256x16xf32>
    %212 = arith.addf %211, %210 : vector<256x16xf32>
    %cst_77 = arith.constant 1.000000e+00 : f32
    %213 = vector.broadcast %cst_77 : f32 to vector<256x16xf32>
    %214 = arith.divf %213, %212 : vector<256x16xf32>
    %215 = arith.mulf %207, %214 : vector<256x16xf32>
    %216 = vector.shape_cast %215 : vector<256x16xf32> to vector<16x16x16xf32>
    %c0_78 = arith.constant 0 : index
    %c0_79 = arith.constant 0 : index
    %c0_80 = arith.constant 0 : index
    %c0_81 = arith.constant 0 : index
    %217 = vector.load %arg8[%c0_78, %c0_79, %c0_80, %c0_81] : memref<1x16x16x16xf32, #tpu.memory_space<vmem>>, vector<1x16x16x16xf32>
    %218 = vector.shape_cast %217 : vector<1x16x16x16xf32> to vector<16x16x16xf32>
    %219 = vector.shape_cast %216 : vector<16x16x16xf32> to vector<1x16x16x16xf32>
    tpu.vector_store %arg8[%c0_78, %c0_79, %c0_80, %c0_81], %219 {strides = array<i32>} : memref<1x16x16x16xf32, #tpu.memory_space<vmem>>, vector<1x16x16x16xf32>,
    return
  }
  func.func @transform_0(%arg0: i32) -> (i32, i32, i32, i32) {
    %c0_i32 = arith.constant 0 : i32
    %c0_i32_0 = arith.constant 0 : i32
    %c0_i32_1 = arith.constant 0 : i32
    %c0_i32_2 = arith.constant 0 : i32
    return %arg0, %c0_i32, %c0_i32_0, %c0_i32_1 : i32, i32, i32, i32
  }
  func.func @transform_1(%arg0: i32) -> (i32, i32) {
    %c0_i32 = arith.constant 0 : i32
    %c0_i32_0 = arith.constant 0 : i32
    %c0_i32_1 = arith.constant 0 : i32
    return %c0_i32, %c0_i32_0 : i32, i32
  }
  func.func @transform_2(%arg0: i32) -> (i32, i32) {
    %c0_i32 = arith.constant 0 : i32
    %c0_i32_0 = arith.constant 0 : i32
    %c0_i32_1 = arith.constant 0 : i32
    return %c0_i32, %c0_i32_0 : i32, i32
  }
  func.func @transform_3(%arg0: i32) -> (i32, i32) {
    %c0_i32 = arith.constant 0 : i32
    %c0_i32_0 = arith.constant 0 : i32
    %c0_i32_1 = arith.constant 0 : i32
    return %c0_i32, %c0_i32_0 : i32, i32
  }
  func.func @transform_4(%arg0: i32) -> (i32, i32, i32) {
    %c0_i32 = arith.constant 0 : i32
    %c0_i32_0 = arith.constant 0 : i32
    %c0_i32_1 = arith.constant 0 : i32
    %c0_i32_2 = arith.constant 0 : i32
    return %c0_i32, %c0_i32_0, %c0_i32_1 : i32, i32, i32
  }
  func.func @transform_5(%arg0: i32) -> (i32, i32) {
    %c0_i32 = arith.constant 0 : i32
    %c0_i32_0 = arith.constant 0 : i32
    %c0_i32_1 = arith.constant 0 : i32
    return %c0_i32, %c0_i32_0 : i32, i32
  }
  func.func @transform_6(%arg0: i32) -> (i32, i32) {
    %c0_i32 = arith.constant 0 : i32
    %c0_i32_0 = arith.constant 0 : i32
    %c0_i32_1 = arith.constant 0 : i32
    return %c0_i32, %c0_i32_0 : i32, i32
  }
  func.func @transform_7(%arg0: i32) -> (i32, i32, i32, i32) {
    %c0_i32 = arith.constant 0 : i32
    %c0_i32_0 = arith.constant 0 : i32
    %c0_i32_1 = arith.constant 0 : i32
    %c0_i32_2 = arith.constant 0 : i32
    return %arg0, %c0_i32, %c0_i32_0, %c0_i32_1 : i32, i32, i32, i32
  }
}

</mosaic_0001>

<bundles_post_ra>
// kernel: tpu_custom_call.1
= control target key start
LH: loop header
LB: loop body
LE: loop exit
PB: predicated region body
PF: predicated region fallthrough
CT: control target
= control target key end

     0   :  { %12 = vsyncpa [#allocation3], 0  ;;  %s10046_s0 = inlined_call_operand.vmem [shape: f32[2,16,16,8], index: 0, kind: input, shape index: {}]   ;;  %s10047_s1 = inlined_call_operand.vmem [shape: bf16[8,4], index: 1, kind: input, shape index: {}]   ;;  %s10048_s2 = inlined_call_operand.vmem [shape: f32[1,4], index: 2, kind: input, shape index: {}]   ;;  %s10049_s3 = inlined_call_operand.vmem [shape: f32[1,4], index: 3, kind: input, shape index: {}]   ;;  %s10050_s4 = inlined_call_operand.vmem [shape: bf16[4,4,16], index: 4, kind: input, shape index: {}]   ;;  %s10051_s5 = inlined_call_operand.vmem [shape: f32[1,16], index: 5, kind: input, shape index: {}]   ;;  %s10052_s6 = inlined_call_operand.vmem [shape: f32[1,16], index: 6, kind: input, shape index: {}]   ;;  %s10053_s7 = inlined_call_operand.hbm [shape: f32[2,16,16,16], index: 7, kind: output, shape index: {}]  }
   0x1   :  { %14 = vsyncpa [#allocation3 + $0x1], 0  ;;  %s5852_s24 = smov 0   ;;  %s5854_s25 = smov 0  }
   0x2   :  { %s5856_s26 = smov 0   ;;  %s5858_s27 = smov 0  }
   0x3 LB: > { %s5873_s28 = sadd.s32 4294967295, %s5807_s27   ;;  %s4988_s29 = sadd.s32 4294967294, %s5807_s27   ;;  %s5807_s27 = sphi %s5858_s27, %s10426_s27   ;;  %s5803_s26 = sphi %s5856_s26, %s10425_s26   ;;  %s5799_s25 = sphi %s5854_s25, %s10424_s25   ;;  %s5795_s24 = sphi %s5852_s24, %s10423_s24  }
   0x4   : > { %s5877_s30 = sadd.s32 1, %s5807_s27   ;;  %s179_s8 = sadd.s32 1, %s5803_s26 }
   0x5   : > { %s176_s9 = ssub.s32 %s5807_s27, %s5877_s30  ;;  %p189_p0 = scmp.ne.s32.totalorder %s5803_s26, %s5799_s25 }
   0x6   : > { %p177_p1 = scmp.eq.s32.totalorder %s176_s9, 0  ;;  %p190_p2 = scmp.eq.s32.totalorder %s5873_s28, 1 }
   0x7   : > { %p195_p3 = scmp.ne.s32.totalorder %s5799_s25, %s5795_s24  ;;  %p196_p4 = scmp.eq.s32.totalorder %s4988_s29, 1 }
   0x8   : > { %s5888_s10 = scalar_select %p177_p1, %s5803_s26, %s179_s8  }
   0x9   : > { %p5890_p5 = por %p190_p2, %p189_p0  ;;  %p5894_p6 = por %p196_p4, %p195_p3 }
   0xa   : > { %p4991_p7 = scmp.ge.s32.totalorder %s5807_s27, 1  ;;  %p240_p8 = scmp.lt.s32.totalorder %s5807_s27, 3 }
   0xc   : > { %p241_p9 = pnand %p4991_p7, %p240_p8 }
   0xe   : > { %244 = sbr.rel (%p241_p9) target bundleno = 1074 (0x432), region = 48 }
  0x15   : > { %v326_v0 = vld [vmem:[%s10047_s1] sm:$0xf]  ;;  %vm376_vm0 = vcmask 1043456   ;;  %p272_p10 = scmp.lt.s32.totalorder %s5873_s28, 1  ;;  %vm327_vm1 = vcmask 64512   ;;  %vm3676_vm10 = vcmask 1041408  }
  0x16   : > { %5442 = vmatprep.subr.msk.bf16.mxu0 %vm376_vm0, %v326_v0  ;;  %v378_v1 = vsel %vm376_vm0, %v326_v0, 0  ;;  %v5961_v50 = vld [vmem:[%s10048_s2] ss:$0 sm:$0xff]  ;;  %vm3627_vm11 = vcmask 31744   ;;  %s269_s22 = sand.u32 1, %s5799_s25   ;;  %vm4879_vm12 = vcmask 130048  }
  0x17   : > { %5175 = vmatpush3.bf16.msra.mxu0 %v378_v1  ;;  %s273_s15 = scalar_select %p272_p10, %s5873_s28, 1  ;;  %v5966_v52 = vld [vmem:[%s10049_s3] ss:$0 sm:$0xff] }
  0x18   : > { %s4992_s23 = sshll.u32 %s269_s22, 8  ;;  %s5088_s8 = sshll.u32 %s5873_s28, 12 }
  0x19   : > { %s5087_s16 = sshll.u32 %s273_s15, 8  ;;  %s9754_s29 = scalar_lea.vmem [#allocation2], %s4992_s23 }
  0x1a   : > { %s5908_s19 = scalar_lea.vmem %s10046_s0, %s5087_s16  ;;  %s4926_s9 = sshll.u32 %s9754_s29, 4  ;;  %s9994_s9 = int_to_ptr.vmem [resolvable:$true] %s4926_s9 }
  0x1b   : > { %v278_v2 = vld [vmem:[%s5908_s19] sm:$0xff]  ;;  %v279_v3 = vld [vmem:[%s5908_s19 + $0x8] sm:$0xff]  ;;  %v280_v4 = vld [vmem:[%s5908_s19 + $0x10] sm:$0xff]  ;;  %s9992_s15 = scalar_lea.hbm %s10053_s7, %s5088_s8  ;;  %s10005_s28 = scalar_lea.sflag [#allocation3], %s269_s22 }
  0x1c   : > { %v310_v5 = vpack.c.bf16 %v279_v3, %v278_v2  ;;  %v281_v6 = vld [vmem:[%s5908_s19 + $0x18] sm:$0xff]  ;;  %v282_v7 = vld [vmem:[%s5908_s19 + $0x20] sm:$0xff]  ;;  %v283_v8 = vld [vmem:[%s5908_s19 + $0x28] sm:$0xff]  ;;  %s5745_s16 = scalar_lea.vmem %s9994_s9, 4096  ;;  %s5809_s17 = smov [#allocation2]  }
  0x1d   : > { %v311_v9 = vpack.c.bf16 %v281_v6, %v280_v4  ;;  %v312_v10 = vpack.c.bf16 %v283_v8, %v282_v7  ;;  %v284_v11 = vld [vmem:[%s5908_s19 + $0x30] sm:$0xff]  ;;  %v285_v12 = vld [vmem:[%s5908_s19 + $0x38] sm:$0xff]  ;;  %v286_v13 = vld [vmem:[%s5908_s19 + $0x40] sm:$0xff]  ;;  %p5746_p11 = scmp.ne.s32.totalorder %s9994_s9, %s5745_s16  ;;  %s5749_s18 = sshll.u32 %s5809_s17, 4  ;;  %s5750_s18 = int_to_ptr.vmem [resolvable:$false] %s5749_s18 }
  0x1e   : > { %5176 = vmatprep.mubr.msk.bf16.mxu0 %vm327_vm1, %v310_v5  ;;  %v287_v14 = vld [vmem:[%s5908_s19 + $0x48] sm:$0xff]  ;;  %v313_v15 = vpack.c.bf16 %v285_v12, %v284_v11  ;;  %v288_v17 = vld [vmem:[%s5908_s19 + $0x50] sm:$0xff]  ;;  %v289_v18 = vld [vmem:[%s5908_s19 + $0x58] sm:$0xff]  ;;  %p5752_p0 = scmp.lt.s32.totalorder %s9994_s9, %s5750_s18 }
  0x1f   : > { %5177 = vmatmul.mubr.msk.bf16.vlgmr.msra.gmra.mrb[0].mxu0 %vm327_vm1, %v311_v9  ;;  %v314_v16 = vpack.c.bf16 %v287_v14, %v286_v13  ;;  %v290_v19 = vld [vmem:[%s5908_s19 + $0x60] sm:$0xff]  ;;  %v291_v20 = vld [vmem:[%s5908_s19 + $0x68] sm:$0xff]  ;;  %v315_v21 = vpack.c.bf16 %v289_v18, %v288_v17  ;;  %v292_v23 = vld [vmem:[%s5908_s19 + $0x70] sm:$0xff]  ;;  %p5747_p12 = pnand %p5746_p11, %p5890_p5 }
  0x20   : > { %5180 = vmatprep.mubr.msk.bf16.mxu0 %vm327_vm1, %v312_v10  ;;  %v316_v22 = vpack.c.bf16 %v291_v20, %v290_v19  ;;  %v293_v24 = vld [vmem:[%s5908_s19 + $0x78] sm:$0xff]  ;;  %v294_v25 = vld [vmem:[%s5908_s19 + $0x80] sm:$0xff]  ;;  %v295_v26 = vld [vmem:[%s5908_s19 + $0x88] sm:$0xff] }
  0x21   : > { %v317_v27 = vpack.c.bf16 %v293_v24, %v292_v23  ;;  %v318_v28 = vpack.c.bf16 %v295_v26, %v294_v25  ;;  %v296_v29 = vld [vmem:[%s5908_s19 + $0x90] sm:$0xff]  ;;  %v297_v30 = vld [vmem:[%s5908_s19 + $0x98] sm:$0xff]  ;;  %v298_v31 = vld [vmem:[%s5908_s19 + $0xa0] sm:$0xff]  ;;  %p5748_p13 = pneg %p5747_p12 }
  0x22   : > { %v299_v32 = vld [vmem:[%s5908_s19 + $0xa8] sm:$0xff]  ;;  %v319_v33 = vpack.c.bf16 %v297_v30, %v296_v29  ;;  %v300_v35 = vld [vmem:[%s5908_s19 + $0xb0] sm:$0xff]  ;;  %v301_v36 = vld [vmem:[%s5908_s19 + $0xb8] sm:$0xff] }
  0x23   : > { %v320_v34 = vpack.c.bf16 %v299_v32, %v298_v31  ;;  %v302_v37 = vld [vmem:[%s5908_s19 + $0xc0] sm:$0xff]  ;;  %v303_v38 = vld [vmem:[%s5908_s19 + $0xc8] sm:$0xff]  ;;  %v321_v39 = vpack.c.bf16 %v301_v36, %v300_v35  ;;  %v304_v41 = vld [vmem:[%s5908_s19 + $0xd0] sm:$0xff] }
  0x24   : > { %v322_v40 = vpack.c.bf16 %v303_v38, %v302_v37  ;;  %v305_v42 = vld [vmem:[%s5908_s19 + $0xd8] sm:$0xff]  ;;  %v306_v43 = vld [vmem:[%s5908_s19 + $0xe0] sm:$0xff]  ;;  %v307_v44 = vld [vmem:[%s5908_s19 + $0xe8] sm:$0xff] }
  0x25   : > { %v323_v45 = vpack.c.bf16 %v305_v42, %v304_v41  ;;  %v324_v46 = vpack.c.bf16 %v307_v44, %v306_v43  ;;  %v308_v47 = vld [vmem:[%s5908_s19 + $0xf0] sm:$0xff]  ;;  %v309_v48 = vld [vmem:[%s5908_s19 + $0xf8] sm:$0xff]  ;;  %s5751_s19 = scalar_lea.vmem %s5750_s18, 8192 }
  0x26   : > { %v325_v49 = vpack.c.bf16 %v309_v48, %v308_v47  ;;  %p5753_p1 = scmp.lt.s32.totalorder %s5751_s19, %s5745_s16 }
  0x27   : > { %5181 = vmatmul.mubr.msk.bf16.gmra.mrb[4].mxu0 %vm327_vm1, %v313_v15 }
  0x28   : > { %5184 = vmatprep.mubr.msk.bf16.mxu0 %vm327_vm1, %v314_v16  ;;  %p5754_p2 = por %p5753_p1, %p5752_p0 }
  0x2a   : > { %p5755_p3 = pnand %p5754_p2, %p5748_p13 }
  0x2f   : > { %5185 = vmatmul.mubr.msk.bf16.gmra.mrb[8].mxu0 %vm327_vm1, %v315_v21 }
  0x30   : > { %5188 = vmatprep.mubr.msk.bf16.mxu0 %vm327_vm1, %v316_v22 }
  0x37   : > { %5189 = vmatmul.mubr.msk.bf16.gmra.mrb[12].mxu0 %vm327_vm1, %v317_v27  ;;  %v843_v27 = vlaneseq }
  0x38   : > { %5192 = vmatprep.mubr.msk.bf16.mxu0 %vm327_vm1, %v318_v28 }
  0x39   : > { %v6018_v44 = vshrl.u32 %v843_v27, 7 }
  0x3b   : > { %vm1044_vm2 = vcmp.lt.s32.totalorder %v6018_v44, 7  ;;  %vm1145_vm3 = vcmp.lt.s32.totalorder %v6018_v44, 1  ;;  %vm1310_vm4 = vcmp.lt.s32.totalorder %v6018_v44, 6  ;;  %vm1411_vm5 = vcmp.lt.s32.totalorder %v6018_v44, 2 }
  0x3c   : > { %vm878_vm7 = vcmp.ge.s32.totalorder %v6018_v44, 1  ;;  %vm946_vm9 = vcmp.ge.s32.totalorder %v6018_v44, 2 }
  0x3f   : > { %5193 = vmatmul.mubr.msk.bf16.gmra.mrb[16].mxu0 %vm327_vm1, %v319_v33 }
  0x40   : > { %5196 = vmatprep.mubr.msk.bf16.mxu0 %vm327_vm1, %v320_v34 }
  0x47   : > { %5197 = vmatmul.mubr.msk.bf16.gmra.mrb[20].mxu0 %vm327_vm1, %v321_v39 }
  0x48   : > { %5200 = vmatprep.mubr.msk.bf16.mxu0 %vm327_vm1, %v322_v40 }
  0x4f   : > { %5201 = vmatmul.mubr.msk.bf16.gmra.mrb[24].mxu0 %vm327_vm1, %v323_v45 }
  0x50   : > { %5204 = vmatprep.mubr.msk.bf16.mxu0 %vm327_vm1, %v324_v46 }
  0x57   : > { %5205 = vmatmul.mubr.msk.bf16.gmra.mrb[28].mxu0 %vm327_vm1, %v325_v49 }
  0xf2   : > { %v5178_v51 = vpop.f32.mrb[0].mxu0 }
  0xf3   : > { %v550_v53 = vmul.f32 %v5178_v51, %v5961_v50  ;;  %v414_v54 = vpop.f32.mrb[1].mxu0 }
  0xf4   : > { %v548_v55 = vmul.f32 %v5961_v50, %v414_v54  ;;  %v5179_v56 = vpop.f32.mrb[2].mxu0 }
  0xf5   : > { %v5971_v57 = vadd.f32 %v5966_v52, %v550_v53  ;;  %v551_v58 = vmul.f32 %v5179_v56, %v5961_v50  ;;  %v417_v59 = vpop.f32.mrb[3].mxu0 }
  0xf6   : > { %v5975_v60 = vadd.f32 %v5966_v52, %v548_v55  ;;  %v549_v61 = vmul.f32 %v5961_v50, %v417_v59 }
  0xf7   : > { %v621_v62 = vsub.f32 0.0, %v5971_v57  ;;  %v5980_v63 = vadd.f32 %v5966_v52, %v551_v58 }
  0xf8   : > { %v619_v0 = vsub.f32 0.0, %v5975_v60  ;;  %v5984_v1 = vadd.f32 %v5966_v52, %v549_v61 }
  0xf9   : > { %v655_v2 = vmul.f32 1.442695, %v621_v62  ;;  %v622_v3 = vsub.f32 0.0, %v5980_v63 }
  0xfa   : > { %v651_v4 = vmul.f32 1.442695, %v619_v0  ;;  %v620_v5 = vsub.f32 0.0, %v5984_v1  ;;  %v5182_v6 = vpop.f32.mrb[4].mxu0 }
  0xfb   : > { %5489 = vpow2.f32 %v655_v2  ;;  %v657_v7 = vmul.f32 1.442695, %v622_v3  ;;  %v554_v8 = vmul.f32 %v5182_v6, %v5961_v50  ;;  %v430_v9 = vpop.f32.mrb[5].mxu0  ;;  %v6033_v6 = vadd.s32 8, %v6018_v44 }
  0xfc   : > { %5491 = vpow2.f32 %v651_v4  ;;  %v653_v10 = vmul.f32 1.442695, %v620_v5  ;;  %v552_v11 = vmul.f32 %v5961_v50, %v430_v9  ;;  %v5183_v12 = vpop.f32.mrb[6].mxu0 }
  0xfd   : > { %5493 = vpow2.f32 %v657_v7  ;;  %v5991_v13 = vadd.f32 %v5966_v52, %v554_v8  ;;  %v555_v14 = vmul.f32 %v5183_v12, %v5961_v50  ;;  %v433_v15 = vpop.f32.mrb[7].mxu0  ;;  %vm877_vm6 = vcmp.lt.s32.totalorder %v6033_v6, 15 }
  0xfe   : > { %5495 = vpow2.f32 %v653_v10  ;;  %v5995_v16 = vadd.f32 %v5966_v52, %v552_v11  ;;  %v553_v17 = vmul.f32 %v5961_v50, %v433_v15  ;;  %vm945_vm8 = vcmp.lt.s32.totalorder %v6033_v6, 14 }
  0xff   : > { %v625_v18 = vsub.f32 0.0, %v5991_v13  ;;  %v6000_v19 = vadd.f32 %v5966_v52, %v555_v14 }
 0x100   : > { %v623_v20 = vsub.f32 0.0, %v5995_v16  ;;  %v6004_v21 = vadd.f32 %v5966_v52, %v553_v17 }
 0x101   : > { %v663_v22 = vmul.f32 1.442695, %v625_v18  ;;  %v626_v23 = vsub.f32 0.0, %v6000_v19 }
 0x102   : > { %v659_v24 = vmul.f32 1.442695, %v623_v20  ;;  %v624_v25 = vsub.f32 0.0, %v6004_v21  ;;  %v5186_v26 = vpop.f32.mrb[8].mxu0 }
 0x103   : > { %5497 = vpow2.f32 %v663_v22  ;;  %v665_v28 = vmul.f32 1.442695, %v626_v23  ;;  %v558_v29 = vmul.f32 %v5186_v26, %v5961_v50  ;;  %v446_v30 = vpop.f32.mrb[9].mxu0 }
 0x104   : > { %5499 = vpow2.f32 %v659_v24  ;;  %v661_v31 = vmul.f32 1.442695, %v624_v25  ;;  %v556_v32 = vmul.f32 %v5961_v50, %v446_v30  ;;  %v5187_v33 = vpop.f32.mrb[10].mxu0 }
 0x105   : > { %v5490_v34 = vpop.eup %5489  ;;  %5501 = vpow2.f32 %v665_v28  ;;  %v6011_v35 = vadd.f32 %v5966_v52, %v558_v29  ;;  %v559_v36 = vmul.f32 %v5187_v33, %v5961_v50  ;;  %v449_v37 = vpop.f32.mrb[11].mxu0 }
 0x106   : > { %v5492_v38 = vpop.eup %5491  ;;  %v717_v39 = vadd.f32 1.0, %v5490_v34  ;;  %5503 = vpow2.f32 %v661_v31  ;;  %v6015_v40 = vadd.f32 %v5966_v52, %v556_v32  ;;  %v557_v41 = vmul.f32 %v5961_v50, %v449_v37 }
 0x107   : > { %v5494_v42 = vpop.eup %5493  ;;  %v715_v43 = vadd.f32 1.0, %v5492_v38  ;;  %v629_v45 = vsub.f32 0.0, %v6011_v35  ;;  %v6022_v46 = vadd.f32 %v5966_v52, %v559_v36 }
 0x108   : > { %v5496_v47 = vpop.eup %5495  ;;  %5505 = vrcp.f32 %v717_v39  ;;  %v718_v48 = vadd.f32 1.0, %v5494_v42  ;;  %v627_v49 = vsub.f32 0.0, %v6015_v40  ;;  %v6026_v51 = vadd.f32 %v5966_v52, %v557_v41 }
 0x109   : > { %5507 = vrcp.f32 %v715_v43  ;;  %v716_v53 = vadd.f32 1.0, %v5496_v47  ;;  %v671_v54 = vmul.f32 1.442695, %v629_v45  ;;  %v630_v55 = vsub.f32 0.0, %v6022_v46 }
 0x10a   : > { %5509 = vrcp.f32 %v718_v48  ;;  %v667_v56 = vmul.f32 1.442695, %v627_v49  ;;  %v628_v58 = vsub.f32 0.0, %v6026_v51  ;;  %v5190_v59 = vpop.f32.mrb[12].mxu0 }
 0x10b   : > { %5511 = vrcp.f32 %v716_v53  ;;  %v673_v61 = vmul.f32 1.442695, %v630_v55  ;;  %v562_v62 = vmul.f32 %v5190_v59, %v5961_v50  ;;  %v462_v0 = vpop.f32.mrb[13].mxu0 }
 0x10c   : > { %5513 = vpow2.f32 %v671_v54  ;;  %v669_v2 = vmul.f32 1.442695, %v628_v58  ;;  %v560_v3 = vmul.f32 %v5961_v50, %v462_v0  ;;  %v5191_v4 = vpop.f32.mrb[14].mxu0 }
 0x10d   : > { %v5498_v5 = vpop.eup %5497  ;;  %5515 = vpow2.f32 %v667_v56  ;;  %v6036_v7 = vadd.f32 %v5966_v52, %v562_v62  ;;  %v563_v8 = vmul.f32 %v5191_v4, %v5961_v50  ;;  %v465_v9 = vpop.f32.mrb[15].mxu0 }
 0x10e   : > { %v5500_v10 = vpop.eup %5499  ;;  %v721_v11 = vadd.f32 1.0, %v5498_v5  ;;  %5517 = vpow2.f32 %v673_v61  ;;  %v6040_v12 = vadd.f32 %v5966_v52, %v560_v3  ;;  %v561_v14 = vmul.f32 %v5961_v50, %v465_v9 }
 0x10f   : > { %v5502_v15 = vpop.eup %5501  ;;  %v719_v17 = vadd.f32 1.0, %v5500_v10  ;;  %5519 = vpow2.f32 %v669_v2  ;;  %v633_v18 = vsub.f32 0.0, %v6036_v7  ;;  %v6045_v20 = vadd.f32 %v5966_v52, %v563_v8 }
 0x110   : > { %v5504_v22 = vpop.eup %5503  ;;  %5521 = vrcp.f32 %v721_v11  ;;  %v722_v23 = vadd.f32 1.0, %v5502_v15  ;;  %v631_v24 = vsub.f32 0.0, %v6040_v12  ;;  %v6052_v25 = vadd.f32 %v5966_v52, %v561_v14 }
 0x111   : > { %5523 = vrcp.f32 %v719_v17  ;;  %v720_v26 = vadd.f32 1.0, %v5504_v22  ;;  %v679_v27 = vmul.f32 1.442695, %v633_v18  ;;  %v634_v28 = vsub.f32 0.0, %v6045_v20 }
 0x112   : > { %10145 = vst [vmem:[#allocation5_spill] sm:$0xff] %v6052_v25  ;;  %v5506_v29 = vpop.eup %5505  ;;  %5525 = vrcp.f32 %v722_v23  ;;  %v632_v30 = vsub.f32 0.0, %v6052_v25  ;;  %v5194_v31 = vpop.f32.mrb[16].mxu0  ;;  %v675_v34 = vmul.f32 1.442695, %v631_v24 }
 0x113   : > { %v5508_v32 = vpop.eup %5507  ;;  %v6060_v33 = vmul.f32 %v5506_v29, %v5971_v57  ;;  %5527 = vrcp.f32 %v720_v26  ;;  %v681_v36 = vmul.f32 1.442695, %v634_v28  ;;  %v478_v37 = vpop.f32.mrb[17].mxu0  ;;  %v566_v42 = vmul.f32 %v5194_v31, %v5961_v50 }
 0x114   : > { %v5510_v38 = vpop.eup %5509  ;;  %v6064_v39 = vmul.f32 %v5508_v32, %v5975_v60  ;;  %5529 = vpow2.f32 %v679_v27  ;;  %v6067_v41 = vmul.f32 1.442695, %v632_v30  ;;  %v6070_v43 = vpop.f32.mrb[18].mxu0  ;;  %v564_v49 = vmul.f32 %v5961_v50, %v478_v37 }
 0x115   : > { %10146 = vst [vmem:[#allocation6_spill] sm:$0xff] %v6060_v33  ;;  %v5512_v57 = vpop.eup %5511  ;;  %v1014_v45 = vrot.slane %v6060_v33, 1  ;;  %v1115_v47 = vrot.slane %v6060_v33, 7  ;;  %v1280_v48 = vrot.slane %v6060_v33, 2  ;;  %v6076_v60 = vpop.f32.mrb[19].mxu0  ;;  %v1381_v54 = vrot.slane %v6060_v33, 6 }
 0x116   : > { %10147 = vst [vmem:[#allocation7_spill] sm:$0xff] %v6064_v39  ;;  %v5514_v53 = vpop.eup %5513  ;;  %v10057_v55 = vrot.slane %v6064_v39, 1  ;;  %v10054_v56 = vrot.slane %v6064_v39, 7  ;;  %v10056_v58 = vrot.slane %v6064_v39, 2  ;;  %v10055_v61 = vrot.slane %v6064_v39, 6 }
 0x117   : > { %v5516_v59 = vpop.eup %5515  ;;  %v6084_v62 = vmul.f32 %v5510_v38, %v5980_v63  ;;  %v6087_v0 = vmul.f32 %v5512_v57, %v5984_v1  ;;  %5531 = vpow2.f32 %v675_v34  ;;  %v6091_v3 = vadd.f32 1.0, %v5514_v53 }
 0x118   : > { %v6089_v2 = vpop.eup %5517  ;;  %v6093_v4 = vadd.f32 1.0, %v5516_v59  ;;  %5533 = vpow2.f32 %v681_v36  ;;  %v6096_v5 = vadd.f32 %v5966_v52, %v566_v42  ;;  %v6119_v28 = vadd.f32 %v5966_v52, %v564_v49 }
 0x119   : > { %10148 = vst [vmem:[#allocation8_spill] sm:$0xff] %v6084_v62  ;;  %10149 = vst [vmem:[#allocation9_spill] sm:$0xff] %v6087_v0  ;;  %v6098_v8 = vpop.eup %5519  ;;  %v1015_v9 = vrot.slane %v6084_v62, 1  ;;  %v1116_v63 = vrot.slane %v6084_v62, 7  ;;  %v1281_v1 = vrot.slane %v6084_v62, 2  ;;  %v1382_v10 = vrot.slane %v6084_v62, 6 }
 0x11a   : > { %v5522_v11 = vpop.eup %5521  ;;  %v1013_v14 = vrot.slane %v6087_v0, 1  ;;  %v1114_v15 = vrot.slane %v6087_v0, 7  ;;  %v1279_v17 = vrot.slane %v6087_v0, 2  ;;  %v1380_v18 = vrot.slane %v6087_v0, 6  ;;  %v6108_v22 = vpop.f32.mrb[20].mxu0 }
 0x11b   : > { %v5524_v23 = vpop.eup %5523  ;;  %v1073_v24 = vsel %vm1044_vm2, %v1014_v45, %v1015_v9  ;;  %v6114_v26 = vsel %vm1145_vm3, %v1115_v47, %v1116_v63  ;;  %v1339_v27 = vsel %vm1310_vm4, %v1280_v48, %v1281_v1  ;;  %v6121_v29 = vpop.f32.mrb[21].mxu0  ;;  %v6125_v31 = vsel %vm1411_vm5, %v1381_v54, %v1382_v10 }
 0x11c   : > { %v5526_v30 = vpop.eup %5525  ;;  %v1074_v32 = vsel %vm1044_vm2, %v1013_v14, %v1014_v45  ;;  %v1175_v34 = vsel %vm1145_vm3, %v1114_v15, %v1115_v47  ;;  %v1176_v36 = vsel %vm1145_vm3, %v10054_v56, %v1114_v15  ;;  %v6135_v37 = vpop.f32.mrb[22].mxu0  ;;  %v6141_v42 = vsel %vm1044_vm2, %v10057_v55, %v1013_v14 }
 0x11d   : > { %v5528_v38 = vpop.eup %5527  ;;  %10150 = vst [vmem:[#allocation10_spill] sm:$0xff] %v6141_v42  ;;  %v1082_v57 = vsel %vm877_vm6, %v1074_v32, -inf  ;;  %v1184_v45 = vsel %vm878_vm7, %v1175_v34, -inf  ;;  %v1340_v47 = vsel %vm1310_vm4, %v1279_v17, %v1280_v48  ;;  %v6149_v49 = vpop.f32.mrb[23].mxu0  ;;  %v1441_v14 = vsel %vm1411_vm5, %v1380_v18, %v1381_v54 }
 0x11e   : > { %v6151_v53 = vpop.eup %5529  ;;  %v1215_v59 = vmax.f32 %v1082_v57, %v1176_v36  ;;  %v1216_v15 = vmax.f32 %v1073_v24, %v1184_v45  ;;  %v1348_v56 = vsel %vm945_vm8, %v1340_v47, -inf  ;;  %v1442_v32 = vsel %vm1411_vm5, %v10055_v61, %v1380_v18 }
 0x11f   : > { %v1450_v48 = vsel %vm946_vm9, %v1441_v14, -inf  ;;  %v6164_v34 = vmul.f32 %v5522_v11, %v5991_v13  ;;  %v6167_v36 = vmul.f32 %v5524_v23, %v5995_v16  ;;  %v6175_v54 = vsel %vm1310_vm4, %v10056_v58, %v1279_v17 }
 0x120   : > { %v1247_v24 = vmax.f32 %v6087_v0, %v1215_v59  ;;  %v1248_v57 = vmax.f32 %v6060_v33, %v1216_v15  ;;  %10153 = vst [vmem:[#allocation13_spill] sm:$0xff] %v6175_v54  ;;  %v1481_v18 = vmax.f32 %v1348_v56, %v1442_v32  ;;  %v1482_v47 = vmax.f32 %v1339_v27, %v1450_v48 }
 0x121   : > { %10151 = vst [vmem:[#allocation11_spill] sm:$0xff] %v6164_v34  ;;  %10152 = vst [vmem:[#allocation12_spill] sm:$0xff] %v6167_v36  ;;  %v6177_v45 = vpop.eup %5531  ;;  %v1018_v13 = vrot.slane %v6164_v34, 1  ;;  %v1119_v11 = vrot.slane %v6164_v34, 7  ;;  %v1284_v16 = vrot.slane %v6164_v34, 2  ;;  %v1385_v15 = vrot.slane %v6164_v34, 6 }
 0x122   : > { %v6182_v23 = vpop.eup %5533  ;;  %v6184_v59 = vmax.f32 %v1247_v24, %v1481_v18  ;;  %v1016_v14 = vrot.slane %v6167_v36, 1  ;;  %v1117_v17 = vrot.slane %v6167_v36, 7  ;;  %v6189_v56 = vpop.f32.mrb[24].mxu0  ;;  %v6191_v32 = vmax.f32 %v1248_v57, %v1482_v47 }
 0x123   : > { %v1282_v27 = vrot.slane %v6167_v36, 2  ;;  %v1383_v48 = vrot.slane %v6167_v36, 6  ;;  %v6196_v61 = vmul.f32 %v5526_v30, %v6000_v19  ;;  %v6198_v58 = vpop.f32.mrb[25].mxu0  ;;  %v6205_v55 = vmul.f32 %v5528_v38, %v6004_v21 }
 0x124   : > { %10154 = vst [vmem:[#allocation14_spill] sm:$0xff] %v6191_v32  ;;  %v1072_v24 = vsel %vm1044_vm2, %v1015_v9, %v1016_v14  ;;  %v1173_v18 = vsel %vm1145_vm3, %v1116_v63, %v1117_v17  ;;  %5535 = vrcp.f32 %v6091_v3  ;;  %v6208_v57 = vpop.f32.mrb[26].mxu0  ;;  %v726_v9 = vadd.f32 1.0, %v6089_v2 }
 0x125   : > { %10155 = vst [vmem:[#allocation15_spill] sm:$0xff] %v6196_v61  ;;  %10156 = vst [vmem:[#allocation16_spill] sm:$0xff] %v6205_v55  ;;  %v1084_v47 = vsel %vm877_vm6, %v1072_v24, -inf  ;;  %v1338_v19 = vsel %vm1310_vm4, %v1281_v1, %v1282_v27  ;;  %v1439_v30 = vsel %vm1411_vm5, %v1382_v10, %v1383_v48  ;;  %v6217_v33 = vpop.f32.mrb[27].mxu0  ;;  %v1186_v21 = vsel %vm878_vm7, %v1173_v18, -inf }
 0x126   : > { %v1217_v3 = vmax.f32 %v1084_v47, %v6114_v26  ;;  %v1350_v63 = vsel %vm945_vm8, %v1338_v19, -inf  ;;  %v10060_v38 = vrot.slane %v6196_v61, 1  ;;  %v1452_v1 = vsel %vm946_vm9, %v1439_v30, -inf }
 0x127   : > { %v10061_v24 = vrot.slane %v6196_v61, 7  ;;  %v10063_v10 = vrot.slane %v6196_v61, 2  ;;  %v10064_v2 = vrot.slane %v6196_v61, 6  ;;  %v1483_v18 = vmax.f32 %v1350_v63, %v6125_v31 }
 0x128   : > { %v1249_v0 = vmax.f32 %v6084_v62, %v1217_v3  ;;  %v1017_v26 = vrot.slane %v6205_v55, 1  ;;  %v1118_v47 = vrot.slane %v6205_v55, 7  ;;  %v1069_v19 = vsel %vm1044_vm2, %v1018_v13, %v10060_v38 }
 0x129   : > { %v6242_v30 = vsel %vm1145_vm3, %v1119_v11, %v10061_v24  ;;  %v1335_v31 = vsel %vm1310_vm4, %v1284_v16, %v10063_v10  ;;  %v1283_v3 = vrot.slane %v6205_v55, 2  ;;  %v6253_v63 = vsel %vm1411_vm5, %v1385_v15, %v10064_v2 }
 0x12a   : > { %v1070_v38 = vsel %vm1044_vm2, %v1017_v26, %v1018_v13  ;;  %v1071_v24 = vsel %vm1044_vm2, %v1016_v14, %v1017_v26  ;;  %v1171_v62 = vsel %vm1145_vm3, %v1118_v47, %v1119_v11  ;;  %v6261_v54 = vpop.f32.mrb[28].mxu0  ;;  %v1172_v42 = vsel %vm1145_vm3, %v1117_v17, %v1118_v47 }
 0x12b   : > { %v1086_v10 = vsel %vm877_vm6, %v1070_v38, -inf  ;;  %v1188_v2 = vsel %vm878_vm7, %v1171_v62, -inf  ;;  %v1218_v39 = vmax.f32 %v1071_v24, %v1186_v21  ;;  %v6269_v32 = vpop.f32.mrb[29].mxu0  ;;  %v1336_v14 = vsel %vm1310_vm4, %v1283_v3, %v1284_v16 }
 0x12c   : > { %v1219_v13 = vmax.f32 %v1086_v10, %v1172_v42  ;;  %v1220_v25 = vmax.f32 %v1069_v19, %v1188_v2  ;;  %v1337_v11 = vsel %vm1310_vm4, %v1282_v27, %v1283_v3  ;;  %v6275_v26 = vpop.f32.mrb[30].mxu0  ;;  %v6277_v38 = vmax.f32 %v1249_v0, %v1483_v18 }
 0x12d   : > { %v1250_v17 = vmax.f32 %v6167_v36, %v1218_v39  ;;  %v1352_v62 = vsel %vm945_vm8, %v1336_v14, -inf  ;;  %v1384_v21 = vrot.slane %v6205_v55, 6  ;;  %v6283_v24 = vpop.f32.mrb[31].mxu0  ;;  %v1484_v2 = vmax.f32 %v1337_v11, %v1452_v1 }
 0x12e   : > { %v5536_v42 = vpop.eup %5535  ;;  %v1251_v10 = vmax.f32 %v6205_v55, %v1219_v13  ;;  %v1252_v16 = vmax.f32 %v6164_v34, %v1220_v25  ;;  %5537 = vrcp.f32 %v6093_v4  ;;  %v724_v18 = vadd.f32 1.0, %v6098_v8 }
 0x12f   : > { %v1437_v0 = vsel %vm1411_vm5, %v1384_v21, %v1385_v15  ;;  %v1438_v39 = vsel %vm1411_vm5, %v1383_v48, %v1384_v21  ;;  %v6293_v27 = vmul.f32 %v5536_v42, %v6011_v35  ;;  %5539 = vrcp.f32 %v726_v9 }
 0x130   : > { %v1454_v47 = vsel %vm946_vm9, %v1437_v0, -inf  ;;  %v1485_v19 = vmax.f32 %v1352_v62, %v1438_v39  ;;  %v729_v25 = vadd.f32 1.0, %v6151_v53  ;;  %v6299_v4 = vmax.f32 %v1250_v17, %v1484_v2 }
 0x131   : > { %10157 = vst [vmem:[#allocation17_spill] sm:$0xff] %v6293_v27  ;;  %v1486_v1 = vmax.f32 %v1335_v31, %v1454_v47  ;;  %v10069_v15 = vrot.slane %v6293_v27, 1  ;;  %v10072_v3 = vrot.slane %v6293_v27, 7  ;;  %v10074_v35 = vrot.slane %v6293_v27, 2 }
 0x132   : > { %10158 = vst [vmem:[#allocation18_spill] sm:$0xff] %v6299_v4  ;;  %v6303_v48 = vmax.f32 %v1251_v10, %v1485_v19  ;;  %v727_v13 = vadd.f32 1.0, %v6177_v45  ;;  %5541 = vrcp.f32 %v724_v18  ;;  %v730_v53 = vadd.f32 1.0, %v6182_v23 }
 0x133   : > { %v6308_v14 = vmax.f32 %v1252_v16, %v1486_v1  ;;  %v637_v9 = vsub.f32 0.0, %v6096_v5  ;;  %5543 = vrcp.f32 %v729_v25  ;;  %v635_v11 = vsub.f32 0.0, %v6119_v28 }
 0x134   : > { %10159 = vst [vmem:[#allocation19_spill] sm:$0xff] %v6303_v48  ;;  %v567_v17 = vmul.f32 %v6070_v43, %v5961_v50  ;;  %5545 = vrcp.f32 %v727_v13  ;;  %v565_v45 = vmul.f32 %v5961_v50, %v6076_v60  ;;  %v570_v21 = vmul.f32 %v6108_v22, %v5961_v50 }
 0x135   : > { %v687_v62 = vmul.f32 1.442695, %v637_v9  ;;  %5547 = vrcp.f32 %v730_v53  ;;  %v683_v23 = vmul.f32 1.442695, %v635_v11  ;;  %v568_v10 = vmul.f32 %v5961_v50, %v6121_v29 }
 0x136   : > { %v6322_v42 = vadd.f32 %v5966_v52, %v567_v17  ;;  %5549 = vpow2.f32 %v6067_v41  ;;  %v6328_v43 = vadd.f32 %v5966_v52, %v565_v45  ;;  %v6331_v16 = vadd.f32 %v5966_v52, %v570_v21 }
 0x137   : > { %v571_v60 = vmul.f32 %v6135_v37, %v5961_v50  ;;  %5551 = vpow2.f32 %v687_v62  ;;  %v6337_v0 = vadd.f32 %v5966_v52, %v568_v10  ;;  %v569_v29 = vmul.f32 %v5961_v50, %v6149_v49 }
 0x138   : > { %10160 = vst [vmem:[#allocation20_spill] sm:$0xff] %v6328_v43  ;;  %10161 = vst [vmem:[#allocation21_spill] sm:$0xff] %v6331_v16  ;;  %v5538_v22 = vpop.eup %5537  ;;  %v638_v2 = vsub.f32 0.0, %v6322_v42  ;;  %5553 = vpow2.f32 %v683_v23  ;;  %v636_v39 = vsub.f32 0.0, %v6328_v43  ;;  %v641_v18 = vsub.f32 0.0, %v6331_v16 }
 0x139   : > { %v6342_v41 = vmul.f32 %v5538_v22, %v6015_v40  ;;  %v5540_v47 = vpop.eup %5539  ;;  %v6348_v25 = vadd.f32 %v5966_v52, %v571_v60  ;;  %v6351_v1 = vadd.f32 %v5966_v52, %v569_v29  ;;  %v6364_v17 = vmul.f32 %v6189_v56, %v5961_v50 }
 0x13a   : > { %v689_v37 = vmul.f32 1.442695, %v638_v2  ;;  %v6358_v9 = vmul.f32 %v5540_v47, %v6022_v46  ;;  %v6360_v11 = vmul.f32 1.442695, %v636_v39  ;;  %v10164_v45 = vrot.slane %v6196_v61, 1 }
 0x13b   : > { %10162 = vst [vmem:[#allocation22_spill] sm:$0xff] %v6342_v41  ;;  %v1020_v49 = vrot.slane %v6342_v41, 1  ;;  %v1121_v40 = vrot.slane %v6342_v41, 7  ;;  %v1286_v13 = vrot.slane %v6342_v41, 2  ;;  %v1387_v53 = vrot.slane %v6342_v41, 6 }
 0x13c   : > { %10163 = vst [vmem:[#allocation23_spill] sm:$0xff] %v6358_v9  ;;  %5555 = vpow2.f32 %v689_v37  ;;  %v5542_v62 = vpop.eup %5541  ;;  %v10165_v23 = vrot.slane %v6196_v61, 7  ;;  %v10166_v46 = vrot.slane %v6196_v61, 2  ;;  %v10167_v22 = vrot.slane %v6196_v61, 6 }
 0x13d   : > { %v1068_v21 = vsel %vm1044_vm2, %v10164_v45, %v1020_v49  ;;  %v5544_v2 = vpop.eup %5543  ;;  %v6388_v37 = vmul.f32 1.442695, %v641_v18  ;;  %v1124_v31 = vrot.slane %v6358_v9, 7  ;;  %v1390_v8 = vrot.slane %v6358_v9, 6 }
 0x13e   : > { %v1169_v10 = vsel %vm1145_vm3, %v10165_v23, %v1121_v40  ;;  %v1334_v60 = vsel %vm1310_vm4, %v10166_v46, %v1286_v13  ;;  %v1435_v56 = vsel %vm1411_vm5, %v10167_v22, %v1387_v53  ;;  %v1088_v29 = vsel %vm877_vm6, %v1068_v21, -inf  ;;  %v5546_v45 = vpop.eup %5545 }
 0x13f   : > { %v1190_v39 = vsel %vm878_vm7, %v1169_v10, -inf  ;;  %v1354_v47 = vsel %vm945_vm8, %v1334_v60, -inf  ;;  %v1221_v23 = vmax.f32 %v1088_v29, %v6242_v30  ;;  %v1456_v46 = vsel %vm946_vm9, %v1435_v56, -inf  ;;  %v5548_v19 = vpop.eup %5547 }
 0x140   : > { %v1023_v22 = vrot.slane %v6358_v9, 1  ;;  %v1487_v21 = vmax.f32 %v1354_v47, %v6253_v63  ;;  %v1289_v10 = vrot.slane %v6358_v9, 2  ;;  %v6399_v18 = vmul.f32 %v5542_v62, %v6026_v51  ;;  %v5550_v60 = vpop.eup %5549 }
 0x141   : > { %v1253_v30 = vmax.f32 %v6196_v61, %v1221_v23  ;;  %v1166_v63 = vsel %vm1145_vm3, %v10072_v3, %v1124_v31  ;;  %v6411_v29 = vmul.f32 %v5544_v2, %v6036_v7  ;;  %v5552_v47 = vpop.eup %5551  ;;  %v10172_v3 = vrot.slane %v6293_v27, 6 }
 0x142   : > { %10168 = vst [vmem:[#allocation24_spill] sm:$0xff] %v6399_v18  ;;  %v1065_v56 = vsel %vm1044_vm2, %v10069_v15, %v1023_v22  ;;  %v1331_v51 = vsel %vm1310_vm4, %v10074_v35, %v1289_v10  ;;  %v1021_v62 = vrot.slane %v6399_v18, 1  ;;  %v1122_v23 = vrot.slane %v6399_v18, 7  ;;  %v5554_v61 = vpop.eup %5553 }
 0x143   : > { %10169 = vst [vmem:[#allocation25_spill] sm:$0xff] %v6411_v29  ;;  %v6420_v15 = vmul.f32 %v5546_v45, %v6040_v12  ;;  %v6422_v34 = vmax.f32 %v1253_v30, %v1487_v21  ;;  %v1432_v7 = vsel %vm1411_vm5, %v10172_v3, %v1390_v8  ;;  %v1287_v2 = vrot.slane %v6399_v18, 2 }
 0x144   : > { %v1388_v55 = vrot.slane %v6399_v18, 6  ;;  %v10173_v35 = vrot.slane %v6293_v27, 1  ;;  %v1067_v12 = vsel %vm1044_vm2, %v1020_v49, %v1021_v62  ;;  %v10174_v45 = vrot.slane %v6293_v27, 7 }
 0x145   : > { %10170 = vst [vmem:[#allocation26_spill] sm:$0xff] %v6420_v15  ;;  %10171 = vst [vmem:[#allocation27_spill] sm:$0xff] %v6422_v34  ;;  %v1168_v3 = vsel %vm1145_vm3, %v1121_v40, %v1122_v23  ;;  %v1222_v43 = vmax.f32 %v1067_v12, %v1190_v39 }
 0x146   : > { %v1066_v36 = vsel %vm1044_vm2, %v1021_v62, %v10173_v35  ;;  %v1167_v21 = vsel %vm1145_vm3, %v1122_v23, %v10174_v45  ;;  %v10175_v35 = vrot.slane %v6293_v27, 2  ;;  %v5556_v62 = vpop.eup %5555  ;;  %v1333_v45 = vsel %vm1310_vm4, %v1286_v13, %v1287_v2 }
 0x147   : > { %v1090_v30 = vsel %vm877_vm6, %v1066_v36, -inf  ;;  %v1192_v16 = vsel %vm878_vm7, %v1167_v21, -inf  ;;  %v1254_v36 = vmax.f32 %v6342_v41, %v1222_v43  ;;  %v10176_v23 = vrot.slane %v6293_v27, 6 }
 0x148   : > { %v1332_v49 = vsel %vm1310_vm4, %v1287_v2, %v10175_v35  ;;  %v1223_v4 = vmax.f32 %v1090_v30, %v1168_v3  ;;  %v1224_v34 = vmax.f32 %v1065_v56, %v1192_v16  ;;  %v1434_v12 = vsel %vm1411_vm5, %v1387_v53, %v1388_v55 }
 0x149   : > { %v1356_v40 = vsel %vm945_vm8, %v1332_v49, -inf  ;;  %v1433_v39 = vsel %vm1411_vm5, %v1388_v55, %v10176_v23  ;;  %v1488_v21 = vmax.f32 %v1333_v45, %v1456_v46  ;;  %v1026_v43 = vrot.slane %v6411_v29, 1 }
 0x14a   : > { %v1255_v3 = vmax.f32 %v6399_v18, %v1223_v4  ;;  %v1256_v16 = vmax.f32 %v6293_v27, %v1224_v34  ;;  %v1458_v13 = vsel %vm946_vm9, %v1433_v39, -inf  ;;  %v1489_v56 = vmax.f32 %v1356_v40, %v1434_v12 }
 0x14b   : > { %v1490_v2 = vmax.f32 %v1331_v51, %v1458_v13  ;;  %v6465_v30 = vmax.f32 %v1254_v36, %v1488_v21  ;;  %v1127_v35 = vrot.slane %v6411_v29, 7  ;;  %v1292_v55 = vrot.slane %v6411_v29, 2 }
 0x14c   : > { %v6469_v49 = vmax.f32 %v1255_v3, %v1489_v56  ;;  %v1024_v53 = vrot.slane %v6420_v15, 1  ;;  %v1125_v4 = vrot.slane %v6420_v15, 7  ;;  %v1393_v34 = vrot.slane %v6411_v29, 6 }
 0x14d   : > { %v1290_v46 = vrot.slane %v6420_v15, 2  ;;  %v10084_v51 = vrot.slane %v6420_v15, 6  ;;  %v6478_v45 = vmul.f32 %v5548_v19, %v6045_v20  ;;  %v6480_v40 = vmax.f32 %v1256_v16, %v1490_v2 }
 0x14e   : > { %v1064_v36 = vsel %vm1044_vm2, %v1023_v22, %v1024_v53  ;;  %v1165_v23 = vsel %vm1145_vm3, %v1124_v31, %v1125_v4  ;;  %v728_v39 = vadd.f32 1.0, %v5550_v60  ;;  %v733_v22 = vadd.f32 1.0, %v5552_v47 }
 0x14f   : > { %10177 = vst [vmem:[#allocation28_spill] sm:$0xff] %v6478_v45  ;;  %v1092_v12 = vsel %vm877_vm6, %v1064_v36, -inf  ;;  %v1330_v20 = vsel %vm1310_vm4, %v1289_v10, %v1290_v46  ;;  %v1431_v19 = vsel %vm1411_vm5, %v1390_v8, %v10084_v51  ;;  %v6502_v21 = vsel %vm878_vm7, %v1165_v23, -inf }
 0x150   : > { %v1225_v31 = vmax.f32 %v1092_v12, %v1166_v63  ;;  %v1358_v60 = vsel %vm945_vm8, %v1330_v20, -inf  ;;  %v10083_v3 = vrot.slane %v6478_v45, 1  ;;  %v6509_v16 = vsel %vm946_vm9, %v1431_v19, -inf }
 0x151   : > { %v10082_v10 = vrot.slane %v6478_v45, 7  ;;  %v10081_v13 = vrot.slane %v6478_v45, 2  ;;  %v10080_v8 = vrot.slane %v6478_v45, 6  ;;  %v1491_v56 = vmax.f32 %v1358_v60, %v1432_v7 }
 0x152   : > { %v1257_v47 = vmax.f32 %v6358_v9, %v1225_v31  ;;  %5557 = vrcp.f32 %v728_v39  ;;  %v731_v63 = vadd.f32 1.0, %v5554_v61  ;;  %v6521_v2 = vsel %vm1044_vm2, %v1026_v43, %v10083_v3 }
 0x153   : > { %v6529_v36 = vsel %vm1145_vm3, %v1127_v35, %v10082_v10  ;;  %v6537_v61 = vsel %vm1310_vm4, %v1292_v55, %v10081_v13  ;;  %5559 = vrcp.f32 %v733_v22  ;;  %v6547_v23 = vsel %vm1411_vm5, %v1393_v34, %v10080_v8 }
 0x154   : > { %v6539_v7 = vmax.f32 %v1257_v47, %v1491_v56  ;;  %5561 = vrcp.f32 %v731_v63  ;;  %v734_v39 = vadd.f32 1.0, %v5556_v62  ;;  %v10178_v12 = vsub.f32 0.0, %v6337_v0 }
 0x155   : > { %v642_v19 = vsub.f32 0.0, %v6348_v25  ;;  %v640_v31 = vsub.f32 0.0, %v6351_v1  ;;  %v6555_v22 = vadd.f32 %v5966_v52, %v6364_v17  ;;  %5563 = vpow2.f32 %v6360_v11 }
 0x156   : > { %v691_v20 = vmul.f32 1.442695, %v10178_v12  ;;  %v572_v60 = vmul.f32 %v5961_v50, %v6198_v58  ;;  %v575_v47 = vmul.f32 %v6208_v57, %v5961_v50  ;;  %v573_v62 = vmul.f32 %v5961_v50, %v6217_v33 }
 0x157   : > { %5565 = vrcp.f32 %v734_v39  ;;  %v697_v56 = vmul.f32 1.442695, %v642_v19  ;;  %v693_v63 = vmul.f32 1.442695, %v640_v31  ;;  %v645_v12 = vsub.f32 0.0, %v6555_v22 }
 0x158   : > { %5567 = vpow2.f32 %v6388_v37  ;;  %v6567_v17 = vadd.f32 %v5966_v52, %v572_v60  ;;  %v6570_v11 = vadd.f32 %v5966_v52, %v575_v47  ;;  %v6573_v58 = vadd.f32 %v5966_v52, %v573_v62 }
 0x159   : > { %5569 = vpow2.f32 %v691_v20  ;;  %v703_v57 = vmul.f32 1.442695, %v645_v12  ;;  %v578_v33 = vmul.f32 %v6261_v54, %v5961_v50  ;;  %v576_v39 = vmul.f32 %v5961_v50, %v6269_v32  ;;  %v6593_v32 = vld [vmem:[%s10050_s4] sm:$0x3]  ;;  %v6602_v12 = vld [vmem:[%s10050_s4 + $0x2] sm:$0x3] }
 0x15a   : > { %5571 = vpow2.f32 %v697_v56  ;;  %v643_v37 = vsub.f32 0.0, %v6567_v17  ;;  %v646_v19 = vsub.f32 0.0, %v6570_v11  ;;  %v644_v31 = vsub.f32 0.0, %v6573_v58  ;;  %5445 = vmatprep.subr.msk.bf16.mxu1 %vm3676_vm10, %v6593_v32  ;;  %5443 = vmatprep.subr.msk.bf16.mxu0 %vm3676_vm10, %v6602_v12 }
 0x15b   : > { %5573 = vpow2.f32 %v693_v63  ;;  %v6583_v60 = vadd.f32 %v5966_v52, %v578_v33  ;;  %v6586_v20 = vadd.f32 %v5966_v52, %v576_v39  ;;  %v579_v54 = vmul.f32 %v6275_v26, %v5961_v50  ;;  %v10179_v26 = vld [vmem:[#allocation5_spill] sm:$0xff] }
 0x15c   : > { %v5558_v47 = vpop.eup %5557  ;;  %5575 = vpow2.f32 %v703_v57  ;;  %v699_v62 = vmul.f32 1.442695, %v643_v37  ;;  %v6595_v56 = vmul.f32 1.442695, %v646_v19  ;;  %v577_v63 = vmul.f32 %v5961_v50, %v6283_v24 }
 0x15d   : > { %v5560_v33 = vpop.eup %5559  ;;  %v6605_v39 = vmul.f32 %v5558_v47, %v10179_v26  ;;  %v6607_v8 = vmul.f32 1.442695, %v644_v31  ;;  %v6615_v50 = vadd.f32 %v5966_v52, %v579_v54 }
 0x15e   : > { %v5562_v37 = vpop.eup %5561  ;;  %v6612_v19 = vmul.f32 %v5560_v33, %v6096_v5  ;;  %5577 = vpow2.f32 %v699_v62  ;;  %v6621_v26 = vadd.f32 %v5966_v52, %v577_v63 }
 0x15f   : > { %10180 = vst [vmem:[#allocation5_spill] sm:$0xff] %v6605_v39  ;;  %10181 = vst [vmem:[#allocation29_spill] sm:$0xff] %v6615_v50  ;;  %v1025_v24 = vrot.slane %v6605_v39, 1  ;;  %v1126_v47 = vrot.slane %v6605_v39, 7  ;;  %v1291_v31 = vrot.slane %v6605_v39, 2  ;;  %v5564_v5 = vpop.eup %5563  ;;  %v1392_v54 = vrot.slane %v6605_v39, 6 }
 0x160   : > { %10182 = vst [vmem:[#allocation30_spill] sm:$0xff] %v6621_v26  ;;  %v10209_v18 = vrot.slane %v6612_v19, 7 }
 0x161   : > { %v5566_v13 = vpop.eup %5565  ;;  %v1062_v52 = vsel %vm1044_vm2, %v1025_v24, %v1026_v43  ;;  %v1063_v63 = vsel %vm1044_vm2, %v1024_v53, %v1025_v24  ;;  %v1163_v62 = vsel %vm1145_vm3, %v1126_v47, %v1127_v35  ;;  %v1164_v57 = vsel %vm1145_vm3, %v1125_v4, %v1126_v47 }
 0x162   : > { %v5568_v33 = vpop.eup %5567  ;;  %v1094_v10 = vsel %vm877_vm6, %v1062_v52, -inf  ;;  %v1196_v43 = vsel %vm878_vm7, %v1163_v62, -inf  ;;  %v1226_v3 = vmax.f32 %v1063_v63, %v6502_v21  ;;  %v1328_v53 = vsel %vm1310_vm4, %v1291_v31, %v1292_v55 }
 0x163   : > { %v5570_v35 = vpop.eup %5569  ;;  %v1227_v24 = vmax.f32 %v1094_v10, %v1164_v57  ;;  %v1228_v51 = vmax.f32 %v6521_v2, %v1196_v43  ;;  %v1329_v4 = vsel %vm1310_vm4, %v1290_v46, %v1291_v31  ;;  %v1360_v47 = vsel %vm945_vm8, %v1328_v53, -inf }
 0x164   : > { %v5572_v62 = vpop.eup %5571  ;;  %v1258_v21 = vmax.f32 %v6420_v15, %v1226_v3  ;;  %v1429_v55 = vsel %vm1411_vm5, %v1392_v54, %v1393_v34  ;;  %v10183_v10 = vrot.slane %v6420_v15, 6  ;;  %v1492_v3 = vmax.f32 %v1329_v4, %v6509_v16 }
 0x165   : > { %v5574_v52 = vpop.eup %5573  ;;  %v1259_v46 = vmax.f32 %v6605_v39, %v1227_v24  ;;  %v1462_v31 = vsel %vm946_vm9, %v1429_v55, -inf  ;;  %v1260_v53 = vmax.f32 %v6411_v29, %v1228_v51  ;;  %v6680_v15 = vmul.f32 %v5562_v37, %v6119_v28 }
 0x166   : > { %v1430_v2 = vsel %vm1411_vm5, %v10183_v10, %v1392_v54  ;;  %v5576_v43 = vpop.eup %5575  ;;  %v1494_v34 = vmax.f32 %v6537_v61, %v1462_v31  ;;  %v6683_v54 = vmul.f32 %v5566_v13, %v6322_v42  ;;  %v6685_v10 = vmax.f32 %v1258_v21, %v1492_v3 }
 0x167   : > { %v1493_v63 = vmax.f32 %v1360_v47, %v1430_v2  ;;  %v732_v57 = vadd.f32 1.0, %v5564_v5  ;;  %v737_v55 = vadd.f32 1.0, %v5568_v33  ;;  %v10094_v16 = vrot.slane %v6680_v15, 1 }
 0x168   : > { %v5578_v39 = vpop.eup %5577  ;;  %v10093_v4 = vrot.slane %v6680_v15, 7  ;;  %v10091_v51 = vrot.slane %v6680_v15, 2  ;;  %v735_v61 = vadd.f32 1.0, %v5570_v35  ;;  %v10090_v28 = vrot.slane %v6680_v15, 6 }
 0x169   : > { %v6687_v24 = vmax.f32 %v1259_v46, %v1493_v63  ;;  %v10088_v37 = vrot.slane %v6683_v54, 1  ;;  %v10087_v42 = vrot.slane %v6683_v54, 7  ;;  %v10089_v13 = vrot.slane %v6683_v54, 2 }
 0x16a   : > { %v10185_v5 = vrot.slane %v6478_v45, 1  ;;  %v10186_v47 = vrot.slane %v6478_v45, 7  ;;  %v10187_v21 = vrot.slane %v6478_v45, 2  ;;  %v10092_v46 = vrot.slane %v6683_v54, 6 }
 0x16b   : > { %10184 = vst [vmem:[#allocation31_spill] sm:$0xff] %v6687_v24  ;;  %v6715_v31 = vmax.f32 %v1260_v53, %v1494_v34  ;;  %5579 = vrcp.f32 %v732_v57  ;;  %v650_v57 = vsub.f32 0.0, %v6615_v50  ;;  %v10208_v9 = vrot.slane %v6680_v15, 1 }
 0x16c   : > { %v1060_v33 = vsel %vm1044_vm2, %v10185_v5, %v10094_v16  ;;  %v1161_v35 = vsel %vm1145_vm3, %v10186_v47, %v10093_v4  ;;  %v1326_v2 = vsel %vm1310_vm4, %v10187_v21, %v10091_v51  ;;  %v10189_v21 = vrot.slane %v6478_v45, 6 }
 0x16d   : > { %10188 = vst [vmem:[#allocation32_spill] sm:$0xff] %v6715_v31  ;;  %v1096_v3 = vsel %vm877_vm6, %v1060_v33, -inf  ;;  %v6721_v63 = vsel %vm878_vm7, %v1161_v35, -inf  ;;  %v1362_v5 = vsel %vm945_vm8, %v1326_v2, -inf  ;;  %v10190_v33 = vrot.slane %v6612_v19, 1 }
 0x16e   : > { %v1229_v47 = vmax.f32 %v1096_v3, %v6529_v36  ;;  %v1427_v53 = vsel %vm1411_vm5, %v10189_v21, %v10090_v28  ;;  %v1495_v34 = vmax.f32 %v1362_v5, %v6547_v23  ;;  %v10191_v36 = vrot.slane %v6612_v19, 7 }
 0x16f   : > { %v6739_v35 = vsel %vm1044_vm2, %v10190_v33, %v10088_v37  ;;  %v10192_v23 = vrot.slane %v6612_v19, 2  ;;  %v10193_v5 = vrot.slane %v6612_v19, 6  ;;  %5581 = vrcp.f32 %v737_v55 }
 0x170   : > { %v6747_v2 = vsel %vm1145_vm3, %v10191_v36, %v10087_v42  ;;  %v1261_v33 = vmax.f32 %v6478_v45, %v1229_v47  ;;  %v738_v36 = vadd.f32 1.0, %v5572_v62  ;;  %v736_v42 = vadd.f32 1.0, %v5574_v52  ;;  %v5046_v62 = vld [vmem:[%s10050_s4 + $0x4] sm:$0x3] }
 0x171   : > { %v6755_v3 = vsel %vm1310_vm4, %v10192_v23, %v10089_v13  ;;  %v6763_v21 = vsel %vm1411_vm5, %v10193_v5, %v10092_v46  ;;  %v6768_v37 = vsel %vm946_vm9, %v1427_v53, -inf  ;;  %5583 = vrcp.f32 %v735_v61 }
 0x172   : > { %v741_v23 = vadd.f32 1.0, %v5576_v43  ;;  %v739_v13 = vadd.f32 1.0, %v5578_v39  ;;  %v6770_v28 = vmax.f32 %v1261_v33, %v1495_v34  ;;  %5585 = vrcp.f32 %v738_v36 }
 0x173   : > { %v10195_v51 = vsub.f32 0.0, %v6583_v60  ;;  %5587 = vrcp.f32 %v736_v42  ;;  %v10196_v52 = vsub.f32 0.0, %v6586_v20  ;;  %v648_v61 = vsub.f32 0.0, %v6621_v26 }
 0x174   : > { %10194 = vst [vmem:[#allocation33_spill] sm:$0xff] %v6770_v28  ;;  %v6783_v39 = vsel %vm3676_vm10, %v6593_v32, 0  ;;  %5589 = vrcp.f32 %v741_v23  ;;  %v713_v43 = vmul.f32 1.442695, %v650_v57  ;;  %v3678_v47 = vsel %vm3676_vm10, %v6602_v12, 0  ;;  %v10199_v23 = vld [vmem:[#allocation14_spill] sm:$0xff] }
 0x175   : > { %v711_v5 = vmul.f32 1.442695, %v10195_v51  ;;  %v707_v55 = vmul.f32 1.442695, %v10196_v52  ;;  %10197 = vst [vmem:[#allocation34_spill] sm:$0xff] %v6783_v39  ;;  %5345 = vmatpush3.bf16.msra.mxu1 %v6783_v39  ;;  %5591 = vrcp.f32 %v739_v13  ;;  %5209 = vmatpush3.bf16.msra.mxu0 %v3678_v47  ;;  %v6792_v53 = vsel %vm3676_vm10, %v5046_v62, 0  ;;  %v5580_v51 = vpop.eup %5579 }
 0x176   : > { %v709_v42 = vmul.f32 1.442695, %v648_v61  ;;  %5446 = vmatprep.subr.msk.bf16.mxu1 %vm3676_vm10, %v5046_v62  ;;  %v1769_v34 = vmax.f32 %v6184_v59, %v6277_v38  ;;  %5593 = vpow2.f32 %v6595_v56  ;;  %v10198_v33 = vmax.f32 %v6303_v48, %v6184_v59  ;;  %v10200_v13 = vld [vmem:[#allocation27_spill] sm:$0xff]  ;;  %5444 = vmatprep.subr.msk.bf16.mxu0 %vm3676_vm10, %v6593_v32  ;;  %v10202_v52 = vld [vmem:[#allocation18_spill] sm:$0xff] }
 0x177   : > { %v1740_v12 = vmax.f32 %v6308_v14, %v10199_v23  ;;  %v1741_v57 = vmax.f32 %v10200_v13, %v6277_v38  ;;  %5595 = vpow2.f32 %v6607_v8  ;;  %v1997_v56 = vmax.f32 %v6469_v49, %v6184_v59 }
 0x178   : > { %v1771_v36 = vmax.f32 %v6277_v38, %v10198_v33  ;;  %v6809_v62 = vmax.f32 %v1769_v34, %v6303_v48  ;;  %v1742_v61 = vmax.f32 %v6465_v30, %v10202_v52  ;;  %5597 = vpow2.f32 %v711_v5  ;;  %v10205_v5 = vld [vmem:[#allocation20_spill] sm:$0xff] }
 0x179   : > { %v6819_v33 = vmax.f32 %v10202_v52, %v1740_v12  ;;  %v1773_v32 = vmax.f32 %v6303_v48, %v1741_v57  ;;  %5599 = vpow2.f32 %v707_v55  ;;  %v1743_v8 = vmax.f32 %v6469_v49, %v6303_v48  ;;  %v5582_v46 = vpop.eup %5581  ;;  %v10206_v55 = vld [vmem:[#allocation21_spill] sm:$0xff] }
 0x17a   : > { %10201 = vst [vmem:[#allocation27_spill] sm:$0xff] %v6809_v62  ;;  %v6816_v47 = vmax.f32 %v1771_v36, %v10200_v13  ;;  %v1774_v34 = vmax.f32 %v6308_v14, %v1742_v61  ;;  %v1998_v59 = vmax.f32 %v6480_v40, %v10199_v23  ;;  %v6828_v4 = vmul.f32 %v5580_v51, %v10205_v5 }
 0x17b   : > { %10204 = vst [vmem:[#allocation35_spill] sm:$0xff] %v6819_v33  ;;  %5601 = vpow2.f32 %v713_v43  ;;  %v6830_v36 = vmax.f32 %v1773_v32, %v1997_v56  ;;  %v5584_v57 = vpop.eup %5583  ;;  %v6835_v16 = vmul.f32 %v5582_v46, %v10206_v55  ;;  %v6838_v61 = vmax.f32 %v10200_v13, %v1743_v8 }
 0x17c   : > { %10203 = vst [vmem:[#allocation18_spill] sm:$0xff] %v6816_v47  ;;  %5603 = vpow2.f32 %v709_v42  ;;  %v6840_v45 = vmax.f32 %v1774_v34, %v1998_v59  ;;  %v5586_v29 = vpop.eup %5585  ;;  %v1029_v51 = vrot.slane %v6828_v4, 1  ;;  %v1130_v43 = vrot.slane %v6828_v4, 7 }
 0x17d   : > { %v1295_v56 = vrot.slane %v6828_v4, 2  ;;  %v1396_v32 = vrot.slane %v6828_v4, 6  ;;  %v5588_v5 = vpop.eup %5587  ;;  %v10207_v59 = vrot.slane %v6612_v19, 1  ;;  %v10210_v42 = vrot.slane %v6680_v15, 7 }
 0x17e   : > { %v5590_v34 = vpop.eup %5589  ;;  %v1059_v27 = vsel %vm1044_vm2, %v10208_v9, %v1029_v51  ;;  %v1159_v46 = vsel %vm1145_vm3, %v1130_v43, %v10209_v18  ;;  %v10211_v9 = vrot.slane %v6612_v19, 2  ;;  %v10226_v24 = vrot.slane %v6835_v16, 1 }
 0x17f   : > { %v1058_v55 = vsel %vm1044_vm2, %v1029_v51, %v10207_v59  ;;  %v1160_v8 = vsel %vm1145_vm3, %v10210_v42, %v1130_v43  ;;  %v5592_v12 = vpop.eup %5591  ;;  %v1200_v59 = vsel %vm878_vm7, %v1159_v46, -inf  ;;  %v1230_v28 = vmax.f32 %v1059_v27, %v6721_v63 }
 0x180   : > { %v1098_v41 = vsel %vm877_vm6, %v1058_v55, -inf  ;;  %v1324_v51 = vsel %vm1310_vm4, %v1295_v56, %v10211_v9  ;;  %v6875_v18 = vpop.eup %5593  ;;  %v1232_v39 = vmax.f32 %v6739_v35, %v1200_v59  ;;  %v10212_v43 = vrot.slane %v6680_v15, 2 }
 0x181   : > { %v1231_v31 = vmax.f32 %v1098_v41, %v1160_v8  ;;  %v1364_v46 = vsel %vm945_vm8, %v1324_v51, -inf  ;;  %v6884_v55 = vpop.eup %5595  ;;  %v1262_v27 = vmax.f32 %v6680_v15, %v1230_v28  ;;  %v10213_v63 = vrot.slane %v6612_v19, 6 }
 0x182   : > { %v1325_v42 = vsel %vm1310_vm4, %v10212_v43, %v1295_v56  ;;  %v10214_v41 = vrot.slane %v6680_v15, 6  ;;  %v6896_v56 = vpop.eup %5597  ;;  %v1264_v51 = vmax.f32 %v6612_v19, %v1232_v39  ;;  %v6918_v39 = vmul.f32 %v5588_v5, %v6351_v1 }
 0x183   : > { %v1425_v9 = vsel %vm1411_vm5, %v1396_v32, %v10213_v63  ;;  %v1496_v8 = vmax.f32 %v1325_v42, %v6768_v37  ;;  %v1263_v59 = vmax.f32 %v6828_v4, %v1231_v31  ;;  %v6902_v47 = vpop.eup %5599  ;;  %v6911_v37 = vmul.f32 %v5586_v29, %v6348_v25 }
 0x184   : > { %v1426_v35 = vsel %vm1411_vm5, %v10214_v41, %v1396_v32  ;;  %v1466_v28 = vsel %vm946_vm9, %v1425_v9, -inf  ;;  %v6908_v32 = vmul.f32 %v5584_v57, %v6337_v0  ;;  %v10228_v26 = vrot.slane %v6835_v16, 7 }
 0x185   : > { %v1497_v43 = vmax.f32 %v1364_v46, %v1426_v35  ;;  %v1498_v63 = vmax.f32 %v6755_v3, %v1466_v28  ;;  %v6905_v62 = vmax.f32 %v1262_v27, %v1496_v8  ;;  %v6913_v42 = vpop.eup %5601  ;;  %v6921_v46 = vmul.f32 %v5590_v34, %v6555_v22 }
 0x186   : > { %v6924_v3 = vmul.f32 %v5592_v12, %v6567_v17  ;;  %v6926_v27 = vpop.eup %5603  ;;  %v1032_v25 = vrot.slane %v6908_v32, 1  ;;  %v1133_v29 = vrot.slane %v6908_v32, 7  ;;  %v1298_v57 = vrot.slane %v6908_v32, 2 }
 0x187   : > { %10215 = vst [vmem:[#allocation20_spill] sm:$0xff] %v6905_v62  ;;  %v6915_v31 = vmax.f32 %v1263_v59, %v1497_v43  ;;  %v6928_v0 = vmax.f32 %v1264_v51, %v1498_v63  ;;  %v1399_v9 = vrot.slane %v6908_v32, 6  ;;  %v1035_v1 = vrot.slane %v6911_v37, 1 }
 0x188   : > { %v1136_v22 = vrot.slane %v6911_v37, 7  ;;  %v1301_v5 = vrot.slane %v6911_v37, 2  ;;  %v10218_v17 = vrot.slane %v6683_v54, 1  ;;  %v10219_v34 = vrot.slane %v6683_v54, 7 }
 0x189   : > { %10216 = vst [vmem:[#allocation21_spill] sm:$0xff] %v6915_v31  ;;  %10217 = vst [vmem:[#allocation36_spill] sm:$0xff] %v6928_v0  ;;  %v10220_v35 = vrot.slane %v6683_v54, 2  ;;  %v1402_v59 = vrot.slane %v6911_v37, 6  ;;  %v10221_v63 = vrot.slane %v6683_v54, 6  ;;  %v10223_v31 = vrot.slane %v6835_v16, 7 }
 0x18a   : > { %v1056_v12 = vsel %vm1044_vm2, %v10218_v17, %v1032_v25  ;;  %v1157_v41 = vsel %vm1145_vm3, %v10219_v34, %v1133_v29  ;;  %v10224_v62 = vrot.slane %v6835_v16, 2  ;;  %v10229_v33 = vrot.slane %v6835_v16, 2 }
 0x18b   : > { %v1322_v8 = vsel %vm1310_vm4, %v10220_v35, %v1298_v57  ;;  %v1100_v51 = vsel %vm877_vm6, %v1056_v12, -inf  ;;  %v1202_v28 = vsel %vm878_vm7, %v1157_v41, -inf  ;;  %v1423_v17 = vsel %vm1411_vm5, %v10221_v63, %v1399_v9 }
 0x18c   : > { %v1366_v43 = vsel %vm945_vm8, %v1322_v8, -inf  ;;  %v1233_v34 = vmax.f32 %v1100_v51, %v6747_v2  ;;  %v1468_v35 = vsel %vm946_vm9, %v1423_v17, -inf  ;;  %v10222_v12 = vrot.slane %v6835_v16, 1 }
 0x18d   : > { %v1499_v0 = vmax.f32 %v1366_v43, %v6763_v21  ;;  %v1154_v8 = vsel %vm1145_vm3, %v10223_v31, %v1136_v22  ;;  %v1319_v2 = vsel %vm1310_vm4, %v10224_v62, %v1301_v5  ;;  %v10225_v51 = vrot.slane %v6835_v16, 6 }
 0x18e   : > { %v1053_v41 = vsel %vm1044_vm2, %v10222_v12, %v1035_v1  ;;  %v1033_v43 = vrot.slane %v6918_v39, 1  ;;  %v1265_v63 = vmax.f32 %v6683_v54, %v1233_v34  ;;  %v1134_v17 = vrot.slane %v6918_v39, 7 }
 0x18f   : > { %v6980_v21 = vsel %vm1411_vm5, %v10225_v51, %v1402_v59  ;;  %v1299_v12 = vrot.slane %v6918_v39, 2  ;;  %v1400_v31 = vrot.slane %v6918_v39, 6 }
 0x190   : > { %v1054_v62 = vsel %vm1044_vm2, %v1033_v43, %v10226_v24  ;;  %v1055_v48 = vsel %vm1044_vm2, %v1032_v25, %v1033_v43  ;;  %v6995_v23 = vmax.f32 %v1265_v63, %v1499_v0  ;;  %v1155_v50 = vsel %vm1145_vm3, %v1134_v17, %v10228_v26 }
 0x191   : > { %v1102_v34 = vsel %vm877_vm6, %v1054_v62, -inf  ;;  %v1156_v24 = vsel %vm1145_vm3, %v1133_v29, %v1134_v17  ;;  %v1204_v25 = vsel %vm878_vm7, %v1155_v50, -inf  ;;  %v1234_v43 = vmax.f32 %v1055_v48, %v1202_v28 }
 0x192   : > { %10227 = vst [vmem:[#allocation37_spill] sm:$0xff] %v6995_v23  ;;  %v1235_v51 = vmax.f32 %v1102_v34, %v1156_v24  ;;  %v1320_v0 = vsel %vm1310_vm4, %v1299_v12, %v10229_v33  ;;  %v1236_v63 = vmax.f32 %v1053_v41, %v1204_v25  ;;  %v1321_v62 = vsel %vm1310_vm4, %v1298_v57, %v1299_v12 }
 0x193   : > { %v1368_v26 = vsel %vm945_vm8, %v1320_v0, -inf  ;;  %v10230_v23 = vrot.slane %v6835_v16, 6  ;;  %v1266_v48 = vmax.f32 %v6908_v32, %v1234_v43  ;;  %v1422_v28 = vsel %vm1411_vm5, %v1399_v9, %v1400_v31 }
 0x194   : > { %v1267_v50 = vmax.f32 %v6918_v39, %v1235_v51  ;;  %v1268_v57 = vmax.f32 %v6835_v16, %v1236_v63  ;;  %v1500_v41 = vmax.f32 %v1321_v62, %v1468_v35  ;;  %v1501_v17 = vmax.f32 %v1368_v26, %v1422_v28 }
 0x195   : > { %v1421_v29 = vsel %vm1411_vm5, %v1400_v31, %v10230_v23  ;;  %v1304_v34 = vrot.slane %v6921_v46, 2  ;;  %v1405_v23 = vrot.slane %v6921_v46, 6  ;;  %v1036_v24 = vrot.slane %v6924_v3, 1 }
 0x196   : > { %v1470_v33 = vsel %vm946_vm9, %v1421_v29, -inf  ;;  %v1137_v51 = vrot.slane %v6924_v3, 7  ;;  %v7030_v25 = vmax.f32 %v1266_v48, %v1500_v41  ;;  %v7032_v9 = vmax.f32 %v1267_v50, %v1501_v17 }
 0x197   : > { %v1502_v12 = vmax.f32 %v1319_v2, %v1470_v33  ;;  %v1302_v43 = vrot.slane %v6924_v3, 2  ;;  %v1052_v35 = vsel %vm1044_vm2, %v1035_v1, %v1036_v24  ;;  %v1403_v0 = vrot.slane %v6924_v3, 6 }
 0x198   : > { %v1153_v2 = vsel %vm1145_vm3, %v1136_v22, %v1137_v51  ;;  %v742_v63 = vadd.f32 1.0, %v6875_v18  ;;  %v1104_v62 = vsel %vm877_vm6, %v1052_v35, -inf  ;;  %v740_v29 = vadd.f32 1.0, %v6884_v55 }
 0x199   : > { %v7034_v31 = vmax.f32 %v1268_v57, %v1502_v12  ;;  %v7051_v26 = vsel %vm878_vm7, %v1153_v2, -inf  ;;  %v1318_v1 = vsel %vm1310_vm4, %v1301_v5, %v1302_v43  ;;  %v1237_v48 = vmax.f32 %v1104_v62, %v1154_v8 }
 0x19a   : > { %v1370_v22 = vsel %vm945_vm8, %v1318_v1, -inf  ;;  %v1419_v18 = vsel %vm1411_vm5, %v1402_v59, %v1403_v0  ;;  %5605 = vrcp.f32 %v742_v63  ;;  %v745_v5 = vadd.f32 1.0, %v6896_v56 }
 0x19b   : > { %v7066_v50 = vsel %vm946_vm9, %v1419_v18, -inf  ;;  %v1503_v28 = vmax.f32 %v1370_v22, %v6980_v21  ;;  %5607 = vrcp.f32 %v740_v29  ;;  %v1269_v55 = vmax.f32 %v6911_v37, %v1237_v48 }
 0x19c   : > { %v743_v8 = vadd.f32 1.0, %v6902_v47  ;;  %v746_v33 = vadd.f32 1.0, %v6913_v42  ;;  %v744_v57 = vadd.f32 1.0, %v6926_v27  ;;  %5609 = vrcp.f32 %v745_v5 }
 0x19d   : > { %v3600_v59 = vpack.c.bf16 %v6828_v4, %v6680_v15  ;;  %v3602_v41 = vpack.c.bf16 %v6918_v39, %v6908_v32  ;;  %v3603_v21 = vpack.c.bf16 %v6911_v37, %v6835_v16  ;;  %v7080_v17 = vmax.f32 %v1269_v55, %v1503_v28  ;;  %v7096_v16 = vld [vmem:[%s10050_s4 + $0x6] sm:$0x3] }
 0x19e   : > { %5611 = vrcp.f32 %v743_v8  ;;  %v10119_v47 = vrot.slane %v6830_v36, 7  ;;  %v10117_v15 = vrot.slane %v6830_v36, 6  ;;  %v10231_v4 = vmax.f32 %v6539_v7, %v6277_v38 }
 0x19f   : > { %5613 = vrcp.f32 %v746_v33  ;;  %5260 = vmatprep.mubr.msk.bf16.mxu1 %vm3627_vm11, %v3600_v59  ;;  %v10232_v37 = vpack.c.bf16 %v6683_v54, %v6612_v19  ;;  %v10120_v39 = vrot.slane %v6840_v45, 1  ;;  %v2158_v27 = vrot.slane %v6840_v45, 7 }
 0x1a0   : > { %v7091_v32 = vmax.f32 %v6838_v61, %v10231_v4  ;;  %5615 = vrcp.f32 %v744_v57  ;;  %v10118_v38 = vrot.slane %v6840_v45, 2  ;;  %v2414_v19 = vrot.slane %v6840_v45, 6 }
 0x1a1   : > { %5261 = vmatmul.mubr.msk.bf16.vlgmr.msra.gmra.mrb[0].mxu1 %vm3627_vm11, %v10232_v37  ;;  %v2209_v54 = vsel %vm1145_vm3, %v10119_v47, %v2158_v27  ;;  %v1745_v55 = vmax.f32 %v6539_v7, %v10200_v13  ;;  %v10236_v56 = vrot.slane %v6921_v46, 7 }
 0x1a2   : > { %5264 = vmatprep.mubr.msk.bf16.mxu1 %vm3627_vm11, %v3602_v41  ;;  %5277 = vmatpush3.bf16.msra.mxu1 %v6792_v53  ;;  %v10122_v61 = vrot.slane %v7091_v32, 1  ;;  %v10116_v12 = vrot.slane %v7091_v32, 7  ;;  %v10121_v35 = vrot.slane %v7091_v32, 2  ;;  %v10115_v2 = vrot.slane %v7091_v32, 6 }
 0x1a3   : > { %v1744_v53 = vmax.f32 %v6480_v40, %v6308_v14  ;;  %5447 = vmatprep.subr.msk.bf16.mxu1 %vm3676_vm10, %v7096_v16  ;;  %v2222_v29 = vsel %vm878_vm7, %v2209_v54, -inf  ;;  %v2465_v5 = vsel %vm1411_vm5, %v10117_v15, %v2414_v19  ;;  %v10234_v15 = vrot.slane %v6921_v46, 7 }
 0x1a4   : > { %v2112_v62 = vsel %vm1044_vm2, %v10120_v39, %v10122_v61  ;;  %v7132_v1 = vsel %vm1145_vm3, %v2158_v27, %v10116_v12  ;;  %v7142_v48 = vsel %vm1310_vm4, %v10118_v38, %v10121_v35  ;;  %v5606_v22 = vpop.eup %5605  ;;  %v7148_v28 = vsel %vm1411_vm5, %v2414_v19, %v10115_v2 }
 0x1a5   : > { %v2254_v18 = vmax.f32 %v2112_v62, %v2222_v29  ;;  %v5608_v8 = vpop.eup %5607  ;;  %v7157_v33 = vmul.f32 %v5606_v22, %v6570_v11  ;;  %v7161_v57 = vsel %vm946_vm9, %v2465_v5, -inf  ;;  %v7164_v59 = vmax.f32 %v6465_v30, %v1744_v53 }
 0x1a6   : > { %v836_v4 = vmul.f32 %v5608_v8, %v6573_v58  ;;  %v7175_v11 = vmax.f32 %v6469_v49, %v1745_v55  ;;  %v5610_v19 = vpop.eup %5609  ;;  %v10233_v55 = vrot.slane %v6921_v46, 1 }
 0x1a7   : > { %v7170_v37 = vmax.f32 %v6840_v45, %v2254_v18  ;;  %v1039_v54 = vrot.slane %v7157_v33, 1  ;;  %v1140_v53 = vrot.slane %v7157_v33, 7  ;;  %v1305_v62 = vrot.slane %v7157_v33, 2 }
 0x1a8   : > { %v1406_v29 = vrot.slane %v7157_v33, 6  ;;  %v5612_v22 = vpop.eup %5611  ;;  %v1037_v58 = vrot.slane %v836_v4, 1  ;;  %v1138_v5 = vrot.slane %v836_v4, 7  ;;  %v1303_v18 = vrot.slane %v836_v4, 2 }
 0x1a9   : > { %v1404_v8 = vrot.slane %v836_v4, 6  ;;  %5265 = vmatmul.mubr.msk.bf16.gmra.mrb[4].mxu1 %vm3627_vm11, %v3603_v21  ;;  %v5614_v2 = vpop.eup %5613  ;;  %v1049_v12 = vsel %vm1044_vm2, %v10233_v55, %v1039_v54  ;;  %v1150_v42 = vsel %vm1145_vm3, %v10234_v15, %v1140_v53  ;;  %v1315_v38 = vsel %vm1310_vm4, %v1304_v34, %v1305_v62 }
 0x1aa   : > { %v7198_v21 = vsel %vm1411_vm5, %v1405_v23, %v1406_v29  ;;  %v5616_v47 = vpop.eup %5615  ;;  %v10235_v63 = vmov %v10233_v55  ;;  %v1051_v15 = vsel %vm1044_vm2, %v1036_v24, %v1037_v58  ;;  %v1151_v39 = vsel %vm1145_vm3, %v1138_v5, %v10236_v56 }
 0x1ab   : > { %v1050_v55 = vsel %vm1044_vm2, %v1037_v58, %v10235_v63  ;;  %v1152_v35 = vsel %vm1145_vm3, %v1137_v51, %v1138_v5  ;;  %v1208_v63 = vsel %vm878_vm7, %v1151_v39, -inf  ;;  %v1238_v41 = vmax.f32 %v1051_v15, %v7051_v26 }
 0x1ac   : > { %v1106_v61 = vsel %vm877_vm6, %v1050_v55, -inf  ;;  %v1316_v24 = vsel %vm1310_vm4, %v1303_v18, %v1304_v34  ;;  %v1240_v56 = vmax.f32 %v1049_v12, %v1208_v63  ;;  %v1317_v51 = vsel %vm1310_vm4, %v1302_v43, %v1303_v18 }
 0x1ad   : > { %v1239_v58 = vmax.f32 %v1106_v61, %v1152_v35  ;;  %v1372_v5 = vsel %vm945_vm8, %v1316_v24, -inf  ;;  %v1270_v55 = vmax.f32 %v6924_v3, %v1238_v41  ;;  %v1417_v26 = vsel %vm1411_vm5, %v1404_v8, %v1405_v23 }
 0x1ae   : > { %v1418_v34 = vsel %vm1411_vm5, %v1403_v0, %v1404_v8  ;;  %v1504_v39 = vmax.f32 %v1317_v51, %v7066_v50  ;;  %v1272_v43 = vmax.f32 %v6921_v46, %v1240_v56  ;;  %v1474_v12 = vsel %vm946_vm9, %v1417_v26, -inf  ;;  %v10237_v0 = vld [vmem:[#allocation29_spill] sm:$0xff]  ;;  %v10238_v8 = vld [vmem:[#allocation30_spill] sm:$0xff] }
 0x1af   : > { %v1271_v61 = vmax.f32 %v836_v4, %v1239_v58  ;;  %v1505_v35 = vmax.f32 %v1372_v5, %v1418_v34  ;;  %v1506_v41 = vmax.f32 %v1315_v38, %v1474_v12  ;;  %v7247_v15 = vmul.f32 %v5610_v19, %v6583_v60 }
 0x1b0   : > { %v7244_v18 = vmax.f32 %v1270_v55, %v1504_v39  ;;  %v7250_v23 = vmul.f32 %v5612_v22, %v6586_v20  ;;  %v7255_v50 = vmul.f32 %v5614_v2, %v10237_v0  ;;  %v7258_v24 = vmul.f32 %v5616_v47, %v10238_v8  ;;  %v10239_v0 = vld [vmem:[#allocation7_spill] sm:$0xff] }
 0x1b1   : > { %v7252_v63 = vmax.f32 %v1271_v61, %v1505_v35  ;;  %v3604_v58 = vpack.c.bf16 %v836_v4, %v6924_v3  ;;  %v7261_v56 = vmax.f32 %v1272_v43, %v1506_v41  ;;  %v1042_v38 = vrot.slane %v7247_v15, 1 }
 0x1b2   : > { %v1143_v60 = vrot.slane %v7247_v15, 7  ;;  %v1308_v19 = vrot.slane %v7247_v15, 2  ;;  %v1409_v20 = vrot.slane %v7247_v15, 6  ;;  %v1040_v22 = vrot.slane %v7250_v23, 1 }
 0x1b3   : > { %v1141_v2 = vrot.slane %v7250_v23, 7  ;;  %v1306_v51 = vrot.slane %v7250_v23, 2  ;;  %5268 = vmatprep.mubr.msk.bf16.mxu1 %vm3627_vm11, %v3604_v58  ;;  %v10123_v3 = vrot.slane %v7250_v23, 6  ;;  %v1043_v47 = vrot.slane %v7255_v50, 1 }
 0x1b4   : > { %v1144_v4 = vrot.slane %v7255_v50, 7  ;;  %v1309_v5 = vrot.slane %v7255_v50, 2  ;;  %v1048_v55 = vsel %vm1044_vm2, %v1039_v54, %v1040_v22  ;;  %v1410_v39 = vrot.slane %v7255_v50, 6 }
 0x1b5   : > { %v1149_v26 = vsel %vm1145_vm3, %v1140_v53, %v1141_v2  ;;  %v1314_v34 = vsel %vm1310_vm4, %v1305_v62, %v1306_v51  ;;  %v1108_v61 = vsel %vm877_vm6, %v1048_v55, -inf  ;;  %v1415_v54 = vsel %vm1411_vm5, %v1406_v29, %v10123_v3 }
 0x1b6   : > { %v1210_v43 = vsel %vm878_vm7, %v1149_v26, -inf  ;;  %v1374_v12 = vsel %vm945_vm8, %v1314_v34, -inf  ;;  %v1241_v53 = vmax.f32 %v1108_v61, %v1150_v42  ;;  %v1476_v62 = vsel %vm946_vm9, %v1415_v54, -inf  ;;  %v10243_v54 = vld [vmem:[#allocation10_spill] sm:$0xff] }
 0x1b7   : > { %v1507_v35 = vmax.f32 %v1374_v12, %v7198_v21  ;;  %v1045_v41 = vsel %vm1044_vm2, %v1042_v38, %v1043_v47  ;;  %v10240_v8 = vrot.slane %v10239_v0, 1  ;;  %v1146_v55 = vsel %vm1145_vm3, %v1143_v60, %v1144_v4 }
 0x1b8   : > { %v10241_v26 = vrot.slane %v10239_v0, 7  ;;  %v7309_v29 = vsel %vm1310_vm4, %v1308_v19, %v1309_v5  ;;  %v1273_v21 = vmax.f32 %v7157_v33, %v1241_v53  ;;  %v10242_v61 = vrot.slane %v10239_v0, 2 }
 0x1b9   : > { %v1076_v58 = vsel %vm1044_vm2, %v1043_v47, %v10240_v8  ;;  %v1412_v53 = vsel %vm1411_vm5, %v1409_v20, %v1410_v39 }
 0x1ba   : > { %v1177_v42 = vsel %vm1145_vm3, %v1144_v4, %v10241_v26  ;;  %v1112_v34 = vsel %vm877_vm6, %v1076_v58, -inf  ;;  %v1342_v12 = vsel %vm1310_vm4, %v1309_v5, %v10242_v61  ;;  %v7327_v58 = vmax.f32 %v1273_v21, %v1507_v35 }
 0x1bb   : > { %v1182_v47 = vsel %vm878_vm7, %v1177_v42, -inf  ;;  %v1245_v4 = vmax.f32 %v1112_v34, %v1146_v55  ;;  %v1378_v26 = vsel %vm945_vm8, %v1342_v12, -inf  ;;  %v10244_v42 = vrot.slane %v10239_v0, 6  ;;  %v10245_v12 = vld [vmem:[#allocation13_spill] sm:$0xff] }
 0x1bc   : > { %v1214_v8 = vmax.f32 %v10243_v54, %v1182_v47  ;;  %v1511_v3 = vmax.f32 %v1378_v26, %v1412_v53  ;;  %v1041_v5 = vrot.slane %v7258_v24, 1  ;;  %v1142_v61 = vrot.slane %v7258_v24, 7 }
 0x1bd   : > { %v1443_v27 = vsel %vm1411_vm5, %v1410_v39, %v10244_v42  ;;  %v1277_v34 = vmax.f32 %v7255_v50, %v1245_v4  ;;  %v1307_v54 = vrot.slane %v7258_v24, 2 }
 0x1be   : > { %v1246_v55 = vmax.f32 %v10239_v0, %v1214_v8  ;;  %v1448_v47 = vsel %vm946_vm9, %v1443_v27, -inf  ;;  %v1046_v21 = vsel %vm1044_vm2, %v1041_v5, %v1042_v38  ;;  %v1047_v39 = vsel %vm1044_vm2, %v1040_v22, %v1041_v5 }
 0x1bf   : > { %v1480_v35 = vmax.f32 %v10245_v12, %v1448_v47  ;;  %v7345_v26 = vmax.f32 %v1277_v34, %v1511_v3  ;;  %v1110_v8 = vsel %vm877_vm6, %v1046_v21, -inf  ;;  %v1147_v27 = vsel %vm1145_vm3, %v1142_v61, %v1143_v60  ;;  %v10247_v21 = vld [vmem:[#allocation14_spill] sm:$0xff] }
 0x1c0   : > { %v1148_v4 = vsel %vm1145_vm3, %v1141_v2, %v1142_v61  ;;  %v1212_v38 = vsel %vm878_vm7, %v1147_v27, -inf  ;;  %v1242_v42 = vmax.f32 %v1047_v39, %v1210_v43  ;;  %v1312_v5 = vsel %vm1310_vm4, %v1307_v54, %v1308_v19 }
 0x1c1   : > { %10246 = vst [vmem:[#allocation29_spill] sm:$0xff] %v7345_v26  ;;  %v1512_v53 = vmax.f32 %v1246_v55, %v1480_v35  ;;  %v1243_v47 = vmax.f32 %v1110_v8, %v1148_v4  ;;  %v1244_v3 = vmax.f32 %v1045_v41, %v1212_v38  ;;  %v1313_v34 = vsel %vm1310_vm4, %v1306_v51, %v1307_v54  ;;  %v10250_v4 = vld [vmem:[#allocation35_spill] sm:$0xff] }
 0x1c2   : > { %v1274_v2 = vmax.f32 %v7250_v23, %v1242_v42  ;;  %v1376_v43 = vsel %vm945_vm8, %v1312_v5, -inf  ;;  %v1408_v12 = vrot.slane %v7258_v24, 6  ;;  %v1508_v41 = vmax.f32 %v1313_v34, %v1476_v62 }
 0x1c3   : > { %v1738_v60 = vmax.f32 %v10202_v52, %v1512_v53  ;;  %v1275_v55 = vmax.f32 %v7258_v24, %v1243_v47  ;;  %v1276_v61 = vmax.f32 %v7247_v15, %v1244_v3  ;;  %v3605_v19 = vpack.c.bf16 %v7157_v33, %v6921_v46  ;;  %v10252_v47 = vld [vmem:[#allocation19_spill] sm:$0xff] }
 0x1c4   : > { %v3606_v51 = vpack.c.bf16 %v7258_v24, %v7250_v23  ;;  %v3607_v35 = vpack.c.bf16 %v7255_v50, %v7247_v15  ;;  %v1768_v39 = vmax.f32 %v1512_v53, %v10247_v21  ;;  %v1413_v8 = vsel %vm1411_vm5, %v1408_v12, %v1409_v20  ;;  %v10253_v3 = vld [vmem:[#allocation31_spill] sm:$0xff] }
 0x1c5   : > { %v1770_v54 = vmax.f32 %v10247_v21, %v1738_v60  ;;  %v10248_v62 = vrot.slane %v7250_v23, 6  ;;  %v7384_v33 = vmax.f32 %v1274_v2, %v1508_v41  ;;  %5269 = vmatmul.mubr.msk.bf16.gmra.mrb[8].mxu1 %vm3627_vm11, %v3605_v19  ;;  %v1996_v50 = vmax.f32 %v6465_v30, %v1512_v53  ;;  %v10254_v60 = vld [vmem:[#allocation27_spill] sm:$0xff] }
 0x1c6   : > { %v1478_v24 = vsel %vm946_vm9, %v1413_v8, -inf  ;;  %5272 = vmatprep.mubr.msk.bf16.mxu1 %vm3627_vm11, %v3606_v51  ;;  %v7392_v15 = vmax.f32 %v1768_v39, %v10202_v52  ;;  %v10251_v53 = vmax.f32 %v7142_v48, %v7161_v57  ;;  %v2001_v5 = vmax.f32 %v10253_v3, %v10252_v47 }
 0x1c7   : > { %v1414_v46 = vsel %vm1411_vm5, %v10248_v62, %v1408_v12  ;;  %v7395_v23 = vmax.f32 %v1770_v54, %v6308_v14  ;;  %v1510_v20 = vmax.f32 %v7309_v29, %v1478_v24  ;;  %v7399_v38 = vmax.f32 %v10250_v4, %v1996_v50  ;;  %v10258_v50 = vld [vmem:[#allocation34_spill] sm:$0xff] }
 0x1c8   : > { %v1509_v27 = vmax.f32 %v1376_v43, %v1414_v46  ;;  %10249 = vst [vmem:[#allocation30_spill] sm:$0xff] %v7392_v15  ;;  %v7405_v42 = vmax.f32 %v7170_v37, %v10251_v53  ;;  %v3609_v2 = vpack.c.bf16 %v10254_v60, %v7392_v15  ;;  %v10255_v43 = vld [vmem:[#allocation18_spill] sm:$0xff]  ;;  %v10256_v12 = vmax.f32 %v6685_v10, %v10202_v52 }
 0x1c9   : > { %v3610_v29 = vpack.c.bf16 %v10255_v43, %v7395_v23  ;;  %v7421_v48 = vmax.f32 %v1276_v61, %v1510_v20  ;;  %v2060_v57 = vrot.slane %v7399_v38, 1  ;;  %v2156_v37 = vrot.slane %v7399_v38, 7 }
 0x1ca   : > { %v7409_v34 = vmax.f32 %v1275_v55, %v1509_v27  ;;  %v7419_v41 = vmax.f32 %v7164_v59, %v10256_v12  ;;  %5210 = vmatprep.mubr.msk.bf16.mxu0 %vm3627_vm11, %v3609_v2  ;;  %v3611_v52 = vpack.c.bf16 %v6830_v36, %v7399_v38  ;;  %v7433_v59 = vmax.f32 %v7175_v11, %v2001_v5 }
 0x1cb   : > { %10257 = vst [vmem:[#allocation10_spill] sm:$0xff] %v7421_v48  ;;  %5211 = vmatmul.mubr.msk.bf16.vlgmr.msra.gmra.mrb[32].mxu0 %vm3627_vm11, %v3610_v29  ;;  %v10259_v24 = vrot.slane %v7091_v32, 1  ;;  %v10260_v20 = vrot.slane %v7091_v32, 2  ;;  %v10125_v2 = vrot.slane %v7392_v15, 1  ;;  %v2057_v29 = vrot.slane %v10254_v60, 1 }
 0x1cc   : > { %v1799_v19 = vmax.f32 %v7345_v26, %v7409_v34  ;;  %v10126_v61 = vrot.slane %v7419_v41, 1  ;;  %v10124_v39 = vrot.slane %v7419_v41, 2  ;;  %5214 = vmatprep.mubr.msk.bf16.mxu0 %vm3627_vm11, %v3611_v52  ;;  %5243 = vmatpush3.bf16.msra.mxu0 %v10258_v50  ;;  %v3613_v47 = vpack.c.bf16 %v7433_v59, %v7419_v41 }
 0x1cd   : > { %5273 = vmatmul.mubr.msk.bf16.gmra.mrb[12].mxu1 %vm3627_vm11, %v3607_v35  ;;  %v2059_v52 = vrot.slane %v10255_v43, 1  ;;  %v10261_v50 = vrot.slane %v6840_v45, 1  ;;  %v2118_v22 = vsel %vm1044_vm2, %v10125_v2, %v2057_v29  ;;  %v2152_v53 = vrot.slane %v7392_v15, 7 }
 0x1ce   : > { %v7441_v8 = vmax.f32 %v1799_v19, %v7327_v58  ;;  %v2111_v27 = vsel %vm1044_vm2, %v10259_v24, %v10126_v61  ;;  %v2367_v4 = vsel %vm1310_vm4, %v10260_v20, %v10124_v39  ;;  %v2058_v19 = vrot.slane %v7395_v23, 1 }
 0x1cf   : > { %v7466_v35 = vsel %vm877_vm6, %v2111_v27, -inf  ;;  %v7470_v5 = vsel %vm945_vm8, %v2367_v4, -inf  ;;  %v10262_v24 = vrot.slane %v6830_v36, 1  ;;  %v2115_v39 = vsel %vm1044_vm2, %v2059_v52, %v2060_v57 }
 0x1d0   : > { %v2123_v2 = vsel %vm877_vm6, %v2115_v39, -inf  ;;  %v2155_v21 = vrot.slane %v10255_v43, 7 }
 0x1d1   : > { %v2113_v27 = vsel %vm1044_vm2, %v10262_v24, %v10261_v50  ;;  %v10263_v20 = vmov %v10262_v24  ;;  %v2116_v50 = vsel %vm1044_vm2, %v2058_v19, %v2059_v52  ;;  %v2117_v24 = vsel %vm1044_vm2, %v2057_v29, %v2058_v19 }
 0x1d2   : > { %v2114_v4 = vsel %vm1044_vm2, %v2060_v57, %v10263_v20  ;;  %v2125_v54 = vsel %vm877_vm6, %v2113_v27, -inf  ;;  %v2153_v20 = vrot.slane %v10254_v60, 7  ;;  %v2121_v46 = vsel %vm877_vm6, %v2117_v24, -inf }
 0x1d3   : > { %v2154_v27 = vrot.slane %v7395_v23, 7  ;;  %v10264_v57 = vpack.c.bf16 %v7091_v32, %v6840_v45  ;;  %v10127_v52 = vrot.slane %v7441_v8, 7  ;;  %v10265_v29 = vrot.slane %v6830_v36, 7 }
 0x1d4   : > { %v2214_v24 = vsel %vm1145_vm3, %v2152_v53, %v2153_v20  ;;  %v2211_v11 = vsel %vm1145_vm3, %v2155_v21, %v2156_v37 }
 0x1d5   : > { %5215 = vmatmul.mubr.msk.bf16.gmra.mrb[36].mxu0 %vm3627_vm11, %v10264_v57  ;;  %v2210_v19 = vsel %vm1145_vm3, %v2156_v37, %v10265_v29  ;;  %v2212_v57 = vsel %vm1145_vm3, %v2154_v27, %v2155_v21  ;;  %v2213_v61 = vsel %vm1145_vm3, %v2153_v20, %v2154_v27  ;;  %v2249_v62 = vmax.f32 %v2121_v46, %v2214_v24 }
 0x1d6   : > { %5218 = vmatprep.mubr.msk.bf16.mxu0 %vm3627_vm11, %v3613_v47  ;;  %v2215_v29 = vsel %vm1145_vm3, %v10127_v52, %v2152_v53  ;;  %v2218_v12 = vsel %vm878_vm7, %v2213_v61, -inf  ;;  %v2220_v47 = vsel %vm878_vm7, %v2211_v11, -inf  ;;  %v2251_v51 = vmax.f32 %v2123_v2, %v2212_v57 }
 0x1d7   : > { %v2216_v37 = vsel %vm878_vm7, %v2215_v29, -inf  ;;  %v2250_v21 = vmax.f32 %v2116_v50, %v2218_v12  ;;  %v2252_v39 = vmax.f32 %v2114_v4, %v2220_v47  ;;  %v2253_v55 = vmax.f32 %v2125_v54, %v2210_v19 }
 0x1d8   : > { %v2248_v20 = vmax.f32 %v2118_v22, %v2216_v37  ;;  %v2281_v46 = vmax.f32 %v10254_v60, %v2249_v62  ;;  %v2283_v27 = vmax.f32 %v10255_v43, %v2251_v51  ;;  %v2313_v53 = vrot.slane %v10254_v60, 2 }
 0x1d9   : > { %v2282_v24 = vmax.f32 %v7395_v23, %v2250_v21  ;;  %v2284_v61 = vmax.f32 %v7399_v38, %v2252_v39  ;;  %v2285_v11 = vmax.f32 %v6830_v36, %v2253_v55  ;;  %v2314_v2 = vrot.slane %v7395_v23, 2 }
 0x1da   : > { %v2280_v57 = vmax.f32 %v7392_v15, %v2248_v20  ;;  %v2315_v12 = vrot.slane %v10255_v43, 2  ;;  %v10266_v22 = vrot.slane %v6840_v45, 2  ;;  %v10267_v54 = vrot.slane %v6830_v36, 2 }
 0x1db   : > { %v10269_v4 = vrot.slane %v7399_v38, 2  ;;  %v2373_v50 = vsel %vm1310_vm4, %v2313_v53, %v2314_v2  ;;  %v10270_v19 = vrot.slane %v7392_v15, 2  ;;  %v2408_v29 = vrot.slane %v7392_v15, 6 }
 0x1dc   : > { %v2369_v51 = vsel %vm1310_vm4, %v10267_v54, %v10266_v22  ;;  %v10268_v62 = vmov %v10267_v54  ;;  %v2372_v21 = vsel %vm1310_vm4, %v2314_v2, %v2315_v12  ;;  %v2377_v20 = vsel %vm945_vm8, %v2373_v50, -inf }
 0x1dd   : > { %v2370_v55 = vsel %vm1310_vm4, %v10269_v4, %v10268_v62  ;;  %v2374_v45 = vsel %vm1310_vm4, %v10270_v19, %v2313_v53  ;;  %v2381_v39 = vsel %vm945_vm8, %v2369_v51, -inf  ;;  %v10271_v47 = vmov %v10269_v4 }
 0x1de   : > { %v2371_v37 = vsel %vm1310_vm4, %v2315_v12, %v10271_v47  ;;  %v2409_v22 = vrot.slane %v10254_v60, 6  ;;  %v2410_v54 = vrot.slane %v7395_v23, 6  ;;  %v2411_v51 = vrot.slane %v10255_v43, 6 }
 0x1df   : > { %v2379_v53 = vsel %vm945_vm8, %v2371_v37, -inf  ;;  %v10133_v62 = vrot.slane %v7441_v8, 6  ;;  %v10272_v4 = vrot.slane %v6830_v36, 6  ;;  %v10273_v19 = vrot.slane %v7399_v38, 6 }
 0x1e0   : > { %v2470_v12 = vsel %vm1411_vm5, %v2408_v29, %v2409_v22  ;;  %v1746_v60 = vmax.f32 %v6685_v10, %v6465_v30  ;;  %v1747_v23 = vmax.f32 %v10253_v3, %v6469_v49  ;;  %v2468_v36 = vsel %vm1411_vm5, %v2410_v54, %v2411_v51 }
 0x1e1   : > { %v2466_v2 = vsel %vm1411_vm5, %v10273_v19, %v10272_v4  ;;  %v10274_v43 = vmov %v10273_v19  ;;  %v2469_v47 = vsel %vm1411_vm5, %v2409_v22, %v2410_v54  ;;  %v2471_v37 = vsel %vm1411_vm5, %v10133_v62, %v2408_v29 }
 0x1e2   : > { %v2467_v50 = vsel %vm1411_vm5, %v2411_v51, %v10274_v43  ;;  %v2472_v4 = vsel %vm946_vm9, %v2471_v37, -inf  ;;  %v2474_v38 = vsel %vm946_vm9, %v2469_v47, -inf  ;;  %v2505_v43 = vmax.f32 %v2377_v20, %v2470_v12 }
 0x1e3   : > { %v2476_v19 = vsel %vm946_vm9, %v2467_v50, -inf  ;;  %v2504_v52 = vmax.f32 %v2374_v45, %v2472_v4  ;;  %v2506_v51 = vmax.f32 %v2372_v21, %v2474_v38  ;;  %v2507_v15 = vmax.f32 %v2379_v53, %v2468_v36  ;;  %v10275_v45 = vld [vmem:[#allocation32_spill] sm:$0xff] }
 0x1e4   : > { %v2508_v0 = vmax.f32 %v2370_v55, %v2476_v19  ;;  %v2509_v22 = vmax.f32 %v2381_v39, %v2466_v2  ;;  %v7611_v54 = vmax.f32 %v2281_v46, %v2505_v43  ;;  %v1778_v26 = vmax.f32 %v6480_v40, %v1746_v60  ;;  %v10276_v46 = vld [vmem:[#allocation33_spill] sm:$0xff] }
 0x1e5   : > { %v1779_v29 = vmax.f32 %v6539_v7, %v1747_v23  ;;  %v7615_v62 = vmax.f32 %v2280_v57, %v2504_v52  ;;  %v7617_v37 = vmax.f32 %v2282_v24, %v2506_v51  ;;  %v7619_v47 = vmax.f32 %v2283_v27, %v2507_v15  ;;  %v10279_v51 = vld [vmem:[#allocation20_spill] sm:$0xff] }
 0x1e6   : > { %v7621_v48 = vmax.f32 %v2284_v61, %v2508_v0  ;;  %v7623_v20 = vmax.f32 %v2285_v11, %v2509_v22  ;;  %v2002_v55 = vmax.f32 %v10275_v45, %v6308_v14  ;;  %v2003_v39 = vmax.f32 %v10276_v46, %v10200_v13 }
 0x1e7   : > { %v10277_v21 = vmax.f32 %v7466_v35, %v7132_v1  ;;  %v2664_v0 = vmax.f32 %v7615_v62, %v7617_v37  ;;  %v2665_v15 = vmax.f32 %v7611_v54, %v7619_v47  ;;  %v2511_v14 = vmax.f32 %v7470_v5, %v7148_v28 }
 0x1e8   : > { %v2634_v24 = vmax.f32 %v7621_v48, %v7615_v62  ;;  %v2635_v13 = vmax.f32 %v7623_v20, %v7611_v54  ;;  %v7643_v27 = vmax.f32 %v1778_v26, %v2002_v55  ;;  %v7645_v1 = vmax.f32 %v1779_v29, %v2003_v39  ;;  %v10280_v29 = vld [vmem:[#allocation21_spill] sm:$0xff] }
 0x1e9   : > { %v2287_v52 = vmax.f32 %v7091_v32, %v10277_v21  ;;  %v4382_v35 = vsel %vm3676_vm10, %v7096_v16, 0  ;;  %v7650_v61 = vmax.f32 %v2664_v0, %v7621_v48  ;;  %v7653_v11 = vmax.f32 %v2665_v15, %v7623_v20 }
 0x1ea   : > { %v2666_v28 = vmax.f32 %v7617_v37, %v2634_v24  ;;  %v2066_v5 = vrot.slane %v7643_v27, 1  ;;  %v2067_v26 = vrot.slane %v7645_v1, 1  ;;  %v2162_v53 = vrot.slane %v7643_v27, 7 }
 0x1eb   : > { %10278 = vst [vmem:[#allocation13_spill] sm:$0xff] %v7650_v61  ;;  %v7655_v57 = vmax.f32 %v2287_v52, %v2511_v14  ;;  %v2163_v2 = vrot.slane %v7645_v1, 7  ;;  %v4053_v16 = vpack.c.bf16 %v7653_v11, %v7650_v61  ;;  %v2322_v12 = vrot.slane %v7643_v27, 2 }
 0x1ec   : > { %v2323_v60 = vrot.slane %v7645_v1, 2  ;;  %v3614_v36 = vpack.c.bf16 %v7645_v1, %v7643_v27  ;;  %v2667_v4 = vmax.f32 %v7619_v47, %v2635_v13  ;;  %v7672_v38 = vmax.f32 %v2666_v28, %v7405_v42 }
 0x1ed   : > { %5278 = vmatprep.mubr.msk.bf16.mxu1 %vm3627_vm11, %v4053_v16  ;;  %v1748_v19 = vmax.f32 %v10275_v45, %v6480_v40  ;;  %v1749_v43 = vmax.f32 %v10276_v46, %v6539_v7  ;;  %v2004_v22 = vmax.f32 %v10279_v51, %v6465_v30  ;;  %v2005_v55 = vmax.f32 %v10280_v29, %v6469_v49 }
 0x1ee   : > { %5219 = vmatmul.mubr.msk.bf16.gmra.mrb[40].mxu0 %vm3627_vm11, %v3614_v36  ;;  %v7685_v39 = vmax.f32 %v2667_v4, %v7655_v57  ;;  %v10281_v21 = vrot.slane %v7433_v59, 1  ;;  %v10283_v0 = vrot.slane %v7419_v41, 1  ;;  %v10284_v49 = vrot.slane %v7433_v59, 7 }
 0x1ef   : > { %v10285_v15 = vrot.slane %v7419_v41, 7  ;;  %v1780_v13 = vmax.f32 %v6685_v10, %v1748_v19  ;;  %v1781_v28 = vmax.f32 %v10253_v3, %v1749_v43  ;;  %v10287_v4 = vrot.slane %v7091_v32, 7 }
 0x1f0   : > { %v2109_v52 = vsel %vm1044_vm2, %v10281_v21, %v2066_v5  ;;  %v10282_v24 = vmov %v10281_v21  ;;  %v10288_v19 = vrot.slane %v7433_v59, 2 }
 0x1f1   : > { %v2110_v30 = vsel %vm1044_vm2, %v10283_v0, %v10282_v24  ;;  %v2206_v14 = vsel %vm1145_vm3, %v10285_v15, %v10284_v49  ;;  %v2129_v16 = vsel %vm877_vm6, %v2109_v52, -inf  ;;  %v10286_v36 = vmov %v10285_v15 }
 0x1f2   : > { %v2207_v21 = vsel %vm1145_vm3, %v10287_v4, %v10286_v36  ;;  %v4054_v24 = vpack.c.bf16 %v7685_v39, %v7672_v38  ;;  %v2257_v49 = vmax.f32 %v2129_v16, %v2206_v14  ;;  %v2365_v43 = vsel %vm1310_vm4, %v10288_v19, %v2322_v12 }
 0x1f3   : > { %v2224_v0 = vsel %vm878_vm7, %v2207_v21, -inf  ;;  %v7725_v52 = vmax.f32 %v1780_v13, %v2004_v22  ;;  %v7727_v15 = vmax.f32 %v1781_v28, %v2005_v55  ;;  %v10289_v36 = vmov %v10288_v19 }
 0x1f4   : > { %v2256_v23 = vmax.f32 %v2110_v30, %v2224_v0  ;;  %v10290_v4 = vrot.slane %v7419_v41, 2  ;;  %5279 = vmatmul.mubr.msk.bf16.vlgmr.msra.gmra.mrb[16].mxu1 %vm3627_vm11, %v4054_v24  ;;  %v2289_v14 = vmax.f32 %v7433_v59, %v2257_v49  ;;  %v2385_v16 = vsel %vm945_vm8, %v2365_v43, -inf }
 0x1f5   : > { %v10291_v22 = vrot.slane %v7433_v59, 6  ;;  %v10292_v55 = vrot.slane %v7419_v41, 6  ;;  %v10294_v28 = vrot.slane %v7091_v32, 6  ;;  %5311 = vmatpush3.bf16.msra.mxu1 %v4382_v35  ;;  %v2068_v24 = vrot.slane %v7725_v52, 1 }
 0x1f6   : > { %v2366_v21 = vsel %vm1310_vm4, %v10290_v4, %v10289_v36  ;;  %v2324_v36 = vrot.slane %v7725_v52, 2  ;;  %v2288_v35 = vmax.f32 %v7419_v41, %v2256_v23  ;;  %v2636_v43 = vmax.f32 %v7405_v42, %v7617_v37  ;;  %v10295_v23 = vld [vmem:[#allocation36_spill] sm:$0xff] }
 0x1f7   : > { %v2462_v30 = vsel %vm1411_vm5, %v10292_v55, %v10291_v22  ;;  %v10293_v13 = vmov %v10292_v55  ;;  %v3615_v55 = vpack.c.bf16 %v7727_v15, %v7725_v52  ;;  %v2637_v4 = vmax.f32 %v7655_v57, %v7619_v47 }
 0x1f8   : > { %v2463_v0 = vsel %vm1411_vm5, %v10294_v28, %v10293_v13  ;;  %v2513_v28 = vmax.f32 %v2385_v16, %v2462_v30  ;;  %v1750_v22 = vmax.f32 %v10279_v51, %v6685_v10  ;;  %v1751_v41 = vmax.f32 %v10280_v29, %v10253_v3 }
 0x1f9   : > { %v2480_v13 = vsel %vm946_vm9, %v2463_v0, -inf  ;;  %5222 = vmatprep.mubr.msk.bf16.mxu0 %vm3627_vm11, %v3615_v55  ;;  %v2006_v16 = vmax.f32 %v10295_v23, %v6480_v40  ;;  %v2669_v49 = vmax.f32 %v7623_v20, %v2637_v4  ;;  %v2107_v40 = vsel %vm1044_vm2, %v2067_v26, %v2068_v24 }
 0x1fa   : > { %v2512_v19 = vmax.f32 %v2366_v21, %v2480_v13  ;;  %v7771_v32 = vmax.f32 %v2289_v14, %v2513_v28  ;;  %v10296_v21 = vld [vmem:[#allocation37_spill] sm:$0xff]  ;;  %v2668_v13 = vmax.f32 %v7621_v48, %v2636_v43  ;;  %v1782_v50 = vmax.f32 %v10275_v45, %v1750_v22 }
 0x1fb   : > { %v2007_v30 = vmax.f32 %v10296_v21, %v6539_v7  ;;  %v1783_v55 = vmax.f32 %v10276_v46, %v1751_v41  ;;  %v2108_v7 = vsel %vm1044_vm2, %v2066_v5, %v2067_v26  ;;  %v2131_v43 = vsel %vm877_vm6, %v2107_v40, -inf }
 0x1fc   : > { %v7779_v0 = vmax.f32 %v2288_v35, %v2512_v19  ;;  %v2765_v14 = vmax.f32 %v7771_v32, %v7611_v54  ;;  %v7801_v54 = vmax.f32 %v1782_v50, %v2006_v16  ;;  %v2204_v4 = vsel %vm1145_vm3, %v2162_v53, %v2163_v2 }
 0x1fd   : > { %v7813_v35 = vmax.f32 %v1783_v55, %v2007_v30  ;;  %v2259_v26 = vmax.f32 %v2131_v43, %v2204_v4  ;;  %v2364_v55 = vsel %vm1310_vm4, %v2322_v12, %v2323_v60  ;;  %v2639_v41 = vmax.f32 %v7771_v32, %v7623_v20 }
 0x1fe   : > { %v2764_v19 = vmax.f32 %v7779_v0, %v7615_v62  ;;  %v7811_v22 = vmax.f32 %v2669_v49, %v2765_v14  ;;  %v10297_v62 = vrot.slane %v7433_v59, 7  ;;  %v2070_v28 = vrot.slane %v7801_v54, 1 }
 0x1ff   : > { %v2326_v16 = vrot.slane %v7801_v54, 2  ;;  %v2071_v49 = vrot.slane %v7813_v35, 1  ;;  %v2167_v30 = vrot.slane %v7813_v35, 7  ;;  %v3616_v40 = vpack.c.bf16 %v7813_v35, %v7801_v54 }
 0x200   : > { %v2205_v5 = vsel %vm1145_vm3, %v10297_v62, %v2162_v53  ;;  %v7821_v50 = vmax.f32 %v2668_v13, %v2764_v19  ;;  %v2291_v4 = vmax.f32 %v7645_v1, %v2259_v26  ;;  %v2363_v62 = vsel %vm1310_vm4, %v2323_v60, %v2324_v36 }
 0x201   : > { %v2226_v19 = vsel %vm878_vm7, %v2205_v5, -inf  ;;  %5223 = vmatmul.mubr.msk.bf16.gmra.mrb[44].mxu0 %vm3627_vm11, %v3616_v40  ;;  %v10298_v5 = vrot.slane %v7645_v1, 6  ;;  %v10299_v26 = vrot.slane %v7643_v27, 6  ;;  %v10301_v14 = vrot.slane %v7433_v59, 6 }
 0x202   : > { %v4055_v53 = vpack.c.bf16 %v7811_v22, %v7821_v50  ;;  %v2258_v43 = vmax.f32 %v2108_v7, %v2226_v19  ;;  %v2387_v7 = vsel %vm945_vm8, %v2363_v62, -inf  ;;  %v2638_v60 = vmax.f32 %v7779_v0, %v7621_v48 }
 0x203   : > { %v2460_v19 = vsel %vm1411_vm5, %v10299_v26, %v10298_v5  ;;  %v10300_v13 = vmov %v10299_v26  ;;  %v1752_v59 = vmax.f32 %v10295_v23, %v10275_v45 }
 0x204   : > { %5282 = vmatprep.mubr.msk.bf16.mxu1 %vm3627_vm11, %v4055_v53  ;;  %v2461_v12 = vsel %vm1411_vm5, %v10301_v14, %v10300_v13  ;;  %v2290_v53 = vmax.f32 %v7643_v27, %v2258_v43  ;;  %v2515_v62 = vmax.f32 %v2387_v7, %v2460_v19  ;;  %v2670_v26 = vmax.f32 %v7405_v42, %v2638_v60 }
 0x205   : > { %v2482_v40 = vsel %vm946_vm9, %v2461_v12, -inf  ;;  %v1753_v14 = vmax.f32 %v10296_v21, %v10276_v46  ;;  %v2671_v27 = vmax.f32 %v7655_v57, %v2639_v41  ;;  %v2008_v43 = vmax.f32 %v7030_v25, %v6685_v10 }
 0x206   : > { %v2514_v5 = vmax.f32 %v2364_v55, %v2482_v40  ;;  %v7878_v13 = vmax.f32 %v2291_v4, %v2515_v62  ;;  %v2009_v7 = vmax.f32 %v7032_v9, %v10253_v3  ;;  %v1784_v55 = vmax.f32 %v10279_v51, %v1752_v59 }
 0x207   : > { %v1785_v12 = vmax.f32 %v10280_v29, %v1753_v14  ;;  %v10302_v60 = vrot.slane %v7727_v15, 1  ;;  %v10304_v40 = vrot.slane %v7727_v15, 7  ;;  %v10305_v62 = vrot.slane %v7725_v52, 7 }
 0x208   : > { %v7885_v19 = vmax.f32 %v2290_v53, %v2514_v5  ;;  %v2767_v41 = vmax.f32 %v7878_v13, %v7619_v47  ;;  %v7913_v59 = vmax.f32 %v1784_v55, %v2008_v43 }
 0x209   : > { %v2105_v4 = vsel %vm1044_vm2, %v10302_v60, %v2070_v28  ;;  %v10303_v10 = vmov %v10302_v60  ;;  %v2202_v5 = vsel %vm1145_vm3, %v10305_v62, %v10304_v40  ;;  %v7915_v14 = vmax.f32 %v1785_v12, %v2009_v7 }
 0x20a   : > { %v2106_v3 = vsel %vm1044_vm2, %v2068_v24, %v10303_v10  ;;  %v2133_v53 = vsel %vm877_vm6, %v2105_v4, -inf  ;;  %v2766_v47 = vmax.f32 %v7885_v19, %v7617_v37  ;;  %v10306_v60 = vmov %v10305_v62 }
 0x20b   : > { %v2203_v24 = vsel %vm1145_vm3, %v2163_v2, %v10306_v60  ;;  %v7923_v4 = vmax.f32 %v2671_v27, %v2767_v41  ;;  %v2261_v40 = vmax.f32 %v2133_v53, %v2202_v5  ;;  %v10307_v37 = vrot.slane %v7727_v15, 2 }
 0x20c   : > { %v2228_v10 = vsel %vm878_vm7, %v2203_v24, -inf  ;;  %v7933_v7 = vmax.f32 %v2670_v26, %v2766_v47  ;;  %v2072_v55 = vrot.slane %v7913_v59, 1  ;;  %v2328_v41 = vrot.slane %v7913_v59, 2 }
 0x20d   : > { %v2361_v43 = vsel %vm1310_vm4, %v10307_v37, %v2326_v16  ;;  %v3617_v47 = vpack.c.bf16 %v7915_v14, %v7913_v59  ;;  %v2260_v60 = vmax.f32 %v2106_v3, %v2228_v10  ;;  %v2293_v24 = vmax.f32 %v7727_v15, %v2261_v40 }
 0x20e   : > { %v4056_v5 = vpack.c.bf16 %v7923_v4, %v7933_v7  ;;  %v2362_v53 = vsel %vm1310_vm4, %v2324_v36, %v10307_v37  ;;  %v2389_v62 = vsel %vm945_vm8, %v2361_v43, -inf  ;;  %v10308_v2 = vrot.slane %v7727_v15, 6 }
 0x20f   : > { %v10309_v26 = vrot.slane %v7725_v52, 6  ;;  %5226 = vmatprep.mubr.msk.bf16.mxu0 %vm3627_vm11, %v3617_v47  ;;  %v2292_v3 = vmax.f32 %v7725_v52, %v2260_v60  ;;  %v10311_v36 = vrot.slane %v7645_v1, 6  ;;  %v1754_v52 = vmax.f32 %v7030_v25, %v10279_v51 }
 0x210   : > { %5283 = vmatmul.mubr.msk.bf16.gmra.mrb[20].mxu1 %vm3627_vm11, %v4056_v5  ;;  %v2641_v5 = vmax.f32 %v7878_v13, %v7655_v57 }
 0x211   : > { %v2458_v27 = vsel %vm1411_vm5, %v10309_v26, %v10308_v2  ;;  %v10310_v10 = vmov %v10309_v26  ;;  %v2640_v2 = vmax.f32 %v7885_v19, %v7405_v42 }
 0x212   : > { %v2459_v40 = vsel %vm1411_vm5, %v10311_v36, %v10310_v10  ;;  %v2517_v43 = vmax.f32 %v2389_v62, %v2458_v27  ;;  %v1755_v27 = vmax.f32 %v7032_v9, %v10280_v29  ;;  %v2010_v62 = vmax.f32 %v7034_v31, %v10275_v45 }
 0x213   : > { %v2484_v12 = vsel %vm946_vm9, %v2459_v40, -inf  ;;  %v2672_v47 = vmax.f32 %v7779_v0, %v2640_v2  ;;  %v2673_v60 = vmax.f32 %v7771_v32, %v2641_v5  ;;  %v1786_v10 = vmax.f32 %v10295_v23, %v1754_v52 }
 0x214   : > { %v2516_v26 = vmax.f32 %v2362_v53, %v2484_v12  ;;  %v7980_v1 = vmax.f32 %v2293_v24, %v2517_v43  ;;  %v2011_v36 = vmax.f32 %v7080_v17, %v10276_v46  ;;  %v1787_v53 = vmax.f32 %v10296_v21, %v1755_v27 }
 0x215   : > { %v2103_v45 = vsel %vm1044_vm2, %v2071_v49, %v2072_v55  ;;  %v8002_v24 = vmax.f32 %v1786_v10, %v2010_v62  ;;  %v2104_v46 = vsel %vm1044_vm2, %v2070_v28, %v2071_v49  ;;  %v10314_v28 = vrot.slane %v7727_v15, 7 }
 0x216   : > { %v7991_v40 = vmax.f32 %v2292_v3, %v2516_v26  ;;  %v2769_v12 = vmax.f32 %v7980_v1, %v7623_v20  ;;  %v2135_v20 = vsel %vm877_vm6, %v2103_v45, -inf  ;;  %v10312_v3 = vrot.slane %v7801_v54, 7 }
 0x217   : > { %v8022_v52 = vmax.f32 %v1787_v53, %v2011_v36  ;;  %v2074_v27 = vrot.slane %v8002_v24, 1  ;;  %v2330_v10 = vrot.slane %v8002_v24, 2  ;;  %v10320_v62 = vrot.slane %v7727_v15, 6 }
 0x218   : > { %v2200_v43 = vsel %vm1145_vm3, %v10312_v3, %v2167_v30  ;;  %v2768_v2 = vmax.f32 %v7991_v40, %v7621_v48  ;;  %v8020_v5 = vmax.f32 %v2673_v60, %v2769_v12  ;;  %v10313_v26 = vmov %v10312_v3 }
 0x219   : > { %v2201_v49 = vsel %vm1145_vm3, %v10314_v28, %v10313_v26  ;;  %v2075_v60 = vrot.slane %v8022_v52, 1  ;;  %v3618_v3 = vpack.c.bf16 %v8022_v52, %v8002_v24  ;;  %v2263_v28 = vmax.f32 %v2135_v20, %v2200_v43 }
 0x21a   : > { %v8034_v48 = vmax.f32 %v2672_v47, %v2768_v2  ;;  %v2230_v26 = vsel %vm878_vm7, %v2201_v49, -inf  ;;  %v10315_v2 = vrot.slane %v7813_v35, 2  ;;  %v10317_v43 = vrot.slane %v7813_v35, 6 }
 0x21b   : > { %v2262_v47 = vmax.f32 %v2104_v46, %v2230_v26  ;;  %5227 = vmatmul.mubr.msk.bf16.gmra.mrb[48].mxu0 %vm3627_vm11, %v3618_v3  ;;  %v2295_v20 = vmax.f32 %v7813_v35, %v2263_v28  ;;  %v10318_v49 = vrot.slane %v7801_v54, 6  ;;  %v2642_v28 = vmax.f32 %v7991_v40, %v7779_v0 }
 0x21c   : > { %v4057_v37 = vpack.c.bf16 %v8020_v5, %v8034_v48  ;;  %v2359_v45 = vsel %vm1310_vm4, %v10315_v2, %v2328_v41  ;;  %v10316_v53 = vmov %v10315_v2  ;;  %v1756_v15 = vmax.f32 %v7034_v31, %v10295_v23 }
 0x21d   : > { %v2360_v12 = vsel %vm1310_vm4, %v2326_v16, %v10316_v53  ;;  %v2391_v46 = vsel %vm945_vm8, %v2359_v45, -inf  ;;  %v2456_v26 = vsel %vm1411_vm5, %v10318_v49, %v10317_v43  ;;  %v10319_v2 = vmov %v10318_v49 }
 0x21e   : > { %v2457_v16 = vsel %vm1411_vm5, %v10320_v62, %v10319_v2  ;;  %5286 = vmatprep.mubr.msk.bf16.mxu1 %vm3627_vm11, %v4057_v37  ;;  %v2294_v53 = vmax.f32 %v7801_v54, %v2262_v47  ;;  %v2519_v3 = vmax.f32 %v2391_v46, %v2456_v26  ;;  %v2643_v43 = vmax.f32 %v7980_v1, %v7771_v32 }
 0x21f   : > { %v2486_v45 = vsel %vm946_vm9, %v2457_v16, -inf  ;;  %v1757_v62 = vmax.f32 %v7080_v17, %v10296_v21  ;;  %v2674_v54 = vmax.f32 %v7885_v19, %v2642_v28  ;;  %v2012_v47 = vmax.f32 %v7244_v18, %v10279_v51 }
 0x220   : > { %v2518_v36 = vmax.f32 %v2360_v12, %v2486_v45  ;;  %v8086_v37 = vmax.f32 %v2295_v20, %v2519_v3  ;;  %v2013_v46 = vmax.f32 %v7252_v63, %v10280_v29  ;;  %v2675_v49 = vmax.f32 %v7878_v13, %v2643_v43 }
 0x221   : > { %v1788_v26 = vmax.f32 %v7030_v25, %v1756_v15  ;;  %v1789_v2 = vmax.f32 %v7032_v9, %v1757_v62  ;;  %v10321_v16 = vrot.slane %v7915_v14, 1  ;;  %v10324_v45 = vrot.slane %v7913_v59, 7 }
 0x222   : > { %v8093_v12 = vmax.f32 %v2294_v53, %v2518_v36  ;;  %v2771_v20 = vmax.f32 %v8086_v37, %v7655_v57  ;;  %v10323_v53 = vrot.slane %v7915_v14, 7 }
 0x223   : > { %v2101_v51 = vsel %vm1044_vm2, %v10321_v16, %v2074_v27  ;;  %v10322_v29 = vmov %v10321_v16  ;;  %v8120_v28 = vmax.f32 %v1788_v26, %v2012_v47  ;;  %v8122_v43 = vmax.f32 %v1789_v2, %v2013_v46 }
 0x224   : > { %v2102_v36 = vsel %vm1044_vm2, %v2072_v55, %v10322_v29  ;;  %v2198_v57 = vsel %vm1145_vm3, %v10324_v45, %v10323_v53  ;;  %v2770_v3 = vmax.f32 %v8093_v12, %v7405_v42  ;;  %v2137_v15 = vsel %vm877_vm6, %v2101_v51, -inf }
 0x225   : > { %v8126_v62 = vmax.f32 %v2675_v49, %v2771_v20  ;;  %v10325_v55 = vmov %v10324_v45  ;;  %v2265_v29 = vmax.f32 %v2137_v15, %v2198_v57  ;;  %v10326_v42 = vrot.slane %v7915_v14, 2 }
 0x226   : > { %v2199_v16 = vsel %vm1145_vm3, %v2167_v30, %v10325_v55  ;;  %v8140_v46 = vmax.f32 %v2674_v54, %v2770_v3  ;;  %v2076_v49 = vrot.slane %v8120_v28, 1  ;;  %v2077_v26 = vrot.slane %v8122_v43, 1 }
 0x227   : > { %v2357_v47 = vsel %vm1310_vm4, %v10326_v42, %v2330_v10  ;;  %v2332_v30 = vrot.slane %v8120_v28, 2  ;;  %v3619_v57 = vpack.c.bf16 %v8122_v43, %v8120_v28  ;;  %v2232_v3 = vsel %vm878_vm7, %v2199_v16, -inf }
 0x228   : > { %v4058_v45 = vpack.c.bf16 %v8126_v62, %v8140_v46  ;;  %v2264_v15 = vmax.f32 %v2102_v36, %v2232_v3  ;;  %v2297_v55 = vmax.f32 %v7915_v14, %v2265_v29  ;;  %v2358_v53 = vsel %vm1310_vm4, %v2328_v41, %v10326_v42 }
 0x229   : > { %v2393_v51 = vsel %vm945_vm8, %v2357_v47, -inf  ;;  %5230 = vmatprep.mubr.msk.bf16.mxu0 %vm3627_vm11, %v3619_v57  ;;  %v10327_v54 = vrot.slane %v7915_v14, 6  ;;  %v10328_v36 = vrot.slane %v7913_v59, 6  ;;  %v10330_v3 = vrot.slane %v7813_v35, 6 }
 0x22a   : > { %5287 = vmatmul.mubr.msk.bf16.gmra.mrb[24].mxu1 %vm3627_vm11, %v4058_v45  ;;  %v2644_v47 = vmax.f32 %v8093_v12, %v7885_v19  ;;  %v2296_v57 = vmax.f32 %v7913_v59, %v2264_v15  ;;  %v2014_v15 = vmax.f32 %v7261_v56, %v10295_v23  ;;  %v2100_v23 = vsel %vm1044_vm2, %v2074_v27, %v2075_v60 }
 0x22b   : > { %v2454_v16 = vsel %vm1411_vm5, %v10328_v36, %v10327_v54  ;;  %v10329_v29 = vmov %v10328_v36  ;;  %v2645_v54 = vmax.f32 %v8086_v37, %v7878_v13  ;;  %v10334_v27 = vrot.slane %v7915_v14, 7 }
 0x22c   : > { %v2455_v41 = vsel %vm1411_vm5, %v10330_v3, %v10329_v29  ;;  %v2521_v2 = vmax.f32 %v2393_v51, %v2454_v16  ;;  %v2676_v35 = vmax.f32 %v7991_v40, %v2644_v47  ;;  %v1758_v29 = vmax.f32 %v7244_v18, %v7030_v25 }
 0x22d   : > { %v2488_v42 = vsel %vm946_vm9, %v2455_v41, -inf  ;;  %v1759_v3 = vmax.f32 %v7252_v63, %v7032_v9  ;;  %v2677_v59 = vmax.f32 %v7980_v1, %v2645_v54  ;;  %v2015_v51 = vmax.f32 %v7327_v58, %v10296_v21 }
 0x22e   : > { %v2520_v36 = vmax.f32 %v2358_v53, %v2488_v42  ;;  %v8192_v20 = vmax.f32 %v2297_v55, %v2521_v2  ;;  %v1790_v53 = vmax.f32 %v7034_v31, %v1758_v29  ;;  %v2099_v2 = vsel %vm1044_vm2, %v2075_v60, %v2076_v49 }
 0x22f   : > { %v1791_v41 = vmax.f32 %v7080_v17, %v1759_v3  ;;  %v2139_v21 = vsel %vm877_vm6, %v2099_v2, -inf  ;;  %v10331_v47 = vrot.slane %v8022_v52, 7 }
 0x230   : > { %v8199_v16 = vmax.f32 %v2296_v57, %v2520_v36  ;;  %v2773_v55 = vmax.f32 %v8192_v20, %v7771_v32  ;;  %v10332_v57 = vrot.slane %v8002_v24, 7  ;;  %v8227_v54 = vmax.f32 %v1790_v53, %v2014_v15 }
 0x231   : > { %v8229_v36 = vmax.f32 %v1791_v41, %v2015_v51 }
 0x232   : > { %v2196_v42 = vsel %vm1145_vm3, %v10332_v57, %v10331_v47  ;;  %v2772_v32 = vmax.f32 %v8199_v16, %v7779_v0  ;;  %v10333_v29 = vmov %v10332_v57  ;;  %v8237_v3 = vmax.f32 %v2677_v59, %v2773_v55 }
 0x233   : > { %v2197_v60 = vsel %vm1145_vm3, %v10334_v27, %v10333_v29  ;;  %v2267_v47 = vmax.f32 %v2139_v21, %v2196_v42  ;;  %v10335_v0 = vrot.slane %v8022_v52, 2  ;;  %v2078_v53 = vrot.slane %v8227_v54, 1 }
 0x234   : > { %v2234_v2 = vsel %vm878_vm7, %v2197_v60, -inf  ;;  %v8247_v51 = vmax.f32 %v2676_v35, %v2772_v32  ;;  %v2079_v41 = vrot.slane %v8229_v36, 1  ;;  %v2334_v57 = vrot.slane %v8227_v54, 2 }
 0x235   : > { %v2355_v15 = vsel %vm1310_vm4, %v10335_v0, %v2332_v30  ;;  %v3620_v32 = vpack.c.bf16 %v8229_v36, %v8227_v54  ;;  %v2266_v27 = vmax.f32 %v2100_v23, %v2234_v2  ;;  %v2299_v60 = vmax.f32 %v8022_v52, %v2267_v47 }
 0x236   : > { %v4059_v29 = vpack.c.bf16 %v8237_v3, %v8247_v51  ;;  %v2356_v45 = vsel %vm1310_vm4, %v2330_v10, %v10335_v0  ;;  %v2395_v42 = vsel %vm945_vm8, %v2355_v15, -inf  ;;  %v10336_v21 = vrot.slane %v8022_v52, 6 }
 0x237   : > { %v10337_v35 = vrot.slane %v8002_v24, 6  ;;  %5231 = vmatmul.mubr.msk.bf16.gmra.mrb[52].mxu0 %vm3627_vm11, %v3620_v32  ;;  %v2298_v23 = vmax.f32 %v8002_v24, %v2266_v27  ;;  %v10339_v10 = vrot.slane %v7915_v14, 6  ;;  %v1760_v24 = vmax.f32 %v7261_v56, %v7034_v31 }
 0x238   : > { %5290 = vmatprep.mubr.msk.bf16.mxu1 %vm3627_vm11, %v4059_v29  ;;  %v2647_v29 = vmax.f32 %v8192_v20, %v7980_v1 }
 0x239   : > { %v2452_v59 = vsel %vm1411_vm5, %v10337_v35, %v10336_v21  ;;  %v10338_v2 = vmov %v10337_v35  ;;  %v2646_v21 = vmax.f32 %v8199_v16, %v7991_v40 }
 0x23a   : > { %v2453_v47 = vsel %vm1411_vm5, %v10339_v10, %v10338_v2  ;;  %v2523_v15 = vmax.f32 %v2395_v42, %v2452_v59  ;;  %v1761_v59 = vmax.f32 %v7327_v58, %v7080_v17  ;;  %v2016_v42 = vmax.f32 %v7384_v33, %v7030_v25 }
 0x23b   : > { %v2490_v55 = vsel %vm946_vm9, %v2453_v47, -inf  ;;  %v2678_v32 = vmax.f32 %v8093_v12, %v2646_v21  ;;  %v2679_v27 = vmax.f32 %v8086_v37, %v2647_v29  ;;  %v1792_v2 = vmax.f32 %v7244_v18, %v1760_v24 }
 0x23c   : > { %v2522_v35 = vmax.f32 %v2356_v45, %v2490_v55  ;;  %v8294_v14 = vmax.f32 %v2299_v60, %v2523_v15  ;;  %v2017_v10 = vmax.f32 %v7409_v34, %v7032_v9  ;;  %v1793_v55 = vmax.f32 %v7252_v63, %v1761_v59 }
 0x23d   : > { %v2097_v25 = vsel %vm1044_vm2, %v2077_v26, %v2078_v53  ;;  %v8316_v60 = vmax.f32 %v1792_v2, %v2016_v42  ;;  %v2098_v9 = vsel %vm1044_vm2, %v2076_v49, %v2077_v26  ;;  %v10341_v15 = vrot.slane %v8120_v28, 7 }
 0x23e   : > { %v8305_v47 = vmax.f32 %v2298_v23, %v2522_v35  ;;  %v2775_v45 = vmax.f32 %v8294_v14, %v7878_v13  ;;  %v2141_v13 = vsel %vm877_vm6, %v2097_v25, -inf  ;;  %v10340_v23 = vrot.slane %v8122_v43, 7 }
 0x23f   : > { %v8336_v35 = vmax.f32 %v1793_v55, %v2017_v10  ;;  %v10342_v59 = vmov %v10341_v15  ;;  %v10343_v49 = vrot.slane %v8022_v52, 7  ;;  %v10135_v42 = vrot.slane %v8316_v60, 1 }
 0x240   : > { %v2194_v21 = vsel %vm1145_vm3, %v10341_v15, %v10340_v23  ;;  %v2774_v29 = vmax.f32 %v8305_v47, %v7885_v19  ;;  %v8334_v24 = vmax.f32 %v2679_v27, %v2775_v45  ;;  %v2336_v25 = vrot.slane %v8316_v60, 2 }
 0x241   : > { %v2195_v26 = vsel %vm1145_vm3, %v10343_v49, %v10342_v59  ;;  %v2081_v27 = vrot.slane %v8336_v35, 1  ;;  %v3621_v15 = vpack.c.bf16 %v8336_v35, %v8316_v60  ;;  %v2269_v49 = vmax.f32 %v2141_v13, %v2194_v21 }
 0x242   : > { %v8348_v19 = vmax.f32 %v2678_v32, %v2774_v29  ;;  %v2236_v59 = vsel %vm878_vm7, %v2195_v26, -inf  ;;  %v10344_v29 = vrot.slane %v8122_v43, 2  ;;  %v10346_v21 = vrot.slane %v8122_v43, 6 }
 0x243   : > { %v2268_v32 = vmax.f32 %v2098_v9, %v2236_v59  ;;  %5234 = vmatprep.mubr.msk.bf16.mxu0 %vm3627_vm11, %v3621_v15  ;;  %v2301_v13 = vmax.f32 %v8122_v43, %v2269_v49  ;;  %v10347_v26 = vrot.slane %v8120_v28, 6  ;;  %v10349_v2 = vrot.slane %v8022_v52, 6 }
 0x244   : > { %v4060_v0 = vpack.c.bf16 %v8334_v24, %v8348_v19  ;;  %v2353_v23 = vsel %vm1310_vm4, %v10344_v29, %v2334_v57  ;;  %v10345_v55 = vmov %v10344_v29  ;;  %v2648_v49 = vmax.f32 %v8305_v47, %v8093_v12 }
 0x245   : > { %v2354_v45 = vsel %vm1310_vm4, %v2332_v30, %v10345_v55  ;;  %v2397_v9 = vsel %vm945_vm8, %v2353_v23, -inf  ;;  %v2450_v59 = vsel %vm1411_vm5, %v10347_v26, %v10346_v21  ;;  %v10348_v29 = vmov %v10347_v26  ;;  %v10351_v26 = vld [vmem:[#allocation29_spill] sm:$0xff] }
 0x246   : > { %v2451_v30 = vsel %vm1411_vm5, %v10349_v2, %v10348_v29  ;;  %5291 = vmatmul.mubr.msk.bf16.gmra.mrb[28].mxu1 %vm3627_vm11, %v4060_v0  ;;  %v2300_v55 = vmax.f32 %v8120_v28, %v2268_v32  ;;  %v2525_v15 = vmax.f32 %v2397_v9, %v2450_v59  ;;  %v2649_v21 = vmax.f32 %v8294_v14, %v8086_v37  ;;  %v10350_v32 = vld [vmem:[#allocation10_spill] sm:$0xff] }
 0x247   : > { %v2492_v23 = vsel %vm946_vm9, %v2451_v30, -inf  ;;  %v1762_v52 = vmax.f32 %v7384_v33, %v7244_v18  ;;  %v1763_v2 = vmax.f32 %v7409_v34, %v7252_v63  ;;  %v2680_v28 = vmax.f32 %v8199_v16, %v2648_v49 }
 0x248   : > { %v2524_v10 = vmax.f32 %v2354_v45, %v2492_v23  ;;  %v8400_v0 = vmax.f32 %v2301_v13, %v2525_v15  ;;  %v2018_v9 = vmax.f32 %v10350_v32, %v7034_v31  ;;  %v2019_v59 = vmax.f32 %v10351_v26, %v7080_v17 }
 0x249   : > { %v2681_v29 = vmax.f32 %v8192_v20, %v2649_v21  ;;  %v1794_v30 = vmax.f32 %v7261_v56, %v1762_v52  ;;  %v1795_v23 = vmax.f32 %v7327_v58, %v1763_v2  ;;  %v2095_v31 = vsel %vm1044_vm2, %v2079_v41, %v10135_v42 }
 0x24a   : > { %v8407_v45 = vmax.f32 %v2300_v55, %v2524_v10  ;;  %v2777_v13 = vmax.f32 %v8400_v0, %v7980_v1  ;;  %v2096_v17 = vsel %vm1044_vm2, %v2078_v53, %v2079_v41  ;;  %v10352_v10 = vrot.slane %v8229_v36, 7 }
 0x24b   : > { %v10353_v55 = vrot.slane %v8227_v54, 7  ;;  %v8434_v49 = vmax.f32 %v1794_v30, %v2018_v9  ;;  %v8436_v21 = vmax.f32 %v1795_v23, %v2019_v59  ;;  %v2143_v52 = vsel %vm877_vm6, %v2095_v31, -inf }
 0x24c   : > { %v2776_v15 = vmax.f32 %v8407_v45, %v7991_v40  ;;  %v8440_v2 = vmax.f32 %v2681_v29, %v2777_v13  ;;  %v10355_v41 = vrot.slane %v8122_v43, 7  ;;  %v10356_v40 = vrot.slane %v8229_v36, 2 }
 0x24d   : > { %v2192_v1 = vsel %vm1145_vm3, %v10353_v55, %v10352_v10  ;;  %v10354_v53 = vmov %v10353_v55  ;;  %v2082_v29 = vrot.slane %v8434_v49, 1  ;;  %v2338_v31 = vrot.slane %v8434_v49, 2 }
 0x24e   : > { %v2193_v42 = vsel %vm1145_vm3, %v10355_v41, %v10354_v53  ;;  %v2271_v10 = vmax.f32 %v2143_v52, %v2192_v1  ;;  %v2351_v9 = vsel %vm1310_vm4, %v10356_v40, %v2336_v25  ;;  %v8454_v59 = vmax.f32 %v2680_v28, %v2776_v15 }
 0x24f   : > { %v3622_v15 = vpack.c.bf16 %v8436_v21, %v8434_v49  ;;  %v2238_v53 = vsel %vm878_vm7, %v2193_v42, -inf  ;;  %v10357_v23 = vrot.slane %v8229_v36, 2  ;;  %v2399_v55 = vsel %vm945_vm8, %v2351_v9, -inf }
 0x250   : > { %v4061_v52 = vpack.c.bf16 %v8440_v2, %v8454_v59  ;;  %v2270_v41 = vmax.f32 %v2096_v17, %v2238_v53  ;;  %v2303_v40 = vmax.f32 %v8229_v36, %v2271_v10  ;;  %v10358_v28 = vrot.slane %v8229_v36, 6 }
 0x251   : > { %v2352_v1 = vsel %vm1310_vm4, %v2334_v57, %v10357_v23  ;;  %5235 = vmatmul.mubr.msk.bf16.gmra.mrb[56].mxu0 %vm3627_vm11, %v3622_v15  ;;  %v10359_v42 = vrot.slane %v8227_v54, 6  ;;  %v10361_v53 = vrot.slane %v8122_v43, 6  ;;  %v2650_v9 = vmax.f32 %v8407_v45, %v8199_v16 }
 0x252   : > { %5294 = vmatprep.mubr.msk.bf16.mxu1 %vm3627_vm11, %v4061_v52  ;;  %v2302_v52 = vmax.f32 %v8227_v54, %v2270_v41 }
 0x253   : > { %v2448_v17 = vsel %vm1411_vm5, %v10359_v42, %v10358_v28  ;;  %v10360_v10 = vmov %v10359_v42  ;;  %v2651_v28 = vmax.f32 %v8400_v0, %v8192_v20  ;;  %v2682_v43 = vmax.f32 %v8305_v47, %v2650_v9 }
 0x254   : > { %v2449_v57 = vsel %vm1411_vm5, %v10361_v53, %v10360_v10  ;;  %v2527_v13 = vmax.f32 %v2399_v55, %v2448_v17  ;;  %v1764_v10 = vmax.f32 %v10350_v32, %v7261_v56  ;;  %v10362_v53 = vmax.f32 %v10351_v26, %v7327_v58 }
 0x255   : > { %v2494_v15 = vsel %vm946_vm9, %v2449_v57, -inf  ;;  %v2683_v54 = vmax.f32 %v8294_v14, %v2651_v28  ;;  %v2093_v55 = vsel %vm1044_vm2, %v2081_v27, %v2082_v29  ;;  %v10364_v17 = vrot.slane %v8336_v35, 7 }
 0x256   : > { %v2526_v42 = vmax.f32 %v2352_v1, %v2494_v15  ;;  %v1797_v23 = vmax.f32 %v7409_v34, %v10362_v53  ;;  %v8508_v30 = vmax.f32 %v2303_v40, %v2527_v13  ;;  %v10363_v1 = vrot.slane %v8316_v60, 1 }
 0x257   : > { %v1796_v34 = vmax.f32 %v7384_v33, %v1764_v10  ;;  %v2145_v41 = vsel %vm877_vm6, %v2093_v55, -inf  ;;  %v10365_v57 = vrot.slane %v8316_v60, 7 }
 0x258   : > { %v2094_v58 = vsel %vm1044_vm2, %v10363_v1, %v2081_v27  ;;  %v8523_v26 = vmax.f32 %v2302_v52, %v2526_v42  ;;  %v8527_v13 = vmax.f32 %v1797_v23, %v7252_v63  ;;  %v2779_v40 = vmax.f32 %v8508_v30, %v8086_v37 }
 0x259   : > { %v2190_v27 = vsel %vm1145_vm3, %v10365_v57, %v10364_v17  ;;  %v10366_v9 = vmov %v10365_v57  ;;  %v10367_v52 = vrot.slane %v8229_v36, 7  ;;  %v10368_v23 = vrot.slane %v8336_v35, 2 }
 0x25a   : > { %v2778_v15 = vmax.f32 %v8523_v26, %v8093_v12  ;;  %v8554_v28 = vmax.f32 %v1796_v34, %v7244_v18  ;;  %v2085_v42 = vrot.slane %v8527_v13, 1  ;;  %v2181_v10 = vrot.slane %v8527_v13, 7 }
 0x25b   : > { %v2191_v63 = vsel %vm1145_vm3, %v10367_v52, %v10366_v9  ;;  %v2349_v37 = vsel %vm1310_vm4, %v10368_v23, %v2338_v31  ;;  %v8558_v53 = vmax.f32 %v2683_v54, %v2779_v40  ;;  %v2273_v1 = vmax.f32 %v2145_v41, %v2190_v27 }
 0x25c   : > { %v2240_v55 = vsel %vm878_vm7, %v2191_v63, -inf  ;;  %v10369_v17 = vmov %v10368_v23  ;;  %v8568_v57 = vmax.f32 %v2682_v43, %v2778_v15  ;;  %v2084_v18 = vrot.slane %v8554_v28, 1 }
 0x25d   : > { %v2350_v12 = vsel %vm1310_vm4, %v2336_v25, %v10369_v17  ;;  %v2180_v34 = vrot.slane %v8554_v28, 7  ;;  %v2340_v54 = vrot.slane %v8554_v28, 2  ;;  %v3623_v40 = vpack.c.bf16 %v8527_v13, %v8554_v28 }
 0x25e   : > { %v2272_v9 = vmax.f32 %v2094_v58, %v2240_v55  ;;  %v2305_v41 = vmax.f32 %v8336_v35, %v2273_v1  ;;  %v2401_v27 = vsel %vm945_vm8, %v2349_v37, -inf  ;;  %v4062_v25 = vpack.c.bf16 %v8558_v53, %v8568_v57 }
 0x25f   : > { %v10370_v43 = vrot.slane %v8336_v35, 6  ;;  %v10371_v52 = vrot.slane %v8316_v60, 6  ;;  %v10373_v15 = vrot.slane %v8229_v36, 6  ;;  %v2652_v37 = vmax.f32 %v8523_v26, %v8305_v47  ;;  %5238 = vmatprep.mubr.msk.bf16.mxu0 %vm3627_vm11, %v3623_v40 }
 0x260   : > { %v2304_v55 = vmax.f32 %v8316_v60, %v2272_v9  ;;  %5295 = vmatmul.mubr.msk.bf16.gmra.mrb[0].mxu1 %vm3627_vm11, %v4062_v25 }
 0x261   : > { %v2446_v63 = vsel %vm1411_vm5, %v10371_v52, %v10370_v43  ;;  %v10372_v23 = vmov %v10371_v52  ;;  %v2653_v43 = vmax.f32 %v8508_v30, %v8294_v14  ;;  %v2684_v52 = vmax.f32 %v8407_v45, %v2652_v37 }
 0x262   : > { %v2447_v58 = vsel %vm1411_vm5, %v10373_v15, %v10372_v23  ;;  %v2529_v17 = vmax.f32 %v2401_v27, %v2446_v63  ;;  %v1798_v23 = vmax.f32 %v10350_v32, %v7384_v33  ;;  %v10374_v15 = vrot.slane %v8436_v21, 1 }
 0x263   : > { %v2496_v1 = vsel %vm946_vm9, %v2447_v58, -inf  ;;  %v2685_v9 = vmax.f32 %v8400_v0, %v2653_v43  ;;  %v10377_v63 = vrot.slane %v8434_v49, 7  ;;  %v10380_v43 = vrot.slane %v8436_v21, 2 }
 0x264   : > { %v2528_v36 = vmax.f32 %v2350_v12, %v2496_v1  ;;  %v2091_v60 = vsel %vm1044_vm2, %v10374_v15, %v2084_v18  ;;  %v8608_v40 = vmax.f32 %v2305_v41, %v2529_v17  ;;  %v10375_v27 = vmov %v10374_v15 }
 0x265   : > { %v2092_v12 = vsel %vm1044_vm2, %v2082_v29, %v10375_v27  ;;  %v2147_v25 = vsel %vm877_vm6, %v2091_v60, -inf  ;;  %v8622_v32 = vmax.f32 %v1798_v23, %v7261_v56  ;;  %v10376_v41 = vrot.slane %v8436_v21, 7 }
 0x266   : > { %v8619_v33 = vmax.f32 %v2304_v55, %v2528_v36  ;;  %v10378_v37 = vmov %v10377_v63  ;;  %v10379_v1 = vrot.slane %v8336_v35, 7  ;;  %v2781_v55 = vmax.f32 %v8608_v40, %v8192_v20 }
 0x267   : > { %v2188_v58 = vsel %vm1145_vm3, %v10377_v63, %v10376_v41  ;;  %v2347_v36 = vsel %vm1310_vm4, %v10380_v43, %v2340_v54  ;;  %v2086_v15 = vrot.slane %v8622_v32, 1  ;;  %v2342_v60 = vrot.slane %v8622_v32, 2 }
 0x268   : > { %v2189_v29 = vsel %vm1145_vm3, %v10379_v1, %v10378_v37  ;;  %v2275_v17 = vmax.f32 %v2147_v25, %v2188_v58  ;;  %v2780_v23 = vmax.f32 %v8619_v33, %v8199_v16  ;;  %v3624_v20 = vpack.c.bf16 %v7441_v8, %v8622_v32 }
 0x269   : > { %v2242_v56 = vsel %vm878_vm7, %v2189_v29, -inf  ;;  %v8652_v27 = vmax.f32 %v2685_v9, %v2781_v55  ;;  %v10381_v63 = vmov %v10380_v43  ;;  %v2403_v37 = vsel %vm945_vm8, %v2347_v36, -inf }
 0x26a   : > { %v2274_v25 = vmax.f32 %v2092_v12, %v2242_v56  ;;  %v2307_v41 = vmax.f32 %v8436_v21, %v2275_v17  ;;  %v2348_v58 = vsel %vm1310_vm4, %v2338_v31, %v10381_v63  ;;  %v8661_v16 = vmax.f32 %v2684_v52, %v2780_v23  ;;  %5239 = vmatmul.mubr.msk.bf16.gmra.mrb[60].mxu0 %vm3627_vm11, %v3624_v20  ;;  %v10387_v63 = vld [vmem:[#allocation9_spill] sm:$0xff] }
 0x26b   : > { %v10382_v9 = vrot.slane %v8436_v21, 6  ;;  %v10383_v12 = vrot.slane %v8434_v49, 6  ;;  %v10385_v55 = vrot.slane %v8336_v35, 6  ;;  %v2654_v43 = vmax.f32 %v8619_v33, %v8407_v45  ;;  %v10386_v35 = vld [vmem:[#allocation7_spill] sm:$0xff] }
 0x26c   : > { %v2306_v52 = vmax.f32 %v8434_v49, %v2274_v25  ;;  %v4063_v36 = vpack.c.bf16 %v8652_v27, %v8661_v16  ;;  %v2655_v20 = vmax.f32 %v8608_v40, %v8400_v0  ;;  %v2089_v25 = vsel %vm1044_vm2, %v2085_v42, %v2086_v15 }
 0x26d   : > { %v2444_v1 = vsel %vm1411_vm5, %v10383_v12, %v10382_v9  ;;  %v10384_v29 = vmov %v10383_v12  ;;  %v3592_v9 = vpack.c.bf16 %v10387_v63, %v10386_v35  ;;  %v2686_v49 = vmax.f32 %v8523_v26, %v2654_v43 }
 0x26e   : > { %v2445_v31 = vsel %vm1411_vm5, %v10385_v55, %v10384_v29  ;;  %v2531_v17 = vmax.f32 %v2403_v37, %v2444_v1  ;;  %5298 = vmatprep.mubr.msk.bf16.mxu1 %vm3627_vm11, %v4063_v36  ;;  %v2687_v1 = vmax.f32 %v8508_v30, %v2655_v20  ;;  %v2186_v29 = vsel %vm1145_vm3, %v2180_v34, %v2181_v10 }
 0x26f   : > { %v2498_v56 = vsel %vm946_vm9, %v2445_v31, -inf  ;;  %5244 = vmatprep.mubr.msk.bf16.mxu0 %vm3627_vm11, %v3592_v9  ;;  %v2436_v43 = vrot.slane %v8554_v28, 6 }
 0x270   : > { %v2530_v23 = vmax.f32 %v2348_v58, %v2498_v56  ;;  %v8689_v12 = vmax.f32 %v2307_v41, %v2531_v17  ;;  %v2090_v58 = vsel %vm1044_vm2, %v2084_v18, %v2085_v42  ;;  %v2149_v41 = vsel %vm877_vm6, %v2089_v25, -inf }
 0x271   : > { %v10388_v18 = vrot.slane %v8436_v21, 7  ;;  %v2277_v31 = vmax.f32 %v2149_v41, %v2186_v29 }
 0x272   : > { %v8701_v37 = vmax.f32 %v2306_v52, %v2530_v23  ;;  %v2783_v42 = vmax.f32 %v8689_v12, %v8294_v14  ;;  %v2341_v52 = vrot.slane %v8527_v13, 2  ;;  %v2437_v14 = vrot.slane %v8527_v13, 6 }
 0x273   : > { %v2187_v55 = vsel %vm1145_vm3, %v10388_v18, %v2180_v34  ;;  %v2309_v20 = vmax.f32 %v8527_v13, %v2277_v31  ;;  %v10390_v18 = vld [vmem:[#allocation6_spill] sm:$0xff] }
 0x274   : > { %v2782_v56 = vmax.f32 %v8701_v37, %v8305_v47  ;;  %v2244_v17 = vsel %vm878_vm7, %v2187_v55, -inf  ;;  %v8728_v36 = vmax.f32 %v2687_v1, %v2783_v42  ;;  %v2345_v34 = vsel %vm1310_vm4, %v2341_v52, %v2342_v60 }
 0x275   : > { %v2276_v23 = vmax.f32 %v2090_v58, %v2244_v17  ;;  %v2346_v47 = vsel %vm1310_vm4, %v2340_v54, %v2341_v52  ;;  %v2405_v63 = vsel %vm945_vm8, %v2345_v34, -inf  ;;  %v2442_v9 = vsel %vm1411_vm5, %v2436_v43, %v2437_v14 }
 0x276   : > { %v8735_v35 = vmax.f32 %v2686_v49, %v2782_v56  ;;  %v10389_v58 = vrot.slane %v8436_v21, 6  ;;  %v2533_v49 = vmax.f32 %v2405_v63, %v2442_v9  ;;  %v2656_v41 = vmax.f32 %v8701_v37, %v8523_v26 }
 0x277   : > { %v2308_v25 = vmax.f32 %v8554_v28, %v2276_v23  ;;  %v2657_v42 = vmax.f32 %v8689_v12, %v8508_v30  ;;  %v10391_v28 = vld [vmem:[#allocation8_spill] sm:$0xff]  ;;  %v10392_v56 = vrot.slane %v7441_v8, 1  ;;  %v10393_v23 = vld [vmem:[#allocation30_spill] sm:$0xff]  ;;  %v10396_v9 = vrot.slane %v7441_v8, 2 }
 0x278   : > { %v2443_v1 = vsel %vm1411_vm5, %v10389_v58, %v2436_v43  ;;  %v4064_v54 = vpack.c.bf16 %v8728_v36, %v8735_v35  ;;  %v3593_v55 = vpack.c.bf16 %v10391_v28, %v10390_v18  ;;  %v2565_v31 = vmax.f32 %v2309_v20, %v2533_v49 }
 0x279   : > { %v2500_v29 = vsel %vm946_vm9, %v2443_v1, -inf  ;;  %v2688_v52 = vmax.f32 %v8619_v33, %v2656_v41  ;;  %v2088_v17 = vsel %vm1044_vm2, %v2086_v15, %v10392_v56  ;;  %v2689_v43 = vmax.f32 %v8608_v40, %v2657_v42 }
 0x27a   : > { %v2532_v21 = vmax.f32 %v2346_v47, %v2500_v29  ;;  %5299 = vmatmul.mubr.msk.bf16.gmra.mrb[4].mxu1 %vm3627_vm11, %v4064_v54  ;;  %5245 = vmatmul.mubr.msk.bf16.vlgmr.msra.gmra.mrb[32].mxu0 %vm3627_vm11, %v3593_v55  ;;  %v10394_v34 = vrot.slane %v10393_v23, 1  ;;  %v10395_v63 = vmov %v10392_v56  ;;  %v2182_v47 = vrot.slane %v8622_v32, 7 }
 0x27b   : > { %v2344_v15 = vsel %vm1310_vm4, %v2342_v60, %v10396_v9  ;;  %v2785_v1 = vmax.f32 %v2565_v31, %v8400_v0  ;;  %v10397_v41 = vrot.slane %v10393_v23, 2  ;;  %v10398_v54 = vmov %v10396_v9 }
 0x27c   : > { %v2119_v20 = vsel %vm1044_vm2, %v10395_v63, %v10394_v34  ;;  %v2564_v58 = vmax.f32 %v2308_v25, %v2532_v21  ;;  %v10399_v42 = vrot.slane %v7441_v8, 7  ;;  %v2185_v0 = vsel %vm1145_vm3, %v2181_v10, %v2182_v47 }
 0x27d   : > { %v2151_v49 = vsel %vm877_vm6, %v2119_v20, -inf  ;;  %v2375_v29 = vsel %vm1310_vm4, %v10398_v54, %v10397_v41  ;;  %v2438_v25 = vrot.slane %v8622_v32, 6  ;;  %v8802_v55 = vmax.f32 %v2689_v43, %v2785_v1  ;;  %v10401_v54 = vld [vmem:[#allocation12_spill] sm:$0xff] }
 0x27e   : > { %v2184_v18 = vsel %vm1145_vm3, %v2182_v47, %v10399_v42  ;;  %v2407_v60 = vsel %vm945_vm8, %v2375_v29, -inf  ;;  %v2784_v28 = vmax.f32 %v2564_v58, %v8407_v45  ;;  %v2246_v21 = vsel %vm878_vm7, %v2185_v0, -inf  ;;  %v10403_v42 = vld [vmem:[#allocation11_spill] sm:$0xff] }
 0x27f   : > { %v2279_v56 = vmax.f32 %v2151_v49, %v2184_v18  ;;  %v2278_v23 = vmax.f32 %v2088_v17, %v2246_v21  ;;  %v10400_v34 = vrot.slane %v7441_v8, 6  ;;  %v2441_v10 = vsel %vm1411_vm5, %v2437_v14, %v2438_v25 }
 0x280   : > { %v2658_v63 = vmax.f32 %v2564_v58, %v8619_v33  ;;  %v8813_v20 = vmax.f32 %v2688_v52, %v2784_v28  ;;  %v2502_v43 = vsel %vm946_vm9, %v2441_v10, -inf  ;;  %v2659_v1 = vmax.f32 %v2565_v31, %v8608_v40  ;;  %v10402_v52 = vld [vmem:[#allocation16_spill] sm:$0xff] }
 0x281   : > { %v2440_v13 = vsel %vm1411_vm5, %v2438_v25, %v10400_v34  ;;  %v2311_v45 = vmax.f32 %v7441_v8, %v2279_v56  ;;  %v2310_v17 = vmax.f32 %v8622_v32, %v2278_v23  ;;  %v2534_v9 = vmax.f32 %v2344_v15, %v2502_v43  ;;  %v10404_v8 = vld [vmem:[#allocation15_spill] sm:$0xff]  ;;  %v10405_v25 = vld [vmem:[#allocation22_spill] sm:$0xff]  ;;  %v10406_v32 = vld [vmem:[#allocation24_spill] sm:$0xff] }
 0x282   : > { %v2535_v47 = vmax.f32 %v2407_v60, %v2440_v13  ;;  %v2690_v49 = vmax.f32 %v8701_v37, %v2658_v63  ;;  %v4065_v14 = vpack.c.bf16 %v8802_v55, %v8813_v20  ;;  %v3594_v29 = vpack.c.bf16 %v10402_v52, %v10401_v54 }
 0x283   : > { %v3595_v18 = vpack.c.bf16 %v10404_v8, %v10403_v42  ;;  %v2566_v0 = vmax.f32 %v2310_v17, %v2534_v9  ;;  %v2691_v60 = vmax.f32 %v8689_v12, %v2659_v1  ;;  %v3596_v15 = vpack.c.bf16 %v10406_v32, %v10405_v25 }
 0x284   : > { %v2567_v41 = vmax.f32 %v2311_v45, %v2535_v47  ;;  %v2826_v28 = vrot.slane %v7672_v38, 1  ;;  %5302 = vmatprep.mubr.msk.bf16.mxu1 %vm3627_vm11, %v4065_v14  ;;  %5248 = vmatprep.mubr.msk.bf16.mxu0 %vm3627_vm11, %v3594_v29  ;;  %v2827_v34 = vrot.slane %v7685_v39, 1  ;;  %v2828_v45 = vrot.slane %v7821_v50, 1 }
 0x285   : > { %v2786_v13 = vmax.f32 %v2566_v0, %v8523_v26  ;;  %v2660_v10 = vmax.f32 %v2566_v0, %v8701_v37  ;;  %5249 = vmatmul.mubr.msk.bf16.gmra.mrb[36].mxu0 %vm3627_vm11, %v3595_v18  ;;  %v2694_v63 = vmax.f32 %v2566_v0, %v2564_v58  ;;  %v2829_v17 = vrot.slane %v7811_v22, 1 }
 0x286   : > { %v2787_v21 = vmax.f32 %v2567_v41, %v8508_v30  ;;  %v2661_v56 = vmax.f32 %v2567_v41, %v8689_v12  ;;  %v2695_v23 = vmax.f32 %v2567_v41, %v2565_v31  ;;  %5252 = vmatprep.mubr.msk.bf16.mxu0 %vm3627_vm11, %v3596_v15  ;;  %v10139_v14 = vrot.slane %v7933_v7, 1 }
 0x287   : > { %v8847_v9 = vmax.f32 %v2690_v49, %v2786_v13  ;;  %v2692_v26 = vmax.f32 %v2564_v58, %v2660_v10  ;;  %v8850_v1 = vmax.f32 %v2694_v63, %v8701_v37  ;;  %v2884_v54 = vsel %vm1044_vm2, %v2826_v28, %v2827_v34 }
 0x288   : > { %v8840_v43 = vmax.f32 %v2691_v60, %v2787_v21  ;;  %v2693_v47 = vmax.f32 %v2565_v31, %v2661_v56  ;;  %v8843_v30 = vmax.f32 %v2695_v23, %v8689_v12  ;;  %v2882_v31 = vsel %vm1044_vm2, %v2828_v45, %v2829_v17 }
 0x289   : > { %v2883_v12 = vsel %vm1044_vm2, %v2827_v34, %v2828_v45  ;;  %v8865_v37 = vmax.f32 %v2692_v26, %v8619_v33  ;;  %v10407_v52 = vrot.slane %v7653_v11, 1  ;;  %v10409_v8 = vrot.slane %v7650_v61, 1 }
 0x28a   : > { %v8854_v41 = vmax.f32 %v2693_v47, %v8608_v40  ;;  %v4066_v58 = vpack.c.bf16 %v8840_v43, %v8847_v9  ;;  %v4068_v49 = vpack.c.bf16 %v8843_v30, %v8850_v1  ;;  %v2881_v40 = vsel %vm1044_vm2, %v2829_v17, %v10139_v14 }
 0x28b   : > { %v2885_v29 = vsel %vm1044_vm2, %v10407_v52, %v2826_v28  ;;  %v10408_v42 = vmov %v10407_v52  ;;  %v2891_v18 = vsel %vm877_vm6, %v2883_v12, -inf  ;;  %v2893_v0 = vsel %vm877_vm6, %v2881_v40, -inf }
 0x28c   : > { %v2886_v33 = vsel %vm1044_vm2, %v10409_v8, %v10408_v42  ;;  %5303 = vmatmul.mubr.msk.bf16.gmra.mrb[8].mxu1 %vm3627_vm11, %v4066_v58  ;;  %v4067_v60 = vpack.c.bf16 %v8854_v41, %v8865_v37  ;;  %v2889_v25 = vsel %vm877_vm6, %v2885_v29, -inf  ;;  %v2920_v32 = vrot.slane %v7650_v61, 7 }
 0x28d   : > { %v2921_v15 = vrot.slane %v7653_v11, 7  ;;  %v2922_v28 = vrot.slane %v7672_v38, 7  ;;  %v2923_v21 = vrot.slane %v7685_v39, 7  ;;  %v2924_v56 = vrot.slane %v7821_v50, 7 }
 0x28e   : > { %v2925_v23 = vrot.slane %v7811_v22, 7  ;;  %5306 = vmatprep.mubr.msk.bf16.mxu1 %vm3627_vm11, %v4067_v60  ;;  %v10138_v34 = vrot.slane %v7933_v7, 7  ;;  %v10136_v13 = vrot.slane %v8843_v30, 7  ;;  %v10137_v63 = vrot.slane %v7650_v61, 2 }
 0x28f   : > { %v2982_v10 = vsel %vm1145_vm3, %v2920_v32, %v2921_v15  ;;  %v2979_v47 = vsel %vm1145_vm3, %v2923_v21, %v2924_v56  ;;  %v2980_v17 = vsel %vm1145_vm3, %v2922_v28, %v2923_v21  ;;  %v2981_v26 = vsel %vm1145_vm3, %v2921_v15, %v2922_v28 }
 0x290   : > { %v2978_v45 = vsel %vm1145_vm3, %v2924_v56, %v2925_v23  ;;  %v8916_v12 = vsel %vm1145_vm3, %v2925_v23, %v10138_v34  ;;  %v2983_v58 = vsel %vm1145_vm3, %v10136_v13, %v2920_v32  ;;  %v2986_v40 = vsel %vm878_vm7, %v2981_v26, -inf }
 0x291   : > { %v2988_v52 = vsel %vm878_vm7, %v2979_v47, -inf  ;;  %v2984_v29 = vsel %vm878_vm7, %v2983_v58, -inf  ;;  %v3017_v42 = vmax.f32 %v2889_v25, %v2982_v10  ;;  %v3018_v8 = vmax.f32 %v2884_v54, %v2986_v40 }
 0x292   : > { %v3019_v60 = vmax.f32 %v2891_v18, %v2980_v17  ;;  %v3016_v15 = vmax.f32 %v2886_v33, %v2984_v29  ;;  %v3020_v28 = vmax.f32 %v2882_v31, %v2988_v52  ;;  %v3021_v21 = vmax.f32 %v2893_v0, %v2978_v45 }
 0x293   : > { %v3081_v56 = vrot.slane %v7653_v11, 2  ;;  %v3049_v23 = vmax.f32 %v7653_v11, %v3017_v42  ;;  %v3050_v32 = vmax.f32 %v7672_v38, %v3018_v8  ;;  %v3082_v13 = vrot.slane %v7672_v38, 2 }
 0x294   : > { %v3051_v26 = vmax.f32 %v7685_v39, %v3019_v60  ;;  %5307 = vmatmul.mubr.msk.bf16.gmra.mrb[12].mxu1 %vm3627_vm11, %v4068_v49  ;;  %v3048_v47 = vmax.f32 %v7650_v61, %v3016_v15  ;;  %v3052_v54 = vmax.f32 %v7821_v50, %v3020_v28  ;;  %v3053_v33 = vmax.f32 %v7811_v22, %v3021_v21 }
 0x295   : > { %v3083_v31 = vrot.slane %v7685_v39, 2  ;;  %v3084_v18 = vrot.slane %v7821_v50, 2  ;;  %v3085_v0 = vrot.slane %v7811_v22, 2  ;;  %v3086_v25 = vrot.slane %v7933_v7, 2 }
 0x296   : > { %v3141_v10 = vsel %vm1310_vm4, %v3081_v56, %v3082_v13  ;;  %v3142_v45 = vsel %vm1310_vm4, %v10137_v63, %v3081_v56  ;;  %v3176_v58 = vrot.slane %v7650_v61, 6  ;;  %v3178_v60 = vrot.slane %v7672_v38, 6  ;;  %v10410_v38 = vld [vmem:[#allocation17_spill] sm:$0xff] }
 0x297   : > { %v3140_v49 = vsel %vm1310_vm4, %v3082_v13, %v3083_v31  ;;  %v3145_v17 = vsel %vm945_vm8, %v3141_v10, -inf  ;;  %v3137_v40 = vsel %vm1310_vm4, %v3085_v0, %v3086_v25  ;;  %v3138_v52 = vsel %vm1310_vm4, %v3084_v18, %v3085_v0  ;;  %v10411_v10 = vld [vmem:[#allocation23_spill] sm:$0xff] }
 0x298   : > { %v3139_v29 = vsel %vm1310_vm4, %v3083_v31, %v3084_v18  ;;  %v3177_v13 = vrot.slane %v7653_v11, 6  ;;  %v3149_v8 = vsel %vm945_vm8, %v3137_v40, -inf  ;;  %v3179_v15 = vrot.slane %v7685_v39, 6 }
 0x299   : > { %v3147_v42 = vsel %vm945_vm8, %v3139_v29, -inf  ;;  %v3180_v28 = vrot.slane %v7821_v50, 6  ;;  %v3181_v21 = vrot.slane %v7811_v22, 6  ;;  %v3182_v56 = vrot.slane %v7933_v7, 6 }
 0x29a   : > { %v10140_v31 = vrot.slane %v8843_v30, 6  ;;  %v3236_v11 = vsel %vm1411_vm5, %v3178_v60, %v3179_v15  ;;  %v3237_v18 = vsel %vm1411_vm5, %v3177_v13, %v3178_v60  ;;  %v3238_v0 = vsel %vm1411_vm5, %v3176_v58, %v3177_v13 }
 0x29b   : > { %v3597_v39 = vpack.c.bf16 %v10411_v10, %v10410_v38  ;;  %v3233_v50 = vsel %vm1411_vm5, %v3181_v21, %v3182_v56  ;;  %v3234_v22 = vsel %vm1411_vm5, %v3180_v28, %v3181_v21  ;;  %v3235_v40 = vsel %vm1411_vm5, %v3179_v15, %v3180_v28 }
 0x29c   : > { %v3239_v29 = vsel %vm1411_vm5, %v10140_v31, %v3176_v58  ;;  %v3242_v60 = vsel %vm946_vm9, %v3237_v18, -inf  ;;  %v3244_v38 = vsel %vm946_vm9, %v3235_v40, -inf  ;;  %v3273_v10 = vmax.f32 %v3145_v17, %v3238_v0 }
 0x29d   : > { %v3240_v13 = vsel %vm946_vm9, %v3239_v29, -inf  ;;  %5253 = vmatmul.mubr.msk.bf16.gmra.mrb[40].mxu0 %vm3627_vm11, %v3597_v39  ;;  %v3274_v63 = vmax.f32 %v3140_v49, %v3242_v60  ;;  %v3275_v15 = vmax.f32 %v3147_v42, %v3236_v11  ;;  %v3276_v28 = vmax.f32 %v3138_v52, %v3244_v38 }
 0x29e   : > { %v3272_v21 = vmax.f32 %v3142_v45, %v3240_v13  ;;  %v3277_v34 = vmax.f32 %v3149_v8, %v3234_v22  ;;  %v8994_v14 = vmax.f32 %v3049_v23, %v3273_v10  ;;  %v2831_v58 = vrot.slane %v7923_v4, 1 }
 0x29f   : > { %v2832_v29 = vrot.slane %v8034_v48, 1  ;;  %v9000_v18 = vmax.f32 %v3050_v32, %v3274_v63  ;;  %v9002_v61 = vmax.f32 %v3051_v26, %v3275_v15  ;;  %v9004_v17 = vmax.f32 %v3052_v54, %v3276_v28 }
 0x2a0   : > { %v8998_v31 = vmax.f32 %v3048_v47, %v3272_v21  ;;  %v9006_v0 = vmax.f32 %v3053_v33, %v3277_v34  ;;  %v10412_v23 = vrot.slane %v7933_v7, 1  ;;  %v2927_v52 = vrot.slane %v7923_v4, 7 }
 0x2a1   : > { %v2879_v49 = vsel %vm1044_vm2, %v2831_v58, %v2832_v29  ;;  %v3433_v34 = vmax.f32 %v8994_v14, %v9002_v61  ;;  %v10413_v54 = vrot.slane %v7933_v7, 7  ;;  %v2990_v42 = vsel %vm878_vm7, %v8916_v12, -inf }
 0x2a2   : > { %v2880_v45 = vsel %vm1044_vm2, %v10412_v23, %v2831_v58  ;;  %v3402_v63 = vmax.f32 %v9004_v17, %v8998_v31  ;;  %v3432_v32 = vmax.f32 %v8998_v31, %v9000_v18  ;;  %v2895_v26 = vsel %vm877_vm6, %v2879_v49, -inf }
 0x2a3   : > { %v3403_v47 = vmax.f32 %v9006_v0, %v8994_v14  ;;  %v2976_v33 = vsel %vm1145_vm3, %v10413_v54, %v2927_v52  ;;  %v3087_v8 = vrot.slane %v7923_v4, 2  ;;  %v3561_v39 = vmax.f32 %v3433_v34, %v9006_v0 }
 0x2a4   : > { %v3560_v11 = vmax.f32 %v3432_v32, %v9004_v17  ;;  %v3022_v22 = vmax.f32 %v2880_v45, %v2990_v42  ;;  %v3023_v40 = vmax.f32 %v2895_v26, %v2976_v33  ;;  %v3088_v13 = vrot.slane %v8034_v48, 2 }
 0x2a5   : > { %v3136_v60 = vsel %vm1310_vm4, %v3086_v25, %v3087_v8  ;;  %v3183_v38 = vrot.slane %v7923_v4, 6  ;;  %v3246_v10 = vsel %vm946_vm9, %v3233_v50, -inf  ;;  %v3434_v23 = vmax.f32 %v9000_v18, %v3402_v63 }
 0x2a6   : > { %v4315_v21 = vpack.c.bf16 %v3561_v39, %v3560_v11  ;;  %v3054_v12 = vmax.f32 %v7933_v7, %v3022_v22  ;;  %v3055_v15 = vmax.f32 %v7923_v4, %v3023_v40  ;;  %v3278_v28 = vmax.f32 %v3136_v60, %v3246_v10  ;;  %v10414_v7 = vld [vmem:[#allocation26_spill] sm:$0xff]  ;;  %v10415_v4 = vld [vmem:[#allocation5_spill] sm:$0xff] }
 0x2a7   : > { %v3135_v58 = vsel %vm1310_vm4, %v3087_v8, %v3088_v13  ;;  %v3232_v49 = vsel %vm1411_vm5, %v3182_v56, %v3183_v38  ;;  %v3435_v25 = vmax.f32 %v9002_v61, %v3403_v47  ;;  %v3598_v32 = vpack.c.bf16 %v10415_v4, %v10414_v7  ;;  %v10416_v4 = vld [vmem:[#allocation25_spill] sm:$0xff] }
 0x2a8   : > { %5312 = vmatprep.mubr.msk.bf16.mxu1 %vm3627_vm11, %v4315_v21  ;;  %v3151_v50 = vsel %vm945_vm8, %v3135_v58, -inf  ;;  %v9052_v45 = vmax.f32 %v3054_v12, %v3278_v28  ;;  %v2833_v34 = vrot.slane %v8020_v5, 1  ;;  %v2834_v54 = vrot.slane %v8140_v46, 1 }
 0x2a9   : > { %v3279_v26 = vmax.f32 %v3151_v50, %v3232_v49  ;;  %v2928_v56 = vrot.slane %v8034_v48, 7  ;;  %v2929_v63 = vrot.slane %v8020_v5, 7  ;;  %5256 = vmatprep.mubr.msk.bf16.mxu0 %vm3627_vm11, %v3598_v32  ;;  %v3089_v42 = vrot.slane %v8020_v5, 2  ;;  %v10417_v32 = vld [vmem:[#allocation28_spill] sm:$0xff] }
 0x2aa   : > { %v3562_v47 = vmax.f32 %v3434_v23, %v9052_v45  ;;  %v2878_v33 = vsel %vm1044_vm2, %v2832_v29, %v2833_v34  ;;  %v3090_v8 = vrot.slane %v8140_v46, 2  ;;  %v2877_v39 = vsel %vm1044_vm2, %v2833_v34, %v2834_v54 }
 0x2ab   : > { %v9066_v11 = vmax.f32 %v3055_v15, %v3279_v26  ;;  %v2974_v22 = vsel %vm1145_vm3, %v2928_v56, %v2929_v63  ;;  %v2975_v40 = vsel %vm1145_vm3, %v2927_v52, %v2928_v56  ;;  %v2897_v60 = vsel %vm877_vm6, %v2877_v39, -inf }
 0x2ac   : > { %v2992_v29 = vsel %vm878_vm7, %v2975_v40, -inf  ;;  %v3133_v10 = vsel %vm1310_vm4, %v3089_v42, %v3090_v8  ;;  %v3134_v21 = vsel %vm1310_vm4, %v3088_v13, %v3089_v42  ;;  %v3025_v28 = vmax.f32 %v2897_v60, %v2974_v22 }
 0x2ad   : > { %v3563_v12 = vmax.f32 %v3435_v25, %v9066_v11  ;;  %v3024_v15 = vmax.f32 %v2878_v33, %v2992_v29  ;;  %v3153_v58 = vsel %vm945_vm8, %v3133_v10, -inf  ;;  %v3184_v52 = vrot.slane %v8034_v48, 6 }
 0x2ae   : > { %v3185_v49 = vrot.slane %v8020_v5, 6  ;;  %v3404_v23 = vmax.f32 %v9052_v45, %v9000_v18  ;;  %v3405_v50 = vmax.f32 %v9066_v11, %v9002_v61  ;;  %v3057_v25 = vmax.f32 %v8020_v5, %v3025_v28 }
 0x2af   : > { %v4316_v7 = vpack.c.bf16 %v3563_v12, %v3562_v47  ;;  %v3056_v13 = vmax.f32 %v8034_v48, %v3024_v15  ;;  %v3599_v34 = vpack.c.bf16 %v10417_v32, %v10416_v4  ;;  %v3231_v56 = vsel %vm1411_vm5, %v3183_v38, %v3184_v52 }
 0x2b0   : > { %v3230_v26 = vsel %vm1411_vm5, %v3184_v52, %v3185_v49  ;;  %v3436_v33 = vmax.f32 %v9004_v17, %v3404_v23  ;;  %v3437_v42 = vmax.f32 %v9006_v0, %v3405_v50  ;;  %v3248_v48 = vsel %vm946_vm9, %v3231_v56, -inf }
 0x2b1   : > { %5313 = vmatmul.mubr.msk.bf16.vlgmr.msra.gmra.mrb[16].mxu1 %vm3627_vm11, %v4316_v7  ;;  %v3281_v47 = vmax.f32 %v3153_v58, %v3230_v26  ;;  %5257 = vmatmul.mubr.msk.bf16.gmra.mrb[44].mxu0 %vm3627_vm11, %v3599_v34  ;;  %v2835_v5 = vrot.slane %v8126_v62, 1  ;;  %v2836_v39 = vrot.slane %v8247_v51, 1  ;;  %v3280_v22 = vmax.f32 %v3134_v21, %v3248_v48 }
 0x2b2   : > { %v2930_v40 = vrot.slane %v8140_v46, 7  ;;  %v2931_v38 = vrot.slane %v8126_v62, 7  ;;  %v3091_v60 = vrot.slane %v8126_v62, 2  ;;  %v3092_v15 = vrot.slane %v8247_v51, 2 }
 0x2b3   : > { %v9110_v29 = vmax.f32 %v3057_v25, %v3281_v47  ;;  %v2875_v10 = vsel %vm1044_vm2, %v2835_v5, %v2836_v39  ;;  %v2876_v12 = vsel %vm1044_vm2, %v2834_v54, %v2835_v5  ;;  %v9117_v28 = vmax.f32 %v3056_v13, %v3280_v22 }
 0x2b4   : > { %v2899_v21 = vsel %vm877_vm6, %v2875_v10, -inf  ;;  %v2972_v58 = vsel %vm1145_vm3, %v2930_v40, %v2931_v38  ;;  %v2973_v52 = vsel %vm1145_vm3, %v2929_v63, %v2930_v40  ;;  %v3131_v7 = vsel %vm1310_vm4, %v3091_v60, %v3092_v15 }
 0x2b5   : > { %v3533_v23 = vmax.f32 %v9110_v29, %v8994_v14  ;;  %v2994_v50 = vsel %vm878_vm7, %v2973_v52, -inf  ;;  %v3027_v54 = vmax.f32 %v2899_v21, %v2972_v58  ;;  %v3532_v13 = vmax.f32 %v9117_v28, %v8998_v31 }
 0x2b6   : > { %v3026_v25 = vmax.f32 %v2876_v12, %v2994_v50  ;;  %v3132_v4 = vsel %vm1310_vm4, %v3090_v8, %v3091_v60  ;;  %v3155_v63 = vsel %vm945_vm8, %v3131_v7, -inf  ;;  %v3186_v34 = vrot.slane %v8140_v46, 6 }
 0x2b7   : > { %v3565_v32 = vmax.f32 %v3437_v42, %v3533_v23  ;;  %v3059_v14 = vmax.f32 %v8126_v62, %v3027_v54  ;;  %v3187_v26 = vrot.slane %v8126_v62, 6  ;;  %v3564_v56 = vmax.f32 %v3436_v33, %v3532_v13 }
 0x2b8   : > { %v3058_v48 = vmax.f32 %v8140_v46, %v3026_v25  ;;  %v3406_v31 = vmax.f32 %v9117_v28, %v9004_v17  ;;  %v3407_v47 = vmax.f32 %v9110_v29, %v9006_v0  ;;  %v3229_v42 = vsel %vm1411_vm5, %v3185_v49, %v3186_v34 }
 0x2b9   : > { %v3228_v8 = vsel %vm1411_vm5, %v3186_v34, %v3187_v26  ;;  %v2837_v5 = vrot.slane %v8237_v3, 1  ;;  %v2838_v22 = vrot.slane %v8348_v19, 1  ;;  %v4317_v62 = vpack.c.bf16 %v3565_v32, %v3564_v56 }
 0x2ba   : > { %v3250_v46 = vsel %vm946_vm9, %v3229_v42, -inf  ;;  %v3283_v33 = vmax.f32 %v3155_v63, %v3228_v8  ;;  %v3438_v40 = vmax.f32 %v9052_v45, %v3406_v31  ;;  %v3439_v10 = vmax.f32 %v9066_v11, %v3407_v47 }
 0x2bb   : > { %v3282_v60 = vmax.f32 %v3132_v4, %v3250_v46  ;;  %v2873_v12 = vsel %vm1044_vm2, %v2837_v5, %v2838_v22  ;;  %v2874_v49 = vsel %vm1044_vm2, %v2836_v39, %v2837_v5  ;;  %5316 = vmatprep.mubr.msk.bf16.mxu1 %vm3627_vm11, %v4317_v62  ;;  %v2932_v52 = vrot.slane %v8247_v51, 7 }
 0x2bc   : > { %v9160_v21 = vmax.f32 %v3059_v14, %v3283_v33  ;;  %v2901_v58 = vsel %vm877_vm6, %v2873_v12, -inf  ;;  %v2933_v23 = vrot.slane %v8237_v3, 7  ;;  %v3093_v54 = vrot.slane %v8237_v3, 2 }
 0x2bd   : > { %v9166_v50 = vmax.f32 %v3058_v48, %v3282_v60  ;;  %v3094_v7 = vrot.slane %v8348_v19, 2  ;;  %v3188_v13 = vrot.slane %v8247_v51, 6  ;;  %v2971_v4 = vsel %vm1145_vm3, %v2931_v38, %v2932_v52 }
 0x2be   : > { %v3535_v39 = vmax.f32 %v9160_v21, %v9002_v61  ;;  %v2970_v25 = vsel %vm1145_vm3, %v2932_v52, %v2933_v23  ;;  %v3189_v63 = vrot.slane %v8237_v3, 6  ;;  %v2996_v14 = vsel %vm878_vm7, %v2971_v4, -inf }
 0x2bf   : > { %v3534_v32 = vmax.f32 %v9166_v50, %v9000_v18  ;;  %v3029_v34 = vmax.f32 %v2901_v58, %v2970_v25  ;;  %v3129_v56 = vsel %vm1310_vm4, %v3093_v54, %v3094_v7  ;;  %v3028_v61 = vmax.f32 %v2874_v49, %v2996_v14 }
 0x2c0   : > { %v3567_v48 = vmax.f32 %v3439_v10, %v3535_v39  ;;  %v3130_v31 = vsel %vm1310_vm4, %v3092_v15, %v3093_v54  ;;  %v3157_v38 = vsel %vm945_vm8, %v3129_v56, -inf  ;;  %v3226_v18 = vsel %vm1411_vm5, %v3188_v13, %v3189_v63 }
 0x2c1   : > { %v3566_v47 = vmax.f32 %v3438_v40, %v3534_v32  ;;  %v3061_v8 = vmax.f32 %v8237_v3, %v3029_v34  ;;  %v3227_v42 = vsel %vm1411_vm5, %v3187_v26, %v3188_v13  ;;  %v3060_v5 = vmax.f32 %v8247_v51, %v3028_v61 }
 0x2c2   : > { %v3252_v62 = vsel %vm946_vm9, %v3227_v42, -inf  ;;  %v3285_v46 = vmax.f32 %v3157_v38, %v3226_v18  ;;  %v3408_v15 = vmax.f32 %v9166_v50, %v9052_v45  ;;  %v3409_v3 = vmax.f32 %v9160_v21, %v9066_v11 }
 0x2c3   : > { %v4318_v33 = vpack.c.bf16 %v3567_v48, %v3566_v47  ;;  %v3284_v60 = vmax.f32 %v3130_v31, %v3252_v62  ;;  %v2839_v40 = vrot.slane %v8334_v24, 1  ;;  %v2840_v51 = vrot.slane %v8454_v59, 1 }
 0x2c4   : > { %v9201_v10 = vmax.f32 %v3061_v8, %v3285_v46  ;;  %v3440_v26 = vmax.f32 %v9117_v28, %v3408_v15  ;;  %v2934_v12 = vrot.slane %v8348_v19, 7  ;;  %v3441_v58 = vmax.f32 %v9110_v29, %v3409_v3 }
 0x2c5   : > { %5317 = vmatmul.mubr.msk.bf16.gmra.mrb[20].mxu1 %vm3627_vm11, %v4318_v33  ;;  %v9207_v49 = vmax.f32 %v3060_v5, %v3284_v60  ;;  %v2872_v52 = vsel %vm1044_vm2, %v2838_v22, %v2839_v40  ;;  %v2935_v54 = vrot.slane %v8334_v24, 7  ;;  %v2871_v39 = vsel %vm1044_vm2, %v2839_v40, %v2840_v51 }
 0x2c6   : > { %v3537_v13 = vmax.f32 %v9201_v10, %v9006_v0  ;;  %v2969_v25 = vsel %vm1145_vm3, %v2933_v23, %v2934_v12  ;;  %v3095_v4 = vrot.slane %v8334_v24, 2  ;;  %v2903_v14 = vsel %vm877_vm6, %v2871_v39, -inf }
 0x2c7   : > { %v3536_v32 = vmax.f32 %v9207_v49, %v9004_v17  ;;  %v2968_v22 = vsel %vm1145_vm3, %v2934_v12, %v2935_v54  ;;  %v2998_v0 = vsel %vm878_vm7, %v2969_v25, -inf  ;;  %v3096_v61 = vrot.slane %v8454_v59, 2 }
 0x2c8   : > { %v3569_v34 = vmax.f32 %v3441_v58, %v3537_v13  ;;  %v3030_v56 = vmax.f32 %v2872_v52, %v2998_v0  ;;  %v3031_v48 = vmax.f32 %v2903_v14, %v2968_v22  ;;  %v3128_v31 = vsel %vm1310_vm4, %v3094_v7, %v3095_v4 }
 0x2c9   : > { %v3568_v23 = vmax.f32 %v3440_v26, %v3536_v32  ;;  %v3190_v17 = vrot.slane %v8348_v19, 6  ;;  %v3191_v38 = vrot.slane %v8334_v24, 6  ;;  %v3127_v18 = vsel %vm1310_vm4, %v3095_v4, %v3096_v61 }
 0x2ca   : > { %v3062_v47 = vmax.f32 %v8348_v19, %v3030_v56  ;;  %v3063_v8 = vmax.f32 %v8334_v24, %v3031_v48  ;;  %v3410_v42 = vmax.f32 %v9207_v49, %v9117_v28  ;;  %v3159_v62 = vsel %vm945_vm8, %v3127_v18, -inf }
 0x2cb   : > { %v4319_v5 = vpack.c.bf16 %v3569_v34, %v3568_v23  ;;  %v3224_v7 = vsel %vm1411_vm5, %v3190_v17, %v3191_v38  ;;  %v3225_v46 = vsel %vm1411_vm5, %v3189_v63, %v3190_v17  ;;  %v3411_v15 = vmax.f32 %v9201_v10, %v9110_v29 }
 0x2cc   : > { %v3254_v19 = vsel %vm946_vm9, %v3225_v46, -inf  ;;  %v3287_v24 = vmax.f32 %v3159_v62, %v3224_v7  ;;  %v3442_v33 = vmax.f32 %v9166_v50, %v3410_v42  ;;  %v2841_v3 = vrot.slane %v8440_v2, 1 }
 0x2cd   : > { %5320 = vmatprep.mubr.msk.bf16.mxu1 %vm3627_vm11, %v4319_v5  ;;  %v3286_v60 = vmax.f32 %v3128_v31, %v3254_v19  ;;  %v2842_v40 = vrot.slane %v8568_v57, 1  ;;  %v2936_v26 = vrot.slane %v8454_v59, 7  ;;  %v3443_v63 = vmax.f32 %v9160_v21, %v3411_v15 }
 0x2ce   : > { %v9254_v12 = vmax.f32 %v3063_v8, %v3287_v24  ;;  %v2937_v58 = vrot.slane %v8440_v2, 7  ;;  %v3097_v52 = vrot.slane %v8440_v2, 2  ;;  %v2870_v25 = vsel %vm1044_vm2, %v2840_v51, %v2841_v3 }
 0x2cf   : > { %v9259_v13 = vmax.f32 %v3062_v47, %v3286_v60  ;;  %v2869_v39 = vsel %vm1044_vm2, %v2841_v3, %v2842_v40  ;;  %v2967_v4 = vsel %vm1145_vm3, %v2935_v54, %v2936_v26  ;;  %v3098_v48 = vrot.slane %v8568_v57, 2 }
 0x2d0   : > { %v3539_v32 = vmax.f32 %v9254_v12, %v9066_v11  ;;  %v2905_v14 = vsel %vm877_vm6, %v2869_v39, -inf  ;;  %v2966_v22 = vsel %vm1145_vm3, %v2936_v26, %v2937_v58  ;;  %v3000_v0 = vsel %vm878_vm7, %v2967_v4, -inf }
 0x2d1   : > { %v3538_v34 = vmax.f32 %v9259_v13, %v9052_v45  ;;  %v3032_v56 = vmax.f32 %v2870_v25, %v3000_v0  ;;  %v3033_v51 = vmax.f32 %v2905_v14, %v2966_v22  ;;  %v3126_v11 = vsel %vm1310_vm4, %v3096_v61, %v3097_v52 }
 0x2d2   : > { %v3571_v54 = vmax.f32 %v3443_v63, %v3539_v32  ;;  %v3192_v23 = vrot.slane %v8454_v59, 6  ;;  %v3193_v31 = vrot.slane %v8440_v2, 6  ;;  %v3125_v45 = vsel %vm1310_vm4, %v3097_v52, %v3098_v48 }
 0x2d3   : > { %v3570_v17 = vmax.f32 %v3442_v33, %v3538_v34  ;;  %v3064_v47 = vmax.f32 %v8454_v59, %v3032_v56  ;;  %v3065_v8 = vmax.f32 %v8440_v2, %v3033_v51  ;;  %v3161_v18 = vsel %vm945_vm8, %v3125_v45, -inf }
 0x2d4   : > { %v3222_v42 = vsel %vm1411_vm5, %v3192_v23, %v3193_v31  ;;  %v3223_v61 = vsel %vm1411_vm5, %v3191_v38, %v3192_v23  ;;  %v3412_v5 = vmax.f32 %v9259_v13, %v9166_v50  ;;  %v3413_v7 = vmax.f32 %v9254_v12, %v9160_v21 }
 0x2d5   : > { %v4320_v62 = vpack.c.bf16 %v3571_v54, %v3570_v17  ;;  %v3256_v59 = vsel %vm946_vm9, %v3223_v61, -inf  ;;  %v3289_v2 = vmax.f32 %v3161_v18, %v3222_v42  ;;  %v2843_v24 = vrot.slane %v8558_v53, 1 }
 0x2d6   : > { %v3288_v46 = vmax.f32 %v3126_v11, %v3256_v59  ;;  %v3444_v19 = vmax.f32 %v9207_v49, %v3412_v5  ;;  %v2844_v15 = vrot.slane %v8661_v16, 1  ;;  %v3445_v33 = vmax.f32 %v9201_v10, %v3413_v7 }
 0x2d7   : > { %5321 = vmatmul.mubr.msk.bf16.gmra.mrb[24].mxu1 %vm3627_vm11, %v4320_v62  ;;  %v9302_v38 = vmax.f32 %v3065_v8, %v3289_v2  ;;  %v2938_v60 = vrot.slane %v8568_v57, 7  ;;  %v2939_v3 = vrot.slane %v8558_v53, 7  ;;  %v2868_v52 = vsel %vm1044_vm2, %v2842_v40, %v2843_v24 }
 0x2d8   : > { %v9307_v26 = vmax.f32 %v3064_v47, %v3288_v46  ;;  %v2867_v63 = vsel %vm1044_vm2, %v2843_v24, %v2844_v15  ;;  %v3099_v39 = vrot.slane %v8558_v53, 2  ;;  %v3100_v34 = vrot.slane %v8661_v16, 2 }
 0x2d9   : > { %v3541_v25 = vmax.f32 %v9302_v38, %v9110_v29  ;;  %v2907_v4 = vsel %vm877_vm6, %v2867_v63, -inf  ;;  %v2964_v32 = vsel %vm1145_vm3, %v2938_v60, %v2939_v3  ;;  %v2965_v14 = vsel %vm1145_vm3, %v2937_v58, %v2938_v60 }
 0x2da   : > { %v3540_v22 = vmax.f32 %v9307_v26, %v9117_v28  ;;  %v3002_v40 = vsel %vm878_vm7, %v2965_v14, -inf  ;;  %v3035_v0 = vmax.f32 %v2907_v4, %v2964_v32  ;;  %v3124_v51 = vsel %vm1310_vm4, %v3098_v48, %v3099_v39 }
 0x2db   : > { %v3573_v56 = vmax.f32 %v3445_v33, %v3541_v25  ;;  %v3034_v29 = vmax.f32 %v2868_v52, %v3002_v40  ;;  %v3194_v54 = vrot.slane %v8568_v57, 6  ;;  %v3123_v58 = vsel %vm1310_vm4, %v3099_v39, %v3100_v34 }
 0x2dc   : > { %v3572_v11 = vmax.f32 %v3444_v19, %v3540_v22  ;;  %v3067_v23 = vmax.f32 %v8558_v53, %v3035_v0  ;;  %v3195_v28 = vrot.slane %v8558_v53, 6  ;;  %v3163_v47 = vsel %vm945_vm8, %v3123_v58, -inf }
 0x2dd   : > { %v3066_v17 = vmax.f32 %v8568_v57, %v3034_v29  ;;  %v3221_v8 = vsel %vm1411_vm5, %v3193_v31, %v3194_v54  ;;  %v3414_v48 = vmax.f32 %v9307_v26, %v9207_v49  ;;  %v3415_v53 = vmax.f32 %v9302_v38, %v9201_v10 }
 0x2de   : > { %v4321_v45 = vpack.c.bf16 %v3573_v56, %v3572_v11  ;;  %v3220_v18 = vsel %vm1411_vm5, %v3194_v54, %v3195_v28  ;;  %v3258_v42 = vsel %vm946_vm9, %v3221_v8, -inf  ;;  %v2845_v62 = vrot.slane %v8652_v27, 1 }
 0x2df   : > { %v3290_v57 = vmax.f32 %v3124_v51, %v3258_v42  ;;  %v3291_v61 = vmax.f32 %v3163_v47, %v3220_v18  ;;  %v3446_v5 = vmax.f32 %v9259_v13, %v3414_v48  ;;  %v3447_v31 = vmax.f32 %v9254_v12, %v3415_v53 }
 0x2e0   : > { %5324 = vmatprep.mubr.msk.bf16.mxu1 %vm3627_vm11, %v4321_v45  ;;  %v2846_v59 = vrot.slane %v8735_v35, 1  ;;  %v2940_v2 = vrot.slane %v8661_v16, 7  ;;  %v2941_v7 = vrot.slane %v8652_v27, 7  ;;  %v2866_v24 = vsel %vm1044_vm2, %v2844_v15, %v2845_v62 }
 0x2e1   : > { %v9354_v46 = vmax.f32 %v3066_v17, %v3290_v57  ;;  %v9356_v19 = vmax.f32 %v3067_v23, %v3291_v61  ;;  %v3101_v33 = vrot.slane %v8652_v27, 2  ;;  %v3102_v39 = vrot.slane %v8735_v35, 2 }
 0x2e2   : > { %v2865_v60 = vsel %vm1044_vm2, %v2845_v62, %v2846_v59  ;;  %v2962_v63 = vsel %vm1145_vm3, %v2940_v2, %v2941_v7  ;;  %v2963_v52 = vsel %vm1145_vm3, %v2939_v3, %v2940_v2  ;;  %v3197_v54 = vrot.slane %v8652_v27, 6 }
 0x2e3   : > { %v3542_v25 = vmax.f32 %v9354_v46, %v9166_v50  ;;  %v3543_v4 = vmax.f32 %v9356_v19, %v9160_v21  ;;  %v2909_v15 = vsel %vm877_vm6, %v2865_v60, -inf  ;;  %v3004_v32 = vsel %vm878_vm7, %v2963_v52, -inf }
 0x2e4   : > { %v3036_v14 = vmax.f32 %v2866_v24, %v3004_v32  ;;  %v3037_v22 = vmax.f32 %v2909_v15, %v2962_v63  ;;  %v3121_v40 = vsel %vm1310_vm4, %v3101_v33, %v3102_v39  ;;  %v3122_v3 = vsel %vm1310_vm4, %v3100_v34, %v3101_v33 }
 0x2e5   : > { %v3574_v0 = vmax.f32 %v3446_v5, %v3542_v25  ;;  %v3575_v56 = vmax.f32 %v3447_v31, %v3543_v4  ;;  %v3165_v50 = vsel %vm945_vm8, %v3121_v40, -inf  ;;  %v3196_v21 = vrot.slane %v8661_v16, 6 }
 0x2e6   : > { %v3068_v29 = vmax.f32 %v8661_v16, %v3036_v14  ;;  %v3069_v51 = vmax.f32 %v8652_v27, %v3037_v22  ;;  %v3416_v11 = vmax.f32 %v9354_v46, %v9259_v13  ;;  %v3417_v58 = vmax.f32 %v9356_v19, %v9254_v12 }
 0x2e7   : > { %v4322_v23 = vpack.c.bf16 %v3575_v56, %v3574_v0  ;;  %v3219_v34 = vsel %vm1411_vm5, %v3195_v28, %v3196_v21  ;;  %v2847_v17 = vrot.slane %v8728_v36, 1  ;;  %v3218_v47 = vsel %vm1411_vm5, %v3196_v21, %v3197_v54 }
 0x2e8   : > { %v3260_v16 = vsel %vm946_vm9, %v3219_v34, -inf  ;;  %v3448_v27 = vmax.f32 %v9307_v26, %v3416_v11  ;;  %v2848_v8 = vrot.slane %v8813_v20, 1  ;;  %v3293_v45 = vmax.f32 %v3165_v50, %v3218_v47 }
 0x2e9   : > { %5325 = vmatmul.mubr.msk.bf16.gmra.mrb[28].mxu1 %vm3627_vm11, %v4322_v23  ;;  %v3292_v48 = vmax.f32 %v3122_v3, %v3260_v16  ;;  %v3449_v28 = vmax.f32 %v9302_v38, %v3417_v58  ;;  %v2864_v18 = vsel %vm1044_vm2, %v2846_v59, %v2847_v17  ;;  %v2942_v53 = vrot.slane %v8735_v35, 7 }
 0x2ea   : > { %v2863_v42 = vsel %vm1044_vm2, %v2847_v17, %v2848_v8  ;;  %v2943_v57 = vrot.slane %v8728_v36, 7  ;;  %v3103_v61 = vrot.slane %v8728_v36, 2  ;;  %v9410_v62 = vmax.f32 %v3069_v51, %v3293_v45 }
 0x2eb   : > { %v9408_v5 = vmax.f32 %v3068_v29, %v3292_v48  ;;  %v2911_v31 = vsel %vm877_vm6, %v2863_v42, -inf  ;;  %v3104_v2 = vrot.slane %v8813_v20, 2  ;;  %v2961_v24 = vsel %vm1145_vm3, %v2941_v7, %v2942_v53 }
 0x2ec   : > { %v2960_v59 = vsel %vm1145_vm3, %v2942_v53, %v2943_v57  ;;  %v3120_v33 = vsel %vm1310_vm4, %v3102_v39, %v3103_v61  ;;  %v3198_v60 = vrot.slane %v8735_v35, 6  ;;  %v3545_v52 = vmax.f32 %v9410_v62, %v9201_v10 }
 0x2ed   : > { %v3544_v63 = vmax.f32 %v9408_v5, %v9207_v49  ;;  %v3006_v25 = vsel %vm878_vm7, %v2961_v24, -inf  ;;  %v3039_v4 = vmax.f32 %v2911_v31, %v2960_v59  ;;  %v3119_v32 = vsel %vm1310_vm4, %v3103_v61, %v3104_v2 }
 0x2ee   : > { %v3038_v15 = vmax.f32 %v2864_v18, %v3006_v25  ;;  %v3199_v7 = vrot.slane %v8728_v36, 6  ;;  %v3217_v39 = vsel %vm1411_vm5, %v3197_v54, %v3198_v60  ;;  %v3577_v22 = vmax.f32 %v3449_v28, %v3545_v52 }
 0x2ef   : > { %v3576_v14 = vmax.f32 %v3448_v27, %v3544_v63  ;;  %v3071_v49 = vmax.f32 %v8728_v36, %v3039_v4  ;;  %v3167_v10 = vsel %vm945_vm8, %v3119_v32, -inf  ;;  %v3262_v0 = vsel %vm946_vm9, %v3217_v39, -inf }
 0x2f0   : > { %v3070_v40 = vmax.f32 %v8735_v35, %v3038_v15  ;;  %v3216_v3 = vsel %vm1411_vm5, %v3198_v60, %v3199_v7  ;;  %v3418_v56 = vmax.f32 %v9408_v5, %v9307_v26  ;;  %v3294_v21 = vmax.f32 %v3120_v33, %v3262_v0 }
 0x2f1   : > { %v4323_v50 = vpack.c.bf16 %v3577_v22, %v3576_v14  ;;  %v3295_v29 = vmax.f32 %v3167_v10, %v3216_v3  ;;  %v3419_v36 = vmax.f32 %v9410_v62, %v9302_v38  ;;  %v2849_v54 = vrot.slane %v8802_v55, 1 }
 0x2f2   : > { %v3450_v51 = vmax.f32 %v9354_v46, %v3418_v56  ;;  %v2850_v35 = vrot.slane %v8847_v9, 1  ;;  %v2944_v11 = vrot.slane %v8813_v20, 7  ;;  %v9450_v23 = vmax.f32 %v3070_v40, %v3294_v21 }
 0x2f3   : > { %5328 = vmatprep.mubr.msk.bf16.mxu1 %vm3627_vm11, %v4323_v50  ;;  %v9452_v34 = vmax.f32 %v3071_v49, %v3295_v29  ;;  %v3451_v58 = vmax.f32 %v9356_v19, %v3419_v36  ;;  %v2945_v17 = vrot.slane %v8802_v55, 7  ;;  %v2862_v16 = vsel %vm1044_vm2, %v2848_v8, %v2849_v54 }
 0x2f4   : > { %v2861_v47 = vsel %vm1044_vm2, %v2849_v54, %v2850_v35  ;;  %v2959_v27 = vsel %vm1145_vm3, %v2943_v57, %v2944_v11  ;;  %v3105_v48 = vrot.slane %v8802_v55, 2  ;;  %v3546_v45 = vmax.f32 %v9450_v23, %v9259_v13 }
 0x2f5   : > { %v3547_v28 = vmax.f32 %v9452_v34, %v9254_v12  ;;  %v2913_v18 = vsel %vm877_vm6, %v2861_v47, -inf  ;;  %v2958_v42 = vsel %vm1145_vm3, %v2944_v11, %v2945_v17  ;;  %v3008_v8 = vsel %vm878_vm7, %v2959_v27, -inf }
 0x2f6   : > { %v3041_v53 = vmax.f32 %v2913_v18, %v2958_v42  ;;  %v3106_v57 = vrot.slane %v8847_v9, 2  ;;  %v3118_v61 = vsel %vm1310_vm4, %v3104_v2, %v3105_v48  ;;  %v3578_v31 = vmax.f32 %v3450_v51, %v3546_v45 }
 0x2f7   : > { %v3579_v13 = vmax.f32 %v3451_v58, %v3547_v28  ;;  %v3040_v59 = vmax.f32 %v2862_v16, %v3008_v8  ;;  %v3200_v12 = vrot.slane %v8813_v20, 6  ;;  %v3201_v60 = vrot.slane %v8802_v55, 6 }
 0x2f8   : > { %v3073_v24 = vmax.f32 %v8802_v55, %v3041_v53  ;;  %v3117_v33 = vsel %vm1310_vm4, %v3105_v48, %v3106_v57  ;;  %v3420_v63 = vmax.f32 %v9450_v23, %v9354_v46  ;;  %v3421_v55 = vmax.f32 %v9452_v34, %v9356_v19 }
 0x2f9   : > { %v4324_v52 = vpack.c.bf16 %v3579_v13, %v3578_v31  ;;  %v3072_v25 = vmax.f32 %v8813_v20, %v3040_v59  ;;  %v3169_v2 = vsel %vm945_vm8, %v3117_v33, -inf  ;;  %v3215_v4 = vsel %vm1411_vm5, %v3199_v7, %v3200_v12  ;;  %v9542_v59 = vpop.f32.mrb[48].mxu0 }
 0x2fa   : > { %v3214_v15 = vsel %vm1411_vm5, %v3200_v12, %v3201_v60  ;;  %v3264_v32 = vsel %vm946_vm9, %v3215_v4, -inf  ;;  %v3452_v39 = vmax.f32 %v9408_v5, %v3420_v63  ;;  %v2851_v22 = vrot.slane %v8840_v43, 1  ;;  %v9548_v33 = vpop.f32.mrb[49].mxu0 }
 0x2fb   : > { %5329 = vmatmul.mubr.msk.bf16.gmra.mrb[0].mxu1 %vm3627_vm11, %v4324_v52  ;;  %v3296_v20 = vmax.f32 %v3118_v61, %v3264_v32  ;;  %v3297_v14 = vmax.f32 %v3169_v2, %v3214_v15  ;;  %v2852_v49 = vrot.slane %v8865_v37, 1  ;;  %v3453_v7 = vmax.f32 %v9410_v62, %v3421_v55  ;;  %v9555_v2 = vpop.f32.mrb[50].mxu0 }
 0x2fc   : > { %v2946_v10 = vrot.slane %v8847_v9, 7  ;;  %v2947_v40 = vrot.slane %v8840_v43, 7  ;;  %v3107_v3 = vrot.slane %v8840_v43, 2  ;;  %v2860_v21 = vsel %vm1044_vm2, %v2850_v35, %v2851_v22 }
 0x2fd   : > { %v9502_v0 = vmax.f32 %v3072_v25, %v3296_v20  ;;  %v9504_v56 = vmax.f32 %v3073_v24, %v3297_v14  ;;  %v2859_v50 = vsel %vm1044_vm2, %v2851_v22, %v2852_v49  ;;  %v3108_v54 = vrot.slane %v8865_v37, 2 }
 0x2fe   : > { %v2915_v29 = vsel %vm877_vm6, %v2859_v50, -inf  ;;  %v2956_v36 = vsel %vm1145_vm3, %v2946_v10, %v2947_v40  ;;  %v2957_v51 = vsel %vm1145_vm3, %v2945_v17, %v2946_v10  ;;  %v3116_v48 = vsel %vm1310_vm4, %v3106_v57, %v3107_v3 }
 0x2ff   : > { %v3548_v11 = vmax.f32 %v9502_v0, %v9307_v26  ;;  %v3549_v58 = vmax.f32 %v9504_v56, %v9302_v38  ;;  %v3010_v35 = vsel %vm878_vm7, %v2957_v51, -inf  ;;  %v3043_v47 = vmax.f32 %v2915_v29, %v2956_v36 }
 0x300   : > { %v3042_v16 = vmax.f32 %v2860_v21, %v3010_v35  ;;  %v3115_v27 = vsel %vm1310_vm4, %v3107_v3, %v3108_v54  ;;  %v3202_v17 = vrot.slane %v8847_v9, 6  ;;  %v3203_v42 = vrot.slane %v8840_v43, 6 }
 0x301   : > { %v3580_v45 = vmax.f32 %v3452_v39, %v3548_v11  ;;  %v3581_v28 = vmax.f32 %v3453_v7, %v3549_v58  ;;  %v3075_v26 = vmax.f32 %v8840_v43, %v3043_v47  ;;  %v3171_v38 = vsel %vm945_vm8, %v3115_v27, -inf  ;;  %v9563_v39 = vpop.f32.mrb[51].mxu0 }
 0x302   : > { %v3074_v18 = vmax.f32 %v8847_v9, %v3042_v16  ;;  %v3213_v8 = vsel %vm1411_vm5, %v3201_v60, %v3202_v17  ;;  %v3422_v53 = vmax.f32 %v9502_v0, %v9408_v5  ;;  %v3423_v31 = vmax.f32 %v9504_v56, %v9410_v62 }
 0x303   : > { %v4325_v57 = vpack.c.bf16 %v3581_v28, %v3580_v45  ;;  %v3266_v61 = vsel %vm946_vm9, %v3213_v8, -inf  ;;  %v2853_v13 = vrot.slane %v8854_v41, 1  ;;  %v3212_v43 = vsel %vm1411_vm5, %v3202_v17, %v3203_v42 }
 0x304   : > { %v3298_v9 = vmax.f32 %v3116_v48, %v3266_v61  ;;  %v3454_v12 = vmax.f32 %v9450_v23, %v3422_v53  ;;  %v2854_v24 = vrot.slane %v8850_v1, 1  ;;  %v3299_v60 = vmax.f32 %v3171_v38, %v3212_v43  ;;  %v10418_v38 = vld [vmem:[#allocation13_spill] sm:$0xff] }
 0x305   : > { %5332 = vmatprep.mubr.msk.bf16.mxu1 %vm3627_vm11, %v4325_v57  ;;  %v3455_v63 = vmax.f32 %v9452_v34, %v3423_v31  ;;  %v2858_v52 = vsel %vm1044_vm2, %v2852_v49, %v2853_v13  ;;  %v2948_v25 = vrot.slane %v8865_v37, 7  ;;  %v2949_v32 = vrot.slane %v8854_v41, 7 }
 0x306   : > { %v9557_v4 = vmax.f32 %v3074_v18, %v3298_v9  ;;  %v2857_v15 = vsel %vm1044_vm2, %v2853_v13, %v2854_v24  ;;  %v3109_v55 = vrot.slane %v8854_v41, 2  ;;  %v9565_v20 = vmax.f32 %v3075_v26, %v3299_v60 }
 0x307   : > { %v2917_v14 = vsel %vm877_vm6, %v2857_v15, -inf  ;;  %v2955_v22 = vsel %vm1145_vm3, %v2947_v40, %v2948_v25  ;;  %v3110_v49 = vrot.slane %v8850_v1, 2  ;;  %v2954_v10 = vsel %vm1145_vm3, %v2948_v25, %v2949_v32 }
 0x308   : > { %v3550_v7 = vmax.f32 %v9557_v4, %v9354_v46  ;;  %v3012_v3 = vsel %vm878_vm7, %v2955_v22, -inf  ;;  %v3114_v50 = vsel %vm1310_vm4, %v3108_v54, %v3109_v55  ;;  %v3551_v21 = vmax.f32 %v9565_v20, %v9356_v19 }
 0x309   : > { %v3044_v29 = vmax.f32 %v2858_v52, %v3012_v3  ;;  %v3045_v36 = vmax.f32 %v2917_v14, %v2954_v10  ;;  %v3113_v40 = vsel %vm1310_vm4, %v3109_v55, %v3110_v49  ;;  %v3204_v11 = vrot.slane %v8865_v37, 6 }
 0x30a   : > { %v3582_v51 = vmax.f32 %v3454_v12, %v3550_v7  ;;  %v3173_v46 = vsel %vm945_vm8, %v3113_v40, -inf  ;;  %v3205_v58 = vrot.slane %v8854_v41, 6  ;;  %v3583_v35 = vmax.f32 %v3455_v63, %v3551_v21 }
 0x30b   : > { %v3076_v47 = vmax.f32 %v8865_v37, %v3044_v29  ;;  %v3077_v54 = vmax.f32 %v8854_v41, %v3045_v36  ;;  %v3424_v19 = vmax.f32 %v9557_v4, %v9450_v23  ;;  %v3211_v27 = vsel %vm1411_vm5, %v3203_v42, %v3204_v11 }
 0x30c   : > { %v3210_v16 = vsel %vm1411_vm5, %v3204_v11, %v3205_v58  ;;  %v3425_v48 = vmax.f32 %v9565_v20, %v9452_v34  ;;  %v2855_v17 = vrot.slane %v8843_v30, 1  ;;  %v4326_v45 = vpack.c.bf16 %v3583_v35, %v3582_v51 }
 0x30d   : > { %v3268_v37 = vsel %vm946_vm9, %v3211_v27, -inf  ;;  %v3301_v28 = vmax.f32 %v3173_v46, %v3210_v16  ;;  %v10419_v18 = vrot.slane %v10418_v38, 1  ;;  %v2950_v57 = vrot.slane %v8850_v1, 7  ;;  %v9652_v27 = vpop.f32.mrb[52].mxu0 }
 0x30e   : > { %v3300_v41 = vmax.f32 %v3114_v50, %v3268_v37  ;;  %v3457_v26 = vmax.f32 %v9504_v56, %v3425_v48  ;;  %5333 = vmatmul.mubr.msk.bf16.gmra.mrb[4].mxu1 %vm3627_vm11, %v4326_v45  ;;  %v3111_v61 = vrot.slane %v8843_v30, 2  ;;  %v3456_v13 = vmax.f32 %v9502_v0, %v3424_v19  ;;  %v9655_v37 = vpop.f32.mrb[53].mxu0 }
 0x30f   : > { %v2887_v8 = vsel %vm1044_vm2, %v2855_v17, %v10419_v18  ;;  %v3333_v42 = vmax.f32 %v3077_v54, %v3301_v28  ;;  %v2856_v43 = vsel %vm1044_vm2, %v2854_v24, %v2855_v17  ;;  %v3206_v9 = vrot.slane %v8850_v1, 6  ;;  %v9657_v28 = vpop.f32.mrb[54].mxu0 }
 0x310   : > { %v2919_v53 = vsel %vm877_vm6, %v2887_v8, -inf  ;;  %v3332_v31 = vmax.f32 %v3076_v47, %v3300_v41  ;;  %v10420_v60 = vrot.slane %v8843_v30, 7  ;;  %v2953_v52 = vsel %vm1145_vm3, %v2949_v32, %v2950_v57 }
 0x311   : > { %v3553_v12 = vmax.f32 %v3333_v42, %v9410_v62  ;;  %v3112_v25 = vsel %vm1310_vm4, %v3110_v49, %v3111_v61  ;;  %v3014_v24 = vsel %vm878_vm7, %v2953_v52, -inf  ;;  %v10421_v14 = vrot.slane %v10418_v38, 2 }
 0x312   : > { %v2952_v63 = vsel %vm1145_vm3, %v2950_v57, %v10420_v60  ;;  %v3552_v15 = vmax.f32 %v3332_v31, %v9408_v5  ;;  %v3046_v7 = vmax.f32 %v2856_v43, %v3014_v24  ;;  %v10422_v32 = vrot.slane %v8843_v30, 6 }
 0x313   : > { %v3047_v55 = vmax.f32 %v2919_v53, %v2952_v63  ;;  %v3143_v62 = vsel %vm1310_vm4, %v3111_v61, %v10421_v14  ;;  %v3585_v22 = vmax.f32 %v3457_v26, %v3553_v12  ;;  %v3209_v50 = vsel %vm1411_vm5, %v3205_v58, %v3206_v9 }
 0x314   : > { %v3175_v10 = vsel %vm945_vm8, %v3143_v62, -inf  ;;  %v3208_v49 = vsel %vm1411_vm5, %v3206_v9, %v10422_v32  ;;  %v3584_v5 = vmax.f32 %v3456_v13, %v3552_v15  ;;  %v3078_v29 = vmax.f32 %v8850_v1, %v3046_v7  ;;  %v9694_v7 = vld [vmem:[%s10051_s5] ss:$0 sm:$0xff] }
 0x315   : > { %v3079_v3 = vmax.f32 %v8843_v30, %v3047_v55  ;;  %v3303_v21 = vmax.f32 %v3175_v10, %v3208_v49  ;;  %v3270_v36 = vsel %vm946_vm9, %v3209_v50, -inf  ;;  %v3426_v6 = vmax.f32 %v3332_v31, %v9502_v0 }
 0x316   : > { %v3427_v40 = vmax.f32 %v3333_v42, %v9504_v56  ;;  %v4327_v51 = vpack.c.bf16 %v3585_v22, %v3584_v5  ;;  %v3302_v46 = vmax.f32 %v3112_v25, %v3270_v36 }
 0x317   : > { %v3335_v11 = vmax.f32 %v3079_v3, %v3303_v21  ;;  %v3458_v58 = vmax.f32 %v9557_v4, %v3426_v6  ;;  %v9703_v3 = vld [vmem:[%s10052_s6] ss:$0 sm:$0xff] }
 0x318   : > { %v3459_v35 = vmax.f32 %v9565_v20, %v3427_v40  ;;  %5336 = vmatprep.mubr.msk.bf16.mxu1 %vm3627_vm11, %v4327_v51  ;;  %v3334_v30 = vmax.f32 %v3078_v29, %v3302_v46 }
 0x319   : > { %v3555_v47 = vmax.f32 %v3335_v11, %v9452_v34  ;;  %v3429_v1 = vmax.f32 %v3335_v11, %v9565_v20  ;;  %v3463_v38 = vmax.f32 %v3335_v11, %v3333_v42 }
 0x31a   : > { %v3554_v44 = vmax.f32 %v3334_v30, %v9450_v23  ;;  %v3428_v19 = vmax.f32 %v3334_v30, %v9557_v4  ;;  %v3462_v26 = vmax.f32 %v3334_v30, %v3332_v31  ;;  %v9660_v23 = vpop.f32.mrb[55].mxu0 }
 0x31b   : > { %v3587_v54 = vmax.f32 %v3459_v35, %v3555_v47  ;;  %v3461_v16 = vmax.f32 %v3333_v42, %v3429_v1 }
 0x31c   : > { %v3586_v48 = vmax.f32 %v3458_v58, %v3554_v44  ;;  %v3460_v17 = vmax.f32 %v3332_v31, %v3428_v19  ;;  %v3590_v8 = vmax.f32 %v3462_v26, %v9557_v4 }
 0x31d   : > { %v3589_v45 = vmax.f32 %v3461_v16, %v9504_v56  ;;  %v3591_v56 = vmax.f32 %v3463_v38, %v9565_v20 }
 0x31e   : > { %v4328_v41 = vpack.c.bf16 %v3587_v54, %v3586_v48  ;;  %v3588_v34 = vmax.f32 %v3460_v17, %v9502_v0 }
 0x31f   : > { %v4330_v53 = vpack.c.bf16 %v3591_v56, %v3590_v8 }
 0x320   : > { %5337 = vmatmul.mubr.msk.bf16.gmra.mrb[8].mxu1 %vm3627_vm11, %v4328_v41  ;;  %v4329_v18 = vpack.c.bf16 %v3589_v45, %v3588_v34 }
 0x322   : > { %5340 = vmatprep.mubr.msk.bf16.mxu1 %vm3627_vm11, %v4329_v18 }
 0x324   : > { %v9667_v57 = vpop.f32.mrb[56].mxu0 }
 0x325   : > { %v9669_v61 = vpop.f32.mrb[57].mxu0 }
 0x326   : > { %v9671_v0 = vpop.f32.mrb[58].mxu0 }
 0x327   : > { %v9673_v42 = vpop.f32.mrb[59].mxu0 }
 0x328   : > { %5341 = vmatmul.mubr.msk.bf16.gmra.mrb[12].mxu1 %vm3627_vm11, %v4330_v53 }
 0x33d   : > { %v9675_v31 = vpop.f32.mrb[60].mxu0 }
 0x33e   : > { %v9677_v13 = vpop.f32.mrb[61].mxu0 }
 0x33f   : > { %v9679_v43 = vpop.f32.mrb[62].mxu0 }
 0x340   : > { %v9681_v4 = vpop.f32.mrb[63].mxu0 }
 0x34d   : > { %v5246_v20 = vpop.f32.mrb[32].mxu0 }
 0x34e   : > { %v3926_v9 = vpop.f32.mrb[33].mxu0 }
 0x34f   : > { %v5247_v12 = vpop.f32.mrb[34].mxu0 }
 0x350   : > { %v3929_v60 = vpop.f32.mrb[35].mxu0 }
 0x358   : > { %v5250_v63 = vpop.f32.mrb[36].mxu0 }
 0x359   : > { %v3942_v52 = vpop.f32.mrb[37].mxu0 }
 0x35a   : > { %v5251_v25 = vpop.f32.mrb[38].mxu0 }
 0x35b   : > { %v3945_v15 = vpop.f32.mrb[39].mxu0 }
 0x370   : > { %v9683_v24 = vpop.f32.mrb[40].mxu0 }
 0x371   : > { %v9685_v55 = vpop.f32.mrb[41].mxu0 }
 0x372   : > { %v9687_v14 = vpop.f32.mrb[42].mxu0 }
 0x373   : > { %v9689_v62 = vpop.f32.mrb[43].mxu0 }
 0x384   : > { %v5314_v22 = vpop.f32.mrb[16].mxu1  ;;  %v9696_v10 = vpop.f32.mrb[44].mxu0 }
 0x385   : > { %v5346_v32 = vadd.f32 %v5314_v22, %v5246_v20  ;;  %v4418_v49 = vpop.f32.mrb[17].mxu1  ;;  %v9698_v5 = vpop.f32.mrb[45].mxu0 }
 0x386   : > { %v5347_v50 = vadd.f32 %v4418_v49, %v3926_v9  ;;  %v5315_v21 = vpop.f32.mrb[18].mxu1  ;;  %v9705_v29 = vpop.f32.mrb[46].mxu0 }
 0x387   : > { %v4586_v36 = vmul.f32 %v5346_v32, %v9694_v7  ;;  %v5348_v6 = vadd.f32 %v5315_v21, %v5247_v12  ;;  %v4421_v40 = vpop.f32.mrb[19].mxu1  ;;  %v9708_v51 = vpop.f32.mrb[47].mxu0 }
 0x388   : > { %v4584_v46 = vmul.f32 %v5347_v50, %v9694_v7  ;;  %v5349_v11 = vadd.f32 %v4421_v40, %v3929_v60 }
 0x389   : > { %v9712_v35 = vadd.f32 %v9703_v3, %v4586_v36  ;;  %v4587_v30 = vmul.f32 %v5348_v6, %v9694_v7 }
 0x38a   : > { %v9716_v58 = vadd.f32 %v9703_v3, %v4584_v46  ;;  %v4585_v47 = vmul.f32 %v5349_v11, %v9694_v7 }
 0x38b   : > { %v4657_v1 = vsub.f32 0.0, %v9712_v35  ;;  %v9721_v44 = vadd.f32 %v9703_v3, %v4587_v30 }
 0x38c   : > { %v4655_v54 = vsub.f32 0.0, %v9716_v58  ;;  %v9725_v19 = vadd.f32 %v9703_v3, %v4585_v47 }
 0x38d   : > { %v4691_v16 = vmul.f32 1.442695, %v4657_v1  ;;  %v4658_v48 = vsub.f32 0.0, %v9721_v44 }
 0x38e   : > { %v4687_v17 = vmul.f32 1.442695, %v4655_v54  ;;  %v4656_v45 = vsub.f32 0.0, %v9725_v19 }
 0x38f   : > { %5617 = vpow2.f32 %v4691_v16  ;;  %v4693_v41 = vmul.f32 1.442695, %v4658_v48 }
 0x390   : > { %5619 = vpow2.f32 %v4687_v17  ;;  %v4689_v34 = vmul.f32 1.442695, %v4656_v45 }
 0x391   : > { %5621 = vpow2.f32 %v4693_v41 }
 0x392   : > { %5623 = vpow2.f32 %v4689_v34 }
 0x398   : > { %v5318_v26 = vpop.f32.mrb[20].mxu1 }
 0x399   : > { %v5618_v38 = vpop.eup %5617  ;;  %v5350_v18 = vadd.f32 %v5318_v26, %v5250_v63  ;;  %v4434_v8 = vpop.f32.mrb[21].mxu1 }
 0x39a   : > { %v5620_v56 = vpop.eup %5619  ;;  %v4753_v53 = vadd.f32 1.0, %v5618_v38  ;;  %v5351_v20 = vadd.f32 %v4434_v8, %v3942_v52  ;;  %v5319_v9 = vpop.f32.mrb[22].mxu1 }
 0x39b   : > { %v5622_v12 = vpop.eup %5621  ;;  %v4751_v60 = vadd.f32 1.0, %v5620_v56  ;;  %v4590_v22 = vmul.f32 %v5350_v18, %v9694_v7  ;;  %v5352_v32 = vadd.f32 %v5319_v9, %v5251_v25  ;;  %v4437_v49 = vpop.f32.mrb[23].mxu1 }
 0x39c   : > { %v5624_v50 = vpop.eup %5623  ;;  %5625 = vrcp.f32 %v4753_v53  ;;  %v4754_v21 = vadd.f32 1.0, %v5622_v12  ;;  %v4588_v36 = vmul.f32 %v5351_v20, %v9694_v7  ;;  %v5353_v6 = vadd.f32 %v4437_v49, %v3945_v15 }
 0x39d   : > { %5627 = vrcp.f32 %v4751_v60  ;;  %v4752_v63 = vadd.f32 1.0, %v5624_v50  ;;  %v9732_v40 = vadd.f32 %v9703_v3, %v4590_v22  ;;  %v4591_v52 = vmul.f32 %v5352_v32, %v9694_v7 }
 0x39e   : > { %5629 = vrcp.f32 %v4754_v21  ;;  %v9736_v46 = vadd.f32 %v9703_v3, %v4588_v36  ;;  %v4589_v25 = vmul.f32 %v5353_v6, %v9694_v7 }
 0x39f   : > { %5631 = vrcp.f32 %v4752_v63  ;;  %v4661_v11 = vsub.f32 0.0, %v9732_v40  ;;  %v9741_v30 = vadd.f32 %v9703_v3, %v4591_v52 }
 0x3a0   : > { %v4659_v15 = vsub.f32 0.0, %v9736_v46  ;;  %v9746_v47 = vadd.f32 %v9703_v3, %v4589_v25 }
 0x3a1   : > { %v4699_v1 = vmul.f32 1.442695, %v4661_v11  ;;  %v4662_v54 = vsub.f32 0.0, %v9741_v30 }
 0x3a2   : > { %v4695_v16 = vmul.f32 1.442695, %v4659_v15  ;;  %v4660_v48 = vsub.f32 0.0, %v9746_v47 }
 0x3a3   : > { %5633 = vpow2.f32 %v4699_v1  ;;  %v4701_v17 = vmul.f32 1.442695, %v4662_v54 }
 0x3a4   : > { %5635 = vpow2.f32 %v4695_v16  ;;  %v4697_v45 = vmul.f32 1.442695, %v4660_v48 }
 0x3a5   : > { %5637 = vpow2.f32 %v4701_v17 }
 0x3a6   : > { %v5626_v41 = vpop.eup %5625  ;;  %5639 = vpow2.f32 %v4697_v45 }
 0x3a7   : > { %v5628_v34 = vpop.eup %5627  ;;  %v4849_v26 = vmul.f32 %v5626_v41, %v9712_v35 }
 0x3a8   : > { %v5630_v38 = vpop.eup %5629  ;;  %v4847_v18 = vmul.f32 %v5628_v34, %v9716_v58 }
 0x3a9   : > { %v5632_v8 = vpop.eup %5631  ;;  %4882 = vst.msk [vmem:[%s9754_s29 + $0x10] sm:$0xff] %vm4879_vm12, %v4849_v26  ;;  %v4850_v56 = vmul.f32 %v5630_v38, %v9721_v44 }
 0x3aa   : > { %4880 = vst.msk [vmem:[%s9754_s29] sm:$0xff] %vm4879_vm12, %v4847_v18  ;;  %v4848_v53 = vmul.f32 %v5632_v8, %v9725_v19  ;;  %v5322_v20 = vpop.f32.mrb[24].mxu1 }
 0x3ab   : > { %4883 = vst.msk [vmem:[%s9754_s29 + $0x18] sm:$0xff] %vm4879_vm12, %v4850_v56  ;;  %v5354_v35 = vadd.f32 %v5322_v20, %v9683_v24  ;;  %v4450_v58 = vpop.f32.mrb[25].mxu1 }
 0x3ac   : > { %4881 = vst.msk [vmem:[%s9754_s29 + $0x8] sm:$0xff] %vm4879_vm12, %v4848_v53  ;;  %v5355_v9 = vadd.f32 %v4450_v58, %v9685_v55  ;;  %v5323_v12 = vpop.f32.mrb[26].mxu1 }
 0x3ad   : > { %v5634_v60 = vpop.eup %5633  ;;  %v4594_v22 = vmul.f32 %v5354_v35, %v9694_v7  ;;  %v5356_v44 = vadd.f32 %v5323_v12, %v9687_v14  ;;  %v4453_v32 = vpop.f32.mrb[27].mxu1 }
 0x3ae   : > { %v5636_v49 = vpop.eup %5635  ;;  %v4757_v50 = vadd.f32 1.0, %v5634_v60  ;;  %v4592_v19 = vmul.f32 %v5355_v9, %v9694_v7  ;;  %v5357_v21 = vadd.f32 %v4453_v32, %v9689_v62 }
 0x3af   : > { %v5638_v36 = vpop.eup %5637  ;;  %v4755_v24 = vadd.f32 1.0, %v5636_v49  ;;  %v9773_v6 = vadd.f32 %v9703_v3, %v4594_v22  ;;  %v4595_v55 = vmul.f32 %v5356_v44, %v9694_v7 }
 0x3b0   : > { %v5640_v63 = vpop.eup %5639  ;;  %5641 = vrcp.f32 %v4757_v50  ;;  %v4758_v52 = vadd.f32 1.0, %v5638_v36  ;;  %v9777_v25 = vadd.f32 %v9703_v3, %v4592_v19  ;;  %v4593_v14 = vmul.f32 %v5357_v21, %v9694_v7 }
 0x3b1   : > { %5643 = vrcp.f32 %v4755_v24  ;;  %v4756_v11 = vadd.f32 1.0, %v5640_v63  ;;  %v4665_v15 = vsub.f32 0.0, %v9773_v6  ;;  %v9782_v62 = vadd.f32 %v9703_v3, %v4595_v55 }
 0x3b2   : > { %5645 = vrcp.f32 %v4758_v52  ;;  %v4663_v1 = vsub.f32 0.0, %v9777_v25  ;;  %v9786_v54 = vadd.f32 %v9703_v3, %v4593_v14 }
 0x3b3   : > { %5647 = vrcp.f32 %v4756_v11  ;;  %v4707_v16 = vmul.f32 1.442695, %v4665_v15  ;;  %v4666_v48 = vsub.f32 0.0, %v9782_v62 }
 0x3b4   : > { %v4703_v17 = vmul.f32 1.442695, %v4663_v1  ;;  %v4664_v45 = vsub.f32 0.0, %v9786_v54 }
 0x3b5   : > { %5649 = vpow2.f32 %v4707_v16  ;;  %v4709_v41 = vmul.f32 1.442695, %v4666_v48 }
 0x3b6   : > { %5651 = vpow2.f32 %v4703_v17  ;;  %v4705_v34 = vmul.f32 1.442695, %v4664_v45 }
 0x3b7   : > { %5653 = vpow2.f32 %v4709_v41 }
 0x3b8   : > { %5655 = vpow2.f32 %v4705_v34 }
 0x3ba   : > { %v5642_v26 = vpop.eup %5641 }
 0x3bb   : > { %v5644_v38 = vpop.eup %5643  ;;  %v4853_v18 = vmul.f32 %v5642_v26, %v9732_v40 }
 0x3bc   : > { %v5646_v8 = vpop.eup %5645  ;;  %v4851_v56 = vmul.f32 %v5644_v38, %v9736_v46  ;;  %v5326_v53 = vpop.f32.mrb[28].mxu1 }
 0x3bd   : > { %v5648_v20 = vpop.eup %5647  ;;  %4886 = vst.msk [vmem:[%s9754_s29 + $0x30] sm:$0xff] %vm4879_vm12, %v4853_v18  ;;  %v4854_v35 = vmul.f32 %v5646_v8, %v9741_v30  ;;  %v5358_v58 = vadd.f32 %v5326_v53, %v9696_v10  ;;  %v4466_v9 = vpop.f32.mrb[29].mxu1 }
 0x3be   : > { %4884 = vst.msk [vmem:[%s9754_s29 + $0x20] sm:$0xff] %vm4879_vm12, %v4851_v56  ;;  %v4852_v12 = vmul.f32 %v5648_v20, %v9746_v47  ;;  %v5359_v60 = vadd.f32 %v4466_v9, %v9698_v5  ;;  %v5327_v40 = vpop.f32.mrb[30].mxu1 }
 0x3bf   : > { %v5650_v22 = vpop.eup %5649  ;;  %4887 = vst.msk [vmem:[%s9754_s29 + $0x38] sm:$0xff] %vm4879_vm12, %v4854_v35  ;;  %v4598_v46 = vmul.f32 %v5358_v58, %v9694_v7  ;;  %v5360_v44 = vadd.f32 %v5327_v40, %v9705_v29  ;;  %v4469_v32 = vpop.f32.mrb[31].mxu1 }
 0x3c0   : > { %v5652_v49 = vpop.eup %5651  ;;  %4885 = vst.msk [vmem:[%s9754_s29 + $0x28] sm:$0xff] %vm4879_vm12, %v4852_v12  ;;  %v4761_v10 = vadd.f32 1.0, %v5650_v22  ;;  %v4596_v30 = vmul.f32 %v5359_v60, %v9694_v7  ;;  %v5361_v50 = vadd.f32 %v4469_v32, %v9708_v51 }
 0x3c1   : > { %v5654_v47 = vpop.eup %5653  ;;  %v4759_v19 = vadd.f32 1.0, %v5652_v49  ;;  %v9809_v5 = vadd.f32 %v9703_v3, %v4598_v46  ;;  %v4599_v21 = vmul.f32 %v5360_v44, %v9694_v7 }
 0x3c2   : > { %v5656_v36 = vpop.eup %5655  ;;  %5657 = vrcp.f32 %v4761_v10  ;;  %v4762_v24 = vadd.f32 1.0, %v5654_v47  ;;  %v9813_v29 = vadd.f32 %v9703_v3, %v4596_v30  ;;  %v4597_v55 = vmul.f32 %v5361_v50, %v9694_v7 }
 0x3c3   : > { %5659 = vrcp.f32 %v4759_v19  ;;  %v4760_v63 = vadd.f32 1.0, %v5656_v36  ;;  %v4669_v52 = vsub.f32 0.0, %v9809_v5  ;;  %v9818_v51 = vadd.f32 %v9703_v3, %v4599_v21 }
 0x3c4   : > { %5661 = vrcp.f32 %v4762_v24  ;;  %v4667_v14 = vsub.f32 0.0, %v9813_v29  ;;  %v9822_v11 = vadd.f32 %v9703_v3, %v4597_v55 }
 0x3c5   : > { %5663 = vrcp.f32 %v4760_v63  ;;  %v4715_v15 = vmul.f32 1.442695, %v4669_v52  ;;  %v4670_v1 = vsub.f32 0.0, %v9818_v51 }
 0x3c6   : > { %v4711_v16 = vmul.f32 1.442695, %v4667_v14  ;;  %v4668_v48 = vsub.f32 0.0, %v9822_v11 }
 0x3c7   : > { %5665 = vpow2.f32 %v4715_v15  ;;  %v4717_v17 = vmul.f32 1.442695, %v4670_v1 }
 0x3c8   : > { %5667 = vpow2.f32 %v4711_v16  ;;  %v4713_v45 = vmul.f32 1.442695, %v4668_v48 }
 0x3c9   : > { %5669 = vpow2.f32 %v4717_v17 }
 0x3ca   : > { %5671 = vpow2.f32 %v4713_v45 }
 0x3cc   : > { %v5658_v41 = vpop.eup %5657 }
 0x3cd   : > { %v5660_v34 = vpop.eup %5659  ;;  %v4857_v26 = vmul.f32 %v5658_v41, %v9773_v6 }
 0x3ce   : > { %v5662_v38 = vpop.eup %5661  ;;  %v4855_v18 = vmul.f32 %v5660_v34, %v9777_v25  ;;  %v5330_v8 = vpop.f32.mrb[0].mxu1 }
 0x3cf   : > { %v5664_v56 = vpop.eup %5663  ;;  %4890 = vst.msk [vmem:[%s9754_s29 + $0x50] sm:$0xff] %vm4879_vm12, %v4857_v26  ;;  %v4858_v53 = vmul.f32 %v5662_v38, %v9782_v62  ;;  %v5362_v20 = vadd.f32 %v5330_v8, %v9542_v59  ;;  %v4482_v35 = vpop.f32.mrb[1].mxu1 }
 0x3d0   : > { %4888 = vst.msk [vmem:[%s9754_s29 + $0x40] sm:$0xff] %vm4879_vm12, %v4855_v18  ;;  %v4856_v58 = vmul.f32 %v5664_v56, %v9786_v54  ;;  %v5363_v9 = vadd.f32 %v4482_v35, %v9548_v33  ;;  %v5331_v6 = vpop.f32.mrb[2].mxu1 }
 0x3d1   : > { %v5666_v12 = vpop.eup %5665  ;;  %4891 = vst.msk [vmem:[%s9754_s29 + $0x58] sm:$0xff] %vm4879_vm12, %v4858_v53  ;;  %v4602_v25 = vmul.f32 %v5362_v20, %v9694_v7  ;;  %v5364_v60 = vadd.f32 %v5331_v6, %v9555_v2  ;;  %v4485_v40 = vpop.f32.mrb[3].mxu1 }
 0x3d2   : > { %v5668_v22 = vpop.eup %5667  ;;  %4889 = vst.msk [vmem:[%s9754_s29 + $0x48] sm:$0xff] %vm4879_vm12, %v4856_v58  ;;  %v4765_v59 = vadd.f32 1.0, %v5666_v12  ;;  %v4600_v62 = vmul.f32 %v5363_v9, %v9694_v7  ;;  %v5365_v46 = vadd.f32 %v4485_v40, %v9563_v39 }
 0x3d3   : > { %v5670_v54 = vpop.eup %5669  ;;  %v4763_v44 = vadd.f32 1.0, %v5668_v22  ;;  %v9845_v33 = vadd.f32 %v9703_v3, %v4602_v25  ;;  %v4603_v32 = vmul.f32 %v5364_v60, %v9694_v7 }
 0x3d4   : > { %v5672_v49 = vpop.eup %5671  ;;  %5673 = vrcp.f32 %v4765_v59  ;;  %v4766_v10 = vadd.f32 1.0, %v5670_v54  ;;  %v9849_v2 = vadd.f32 %v9703_v3, %v4600_v62  ;;  %v4601_v30 = vmul.f32 %v5365_v46, %v9694_v7 }
 0x3d5   : > { %5675 = vrcp.f32 %v4763_v44  ;;  %v4764_v50 = vadd.f32 1.0, %v5672_v49  ;;  %v4673_v47 = vsub.f32 0.0, %v9845_v33  ;;  %v9854_v39 = vadd.f32 %v9703_v3, %v4603_v32 }
 0x3d6   : > { %5677 = vrcp.f32 %v4766_v10  ;;  %v4671_v19 = vsub.f32 0.0, %v9849_v2  ;;  %v9858_v21 = vadd.f32 %v9703_v3, %v4601_v30 }
 0x3d7   : > { %5679 = vrcp.f32 %v4764_v50  ;;  %v4723_v36 = vmul.f32 1.442695, %v4673_v47  ;;  %v4674_v24 = vsub.f32 0.0, %v9854_v39 }
 0x3d8   : > { %v4719_v55 = vmul.f32 1.442695, %v4671_v19  ;;  %v4672_v63 = vsub.f32 0.0, %v9858_v21 }
 0x3d9   : > { %5681 = vpow2.f32 %v4723_v36  ;;  %v4725_v52 = vmul.f32 1.442695, %v4674_v24 }
 0x3da   : > { %5683 = vpow2.f32 %v4719_v55  ;;  %v4721_v14 = vmul.f32 1.442695, %v4672_v63 }
 0x3db   : > { %5685 = vpow2.f32 %v4725_v52 }
 0x3dc   : > { %5687 = vpow2.f32 %v4721_v14 }
 0x3de   : > { %v5674_v15 = vpop.eup %5673 }
 0x3df   : > { %v5676_v1 = vpop.eup %5675  ;;  %v4861_v16 = vmul.f32 %v5674_v15, %v9809_v5 }
 0x3e0   : > { %v5678_v48 = vpop.eup %5677  ;;  %v4859_v17 = vmul.f32 %v5676_v1, %v9813_v29 }
 0x3e1   : > { %v5680_v45 = vpop.eup %5679  ;;  %4894 = vst.msk [vmem:[%s9754_s29 + $0x70] sm:$0xff] %vm4879_vm12, %v4861_v16  ;;  %v4862_v41 = vmul.f32 %v5678_v48, %v9818_v51  ;;  %v5334_v26 = vpop.f32.mrb[4].mxu1 }
 0x3e2   : > { %4892 = vst.msk [vmem:[%s9754_s29 + $0x60] sm:$0xff] %vm4879_vm12, %v4859_v17  ;;  %v4860_v34 = vmul.f32 %v5680_v45, %v9822_v11  ;;  %v5366_v18 = vadd.f32 %v5334_v26, %v9652_v27  ;;  %v4498_v8 = vpop.f32.mrb[5].mxu1 }
 0x3e3   : > { %v5682_v38 = vpop.eup %5681  ;;  %4895 = vst.msk [vmem:[%s9754_s29 + $0x78] sm:$0xff] %vm4879_vm12, %v4862_v41  ;;  %v5367_v56 = vadd.f32 %v4498_v8, %v9655_v37  ;;  %v5335_v53 = vpop.f32.mrb[6].mxu1 }
 0x3e4   : > { %v5684_v5 = vpop.eup %5683  ;;  %4893 = vst.msk [vmem:[%s9754_s29 + $0x68] sm:$0xff] %vm4879_vm12, %v4860_v34  ;;  %v4769_v29 = vadd.f32 1.0, %v5682_v38  ;;  %v4606_v35 = vmul.f32 %v5366_v18, %v9694_v7  ;;  %v5368_v11 = vadd.f32 %v5335_v53, %v9657_v28  ;;  %v4501_v58 = vpop.f32.mrb[7].mxu1 }
 0x3e5   : > { %v5686_v20 = vpop.eup %5685  ;;  %v4767_v51 = vadd.f32 1.0, %v5684_v5  ;;  %v4604_v27 = vmul.f32 %v5367_v56, %v9694_v7  ;;  %v5369_v12 = vadd.f32 %v4501_v58, %v9660_v23 }
 0x3e6   : > { %v5688_v9 = vpop.eup %5687  ;;  %5689 = vrcp.f32 %v4769_v29  ;;  %v4770_v6 = vadd.f32 1.0, %v5686_v20  ;;  %v9881_v60 = vadd.f32 %v9703_v3, %v4606_v35  ;;  %v4607_v37 = vmul.f32 %v5368_v11, %v9694_v7 }
 0x3e7   : > { %5691 = vrcp.f32 %v4767_v51  ;;  %v4768_v25 = vadd.f32 1.0, %v5688_v9  ;;  %v9885_v40 = vadd.f32 %v9703_v3, %v4604_v27  ;;  %v4605_v28 = vmul.f32 %v5369_v12, %v9694_v7 }
 0x3e8   : > { %5693 = vrcp.f32 %v4770_v6  ;;  %v4677_v22 = vsub.f32 0.0, %v9881_v60  ;;  %v9890_v59 = vadd.f32 %v9703_v3, %v4607_v37 }
 0x3e9   : > { %5695 = vrcp.f32 %v4768_v25  ;;  %v4675_v23 = vsub.f32 0.0, %v9885_v40  ;;  %v9894_v62 = vadd.f32 %v9703_v3, %v4605_v28 }
 0x3ea   : > { %v4731_v46 = vmul.f32 1.442695, %v4677_v22  ;;  %v4678_v54 = vsub.f32 0.0, %v9890_v59 }
 0x3eb   : > { %v4727_v44 = vmul.f32 1.442695, %v4675_v23  ;;  %v4676_v32 = vsub.f32 0.0, %v9894_v62 }
 0x3ec   : > { %5697 = vpow2.f32 %v4731_v46  ;;  %v4733_v49 = vmul.f32 1.442695, %v4678_v54 }
 0x3ed   : > { %5699 = vpow2.f32 %v4727_v44  ;;  %v4729_v10 = vmul.f32 1.442695, %v4676_v32 }
 0x3ee   : > { %5701 = vpow2.f32 %v4733_v49 }
 0x3ef   : > { %5703 = vpow2.f32 %v4729_v10 }
 0x3f0   : > { %v5690_v30 = vpop.eup %5689 }
 0x3f1   : > { %v5692_v50 = vpop.eup %5691  ;;  %v4865_v47 = vmul.f32 %v5690_v30, %v9845_v33 }
 0x3f2   : > { %v5694_v19 = vpop.eup %5693  ;;  %v4863_v36 = vmul.f32 %v5692_v50, %v9849_v2 }
 0x3f3   : > { %v5696_v24 = vpop.eup %5695  ;;  %4898 = vst.msk [vmem:[%s9754_s29 + $0x90] sm:$0xff] %vm4879_vm12, %v4865_v47  ;;  %v4866_v55 = vmul.f32 %v5694_v19, %v9854_v39  ;;  %v5338_v63 = vpop.f32.mrb[8].mxu1 }
 0x3f4   : > { %4896 = vst.msk [vmem:[%s9754_s29 + $0x80] sm:$0xff] %vm4879_vm12, %v4863_v36  ;;  %v4864_v52 = vmul.f32 %v5696_v24, %v9858_v21  ;;  %v5370_v14 = vadd.f32 %v5338_v63, %v9667_v57  ;;  %v4514_v15 = vpop.f32.mrb[9].mxu1 }
 0x3f5   : > { %4899 = vst.msk [vmem:[%s9754_s29 + $0x98] sm:$0xff] %vm4879_vm12, %v4866_v55  ;;  %v5371_v33 = vadd.f32 %v4514_v15, %v9669_v61  ;;  %v5339_v1 = vpop.f32.mrb[10].mxu1 }
 0x3f6   : > { %4897 = vst.msk [vmem:[%s9754_s29 + $0x88] sm:$0xff] %vm4879_vm12, %v4864_v52  ;;  %v4610_v2 = vmul.f32 %v5370_v14, %v9694_v7  ;;  %v5372_v16 = vadd.f32 %v5339_v1, %v9671_v0  ;;  %v4517_v39 = vpop.f32.mrb[11].mxu1  ;;  %v5698_v48 = vpop.eup %5697 }
 0x3f7   : > { %v4608_v17 = vmul.f32 %v5371_v33, %v9694_v7  ;;  %v5373_v21 = vadd.f32 %v4517_v39, %v9673_v42  ;;  %v5700_v45 = vpop.eup %5699  ;;  %v4773_v57 = vadd.f32 1.0, %v5698_v48 }
 0x3f8   : > { %v9917_v41 = vadd.f32 %v9703_v3, %v4610_v2  ;;  %v4611_v61 = vmul.f32 %v5372_v16, %v9694_v7  ;;  %v5702_v34 = vpop.eup %5701  ;;  %v4771_v26 = vadd.f32 1.0, %v5700_v45 }
 0x3f9   : > { %v9921_v38 = vadd.f32 %v9703_v3, %v4608_v17  ;;  %v4609_v0 = vmul.f32 %v5373_v21, %v9694_v7  ;;  %v5704_v18 = vpop.eup %5703  ;;  %5705 = vrcp.f32 %v4773_v57  ;;  %v4774_v8 = vadd.f32 1.0, %v5702_v34 }
 0x3fa   : > { %v4681_v5 = vsub.f32 0.0, %v9917_v41  ;;  %v9926_v42 = vadd.f32 %v9703_v3, %v4611_v61  ;;  %5707 = vrcp.f32 %v4771_v26  ;;  %v4772_v29 = vadd.f32 1.0, %v5704_v18 }
 0x3fb   : > { %v4679_v56 = vsub.f32 0.0, %v9921_v38  ;;  %v9930_v53 = vadd.f32 %v9703_v3, %v4609_v0  ;;  %v5342_v20 = vpop.f32.mrb[12].mxu1  ;;  %5709 = vrcp.f32 %v4774_v8 }
 0x3fc   : > { %v4739_v51 = vmul.f32 1.442695, %v4681_v5  ;;  %v4682_v35 = vsub.f32 0.0, %v9926_v42  ;;  %v5374_v11 = vadd.f32 %v5342_v20, %v9675_v31  ;;  %v4530_v58 = vpop.f32.mrb[13].mxu1  ;;  %5711 = vrcp.f32 %v4772_v29 }
 0x3fd   : > { %v4735_v9 = vmul.f32 1.442695, %v4679_v56  ;;  %v4680_v6 = vsub.f32 0.0, %v9930_v53  ;;  %v5375_v27 = vadd.f32 %v4530_v58, %v9677_v13  ;;  %v5343_v12 = vpop.f32.mrb[14].mxu1 }
 0x3fe   : > { %5713 = vpow2.f32 %v4739_v51  ;;  %v4741_v25 = vmul.f32 1.442695, %v4682_v35  ;;  %v4614_v37 = vmul.f32 %v5374_v11, %v9694_v7  ;;  %v5376_v28 = vadd.f32 %v5343_v12, %v9679_v43  ;;  %v4533_v22 = vpop.f32.mrb[15].mxu1 }
 0x3ff   : > { %5715 = vpow2.f32 %v4735_v9  ;;  %v4737_v23 = vmul.f32 1.442695, %v4680_v6  ;;  %v4612_v46 = vmul.f32 %v5375_v27, %v9694_v7  ;;  %v5377_v31 = vadd.f32 %v4533_v22, %v9681_v4 }
 0x400   : > { %5717 = vpow2.f32 %v4741_v25  ;;  %v9941_v54 = vadd.f32 %v9703_v3, %v4614_v37  ;;  %v4615_v13 = vmul.f32 %v5376_v28, %v9694_v7 }
 0x401   : > { %5719 = vpow2.f32 %v4737_v23  ;;  %v9945_v44 = vadd.f32 %v9703_v3, %v4612_v46  ;;  %v4613_v32 = vmul.f32 %v5377_v31, %v9694_v7 }
 0x402   : > { %v4685_v43 = vsub.f32 0.0, %v9941_v54  ;;  %v9950_v49 = vadd.f32 %v9703_v3, %v4615_v13 }
 0x403   : > { %v4683_v4 = vsub.f32 0.0, %v9945_v44  ;;  %v9954_v10 = vadd.f32 %v9703_v3, %v4613_v32  ;;  %v5706_v30 = vpop.eup %5705 }
 0x404   : > { %v4747_v50 = vmul.f32 1.442695, %v4685_v43  ;;  %v4686_v47 = vsub.f32 0.0, %v9950_v49  ;;  %v5708_v19 = vpop.eup %5707  ;;  %v4869_v36 = vmul.f32 %v5706_v30, %v9881_v60 }
 0x405   : > { %v4743_v7 = vmul.f32 1.442695, %v4683_v4  ;;  %v4684_v24 = vsub.f32 0.0, %v9954_v10  ;;  %v5710_v55 = vpop.eup %5709  ;;  %v4867_v63 = vmul.f32 %v5708_v19, %v9885_v40 }
 0x406   : > { %5721 = vpow2.f32 %v4747_v50  ;;  %v4749_v52 = vmul.f32 1.442695, %v4686_v47  ;;  %v5712_v3 = vpop.eup %5711  ;;  %4902 = vst.msk [vmem:[%s9754_s29 + $0xb0] sm:$0xff] %vm4879_vm12, %v4869_v36  ;;  %v4870_v14 = vmul.f32 %v5710_v55, %v9890_v59 }
 0x407   : > { %5723 = vpow2.f32 %v4743_v7  ;;  %v4745_v15 = vmul.f32 1.442695, %v4684_v24  ;;  %4900 = vst.msk [vmem:[%s9754_s29 + $0xa0] sm:$0xff] %vm4879_vm12, %v4867_v63  ;;  %v4868_v60 = vmul.f32 %v5712_v3, %v9894_v62 }
 0x408   : > { %v5714_v33 = vpop.eup %5713  ;;  %5725 = vpow2.f32 %v4749_v52  ;;  %4903 = vst.msk [vmem:[%s9754_s29 + $0xb8] sm:$0xff] %vm4879_vm12, %v4870_v14 }
 0x409   : > { %v5716_v1 = vpop.eup %5715  ;;  %v4777_v40 = vadd.f32 1.0, %v5714_v33  ;;  %5727 = vpow2.f32 %v4745_v15  ;;  %4901 = vst.msk [vmem:[%s9754_s29 + $0xa8] sm:$0xff] %vm4879_vm12, %v4868_v60 }
 0x40a   : > { %v5718_v2 = vpop.eup %5717  ;;  %v4775_v16 = vadd.f32 1.0, %v5716_v1 }
 0x40b   : > { %v5720_v39 = vpop.eup %5719  ;;  %5729 = vrcp.f32 %v4777_v40  ;;  %v4778_v59 = vadd.f32 1.0, %v5718_v2 }
 0x40c   : > { %5731 = vrcp.f32 %v4775_v16  ;;  %v4776_v48 = vadd.f32 1.0, %v5720_v39 }
 0x40d   : > { %5733 = vrcp.f32 %v4778_v59 }
 0x40e   : > { %5735 = vrcp.f32 %v4776_v48 }
 0x410   : > { %v5722_v17 = vpop.eup %5721 }
 0x411   : > { %v5724_v21 = vpop.eup %5723  ;;  %v4781_v62 = vadd.f32 1.0, %v5722_v17 }
 0x412   : > { %v5726_v45 = vpop.eup %5725  ;;  %v4779_v57 = vadd.f32 1.0, %v5724_v21 }
 0x413   : > { %v5728_v61 = vpop.eup %5727  ;;  %5737 = vrcp.f32 %v4781_v62  ;;  %v4782_v34 = vadd.f32 1.0, %v5726_v45 }
 0x414   : > { %5739 = vrcp.f32 %v4779_v57  ;;  %v4780_v26 = vadd.f32 1.0, %v5728_v61 }
 0x415   : > { %v5730_v0 = vpop.eup %5729  ;;  %5741 = vrcp.f32 %v4782_v34 }
 0x416   : > { %v5732_v18 = vpop.eup %5731  ;;  %v4873_v8 = vmul.f32 %v5730_v0, %v9917_v41  ;;  %5743 = vrcp.f32 %v4780_v26 }
 0x417   : > { %v5734_v5 = vpop.eup %5733  ;;  %v4871_v29 = vmul.f32 %v5732_v18, %v9921_v38 }
 0x418   : > { %v5736_v56 = vpop.eup %5735  ;;  %4906 = vst.msk [vmem:[%s9754_s29 + $0xd0] sm:$0xff] %vm4879_vm12, %v4873_v8  ;;  %v4874_v20 = vmul.f32 %v5734_v5, %v9926_v42 }
 0x419   : > { %4904 = vst.msk [vmem:[%s9754_s29 + $0xc0] sm:$0xff] %vm4879_vm12, %v4871_v29  ;;  %v4872_v51 = vmul.f32 %v5736_v56, %v9930_v53 }
 0x41a   : > { %4907 = vst.msk [vmem:[%s9754_s29 + $0xd8] sm:$0xff] %vm4879_vm12, %v4874_v20 }
 0x41b   : > { %4905 = vst.msk [vmem:[%s9754_s29 + $0xc8] sm:$0xff] %vm4879_vm12, %v4872_v51 }
 0x41d   : > { %v5738_v41 = vpop.eup %5737 }
 0x41e   : > { %v5740_v38 = vpop.eup %5739  ;;  %v4877_v35 = vmul.f32 %v5738_v41, %v9941_v54 }
 0x41f   : > { %v5742_v42 = vpop.eup %5741  ;;  %v4875_v11 = vmul.f32 %v5740_v38, %v9945_v44 }
 0x420   : > { %v5744_v58 = vpop.eup %5743  ;;  %4910 = vst.msk [vmem:[%s9754_s29 + $0xf0] sm:$0xff] %vm4879_vm12, %v4877_v35  ;;  %v4878_v53 = vmul.f32 %v5742_v42, %v9950_v49 }
 0x421   : > { %4908 = vst.msk [vmem:[%s9754_s29 + $0xe0] sm:$0xff] %vm4879_vm12, %v4875_v11  ;;  %v4876_v9 = vmul.f32 %v5744_v58, %v9954_v10 }
 0x422   : > { %4911 = vst.msk [vmem:[%s9754_s29 + $0xf8] sm:$0xff] %vm4879_vm12, %v4878_v53 }
 0x423   : > { %4909 = vst.msk [vmem:[%s9754_s29 + $0xe8] sm:$0xff] %vm4879_vm12, %v4876_v9 }
 0x424   : > { %5758 = shalt.err (!%p5755_p3)
}
 0x425   : > { %s5759_s20 = scalar_lea.hbm %s9992_s15, 4096  ;;  %s5763_s23 = scalar_lea.hbm %s10053_s7, 8192 }
 0x426   : > { %p5760_p4 = scmp.ne.s32.totalorder %s9992_s15, %s5759_s20  ;;  %p5764_p9 = scmp.lt.u32.totalorder %s9992_s15, %s10053_s7 }
 0x427   : > { %p5765_p10 = scmp.lt.u32.totalorder %s5763_s23, %s5759_s20  ;;  %p5767_p12 = scmp.lt.u32.totalorder %s5759_s20, %s9992_s15 }
 0x428   : > { %p5761_p7 = pnand %p5760_p4, %p5890_p5 }
 0x429   : > { %p5766_p11 = por %p5765_p10, %p5764_p9 }
 0x42a   : > { %p5762_p8 = pneg %p5761_p7 }
 0x42b   : > { %p5768_p13 = por %p5767_p12, %p5766_p11 }
 0x42d   : > { %p5769_p0 = pnand %p5768_p13, %p5762_p8 }
 0x42f   : > { %5772 = shalt.err (!%p5769_p0)
}
 0x430   : > { %s5810_s13 = smov 128   ;;  %s5811_s14 = smov 8  }
 0x431   : > { %5448 = dma.vmem_to_hbm [thread:$0]  (%p5890_p5), %s9994_s9, 4096, %s9992_s15, %s10005_s28, %s5810_s13, %s5810_s13, %s5811_s14  }
 0x432 PF: > { %p5454_p1 = scmp.ge.s32.totalorder %s5807_s27, 2  ;;  %s4941_s16 = sand.u32 1, %s5795_s24  }
 0x433   : > { %s4942_s17 = scalar_lea.sflag [#allocation3], %s4941_s16 }
 0x434   : > { %p5451_p2 = pnand %p5454_p1, %p5894_p6 }
 0x436   : > { %5790 = dma.done.wait (!%p5451_p2), %s4942_s17, 4096  }
 0x437   : > { %5792 = vsyncadd (!%p5451_p2), %s4942_s17, 4294963200  ;;  %p17_p3 = scmp.ge.s32.totalorder %s5877_s30, 4   ;;  %s10423_s24 = smov %s5799_s25 }
 0x438   : > { %s10424_s25 = smov %s5803_s26  ;;  %s10425_s26 = smov %s5888_s10 }
 0x439   : > { %s10426_s27 = smov %s5877_s30  ;;  %19 = sbr.rel (!%p17_p3) target bundleno = 3 (0x3), region = 86 }
 0x440   :  { %4947 = vsyncpa [#allocation3], 1 }
 0x441   :  { %4949 = vsyncpa [#allocation3 + $0x1], 1 }

</bundles_post_ra>
